<compile_context>
chip_gen: v7x
topology: tpu7x:2x2x1
jax: 0.10.0
libtpu: 0.0.40
codegen_flags: <defaults>
</compile_context>

<pallas_src>
import functools
import math

import jax
import jax.numpy as jnp
from jax import lax
from jax.experimental import pallas as pl
from jax.experimental.pallas import tpu as pltpu

# ---------------- small synthetic config (RobertaModel-shaped) ----------------
VOCAB = 64        # word embedding rows
MAX_POS = 32      # position embedding rows
HID = 32          # hidden_dim (fc input)
NH = 4            # attention heads
DH = HID // NH
FFN = 64          # intermediate size
NLAYERS = 2
OUT_DIM = 2       # output_dim
LN_EPS = 1e-5     # graphcodebert / roberta layer_norm_eps
NEG_INF = float(jnp.finfo(jnp.float32).min)


# ------------------------------ in-kernel helpers ------------------------------
def _erf_approx(x):
    # Abramowitz & Stegun 7.1.26 (|err| < 1.5e-7): effectively exact erf at f32
    # precision, built only from exp/mul/add so it lowers cleanly in Mosaic.
    # TODO(synk): replace with native erf lowering if/when available for exact parity.
    p = 0.3275911
    a1, a2, a3, a4, a5 = 0.254829592, -0.284496736, 1.421413741, -1.453152027, 1.061405429
    ax = jnp.abs(x)
    t = 1.0 / (1.0 + p * ax)
    poly = ((((a5 * t + a4) * t + a3) * t + a2) * t + a1) * t
    y = 1.0 - poly * jnp.exp(-ax * ax)
    return jnp.where(x >= 0.0, y, -y)


def _gelu_exact(x):
    return 0.5 * x * (1.0 + _erf_approx(x * (1.0 / math.sqrt(2.0))))


def _layernorm(x, g, b):
    mu = jnp.mean(x, axis=-1, keepdims=True)
    var = jnp.mean((x - mu) ** 2, axis=-1, keepdims=True)
    return (x - mu) * lax.rsqrt(var + LN_EPS) * g + b


def _sigmoid(x):
    # explicit logistic — exp goes to the EUP slot, add/div on VPU
    return 1.0 / (1.0 + jnp.exp(-x))


# --------------------------------- fused kernel --------------------------------
def _fused_forward_kernel(posidx_ref, attn_ref, wemb_ref, pemb_ref, temb_ref,
                          elng_ref, elnb_ref,
                          wqkv_ref, bqkv_ref, wo_ref, bo_ref, ln1g_ref, ln1b_ref,
                          wi_ref, bi_ref, wo2_ref, bo2_ref, ln2g_ref, ln2b_ref,
                          fcw_ref, fcb_ref, out_ref, *, B, S, nlayers):
    f32 = jnp.float32
    H = HID
    scale = 1.0 / math.sqrt(DH)

    posidx = posidx_ref[...]                    # [B,S] int32
    attn = attn_ref[...]                        # [B,S,S] float 0/1
    wemb = wemb_ref[...]                        # [B,S,H]

    # ---- graph-guided embedding mixing (masks built in-kernel from [B,S] vectors) ----
    nodes = (posidx == 0).astype(f32)           # [B,S]
    token = (posidx >= 2).astype(f32)           # [B,S]
    m = nodes[:, :, None] * token[:, None, :] * attn               # bool AND as float product
    m = m / (m.sum(axis=-1, keepdims=True) + 1e-10)
    avg = jnp.einsum("bqk,bkh->bqh", m, wemb, preferred_element_type=f32)
    nodes3 = nodes[:, :, None]
    inputs_embeds = wemb * (1.0 - nodes3) + avg * nodes3

    # ---- RobertaEmbeddings (token_type 0, eval-mode dropout == identity) ----
    emb = inputs_embeds + pemb_ref[...] + temb_ref[...]
    x = _layernorm(emb.reshape(B * S, H), elng_ref[...], elnb_ref[...])   # [B*S, H]

    # HF extended attention mask, built in-kernel (never materialized in HBM).
    ext_bias = (1.0 - attn) * NEG_INF                                      # [B,S,S]

    # ---- encoder layers (statically unrolled; weights indexed with static l) ----
    for l in range(nlayers):
        # fused QKV projection: one MXU pass with N = 3H
        qkv = jnp.dot(x, wqkv_ref[l], preferred_element_type=f32) + bqkv_ref[l]   # [B*S, 3H]
        wo_l = wo_ref[l]                                                          # [H, H]

        acc = None
        for h in range(NH):                      # static per-head loop (NH=4)
            qh = qkv[:, h * DH:(h + 1) * DH].reshape(B, S, DH)
            kh = qkv[:, H + h * DH:H + (h + 1) * DH].reshape(B, S, DH)
            vh = qkv[:, 2 * H + h * DH:2 * H + (h + 1) * DH].reshape(B, S, DH)
            s = jnp.einsum("bqd,bkd->bqk", qh, kh, preferred_element_type=f32) * scale
            s = s + ext_bias
            s = s - s.max(axis=-1, keepdims=True)
            p = jnp.exp(s)
            p = p / p.sum(axis=-1, keepdims=True)
            ctx = jnp.einsum("bqk,bkd->bqd", p, vh, preferred_element_type=f32)
            ctx = ctx.reshape(B * S, DH)
            # concat_h(ctx_h) @ Wo == sum_h ctx_h @ Wo[h-block]  (keeps lanes on H)
            part = jnp.dot(ctx, wo_l[h * DH:(h + 1) * DH, :], preferred_element_type=f32)
            acc = part if acc is None else acc + part

        attn_out = acc + bo_ref[l]
        h1 = _layernorm(attn_out + x, ln1g_ref[l], ln1b_ref[l])

        ff = jnp.dot(h1, wi_ref[l], preferred_element_type=f32) + bi_ref[l]
        ff = _gelu_exact(ff)                                   # fused in-kernel GELU
        ff2 = jnp.dot(ff, wo2_ref[l], preferred_element_type=f32) + bo2_ref[l]
        x = _layernorm(ff2 + h1, ln2g_ref[l], ln2b_ref[l])

    # ---- classifier head epilogue: sequence_output[:, 0, :] -> fc -> sigmoid ----
    pooled = x.reshape(B, S, H)[:, 0, :]                       # [B, H]
    logits = jnp.dot(pooled, fcw_ref[...], preferred_element_type=f32) + fcb_ref[...]
    out_ref[...] = _sigmoid(logits)


# --------------------------- parameters (deterministic) ------------------------
def init_params(key):
    def normal(k, shape):
        return 0.02 * jax.random.normal(k, shape, jnp.float32)

    ks = jax.random.split(key, 8)
    return {
        "word_emb": normal(ks[0], (VOCAB, HID)),
        "pos_emb": normal(ks[1], (MAX_POS, HID)),
        "type_emb": normal(ks[2], (1, HID)),
        "emb_ln_g": jnp.ones((1, HID), jnp.float32),
        "emb_ln_b": jnp.zeros((1, HID), jnp.float32),
        # per-layer weights stacked on a leading layer axis (all VMEM-resident at once)
        "wqkv": normal(ks[3], (NLAYERS, HID, 3 * HID)),
        "bqkv": jnp.zeros((NLAYERS, 1, 3 * HID), jnp.float32),
        "wo": normal(ks[4], (NLAYERS, HID, HID)),
        "bo": jnp.zeros((NLAYERS, 1, HID), jnp.float32),
        "ln1_g": jnp.ones((NLAYERS, 1, HID), jnp.float32),
        "ln1_b": jnp.zeros((NLAYERS, 1, HID), jnp.float32),
        "wi": normal(ks[5], (NLAYERS, HID, FFN)),
        "bi": jnp.zeros((NLAYERS, 1, FFN), jnp.float32),
        "wo2": normal(ks[6], (NLAYERS, FFN, HID)),
        "bo2": jnp.zeros((NLAYERS, 1, HID), jnp.float32),
        "ln2_g": jnp.ones((NLAYERS, 1, HID), jnp.float32),
        "ln2_b": jnp.zeros((NLAYERS, 1, HID), jnp.float32),
        "fc_w": normal(ks[7], (HID, OUT_DIM)),
        "fc_b": jnp.zeros((1, OUT_DIM), jnp.float32),
    }


# ------------------------------- forward pass ----------------------------------
@functools.partial(jax.jit, static_argnums=())
def graphcodebert_classifier_forward(params, input_ids, position_idx, attn_mask):
    B, S = input_ids.shape
    attn_f = attn_mask.astype(jnp.float32)                             # [B,S,S]

    # Embedding-table gathers stay as plain-JAX glue (data-dependent row gather).
    word_emb = jnp.take(params["word_emb"], input_ids, axis=0)         # [B,S,H]
    pos_emb = jnp.take(params["pos_emb"], position_idx, axis=0)        # [B,S,H]

    kernel = functools.partial(_fused_forward_kernel, B=B, S=S, nlayers=NLAYERS)
    return pl.pallas_call(
        kernel,
        out_shape=jax.ShapeDtypeStruct((B, OUT_DIM), jnp.float32),
        compiler_params=pltpu.CompilerParams(vmem_limit_bytes=32 * 1024 * 1024),
    )(
        position_idx.astype(jnp.int32), attn_f, word_emb, pos_emb,
        params["type_emb"], params["emb_ln_g"], params["emb_ln_b"],
        params["wqkv"], params["bqkv"], params["wo"], params["bo"],
        params["ln1_g"], params["ln1_b"], params["wi"], params["bi"],
        params["wo2"], params["bo2"], params["ln2_g"], params["ln2_b"],
        params["fc_w"], params["fc_b"],
    )


# ----------------------------------- main --------------------------------------
if __name__ == "__main__":
    key = jax.random.PRNGKey(0)
    pkey, ikey = jax.random.split(key)
    params = init_params(pkey)

    B, S = 2, 16
    input_ids = jax.random.randint(ikey, (B, S), 0, VOCAB, dtype=jnp.int32)
    # GraphCodeBERT convention: code tokens get positions >= 2, DFG nodes 0, padding 1
    pos_row = jnp.array([2, 3, 4, 5, 6, 7, 8, 9, 10, 11, 0, 0, 0, 0, 1, 1], dtype=jnp.int32)
    position_idx = jnp.stack([pos_row, pos_row])                       # [B,S]
    not_pad = position_idx != 1
    attn_mask = not_pad[:, :, None] & not_pad[:, None, :]              # bool [B,S,S]

    out = graphcodebert_classifier_forward(params, input_ids, position_idx, attn_mask)
    out = jax.block_until_ready(out)
    assert out.shape == (B, OUT_DIM) and bool(jnp.all((out >= 0) & (out <= 1)))
    print("KERNEL_OK")
</pallas_src>

<mosaic_0001>
module attributes {stable_mosaic.version = 11 : i64} {
  func.func @_fused_forward_kernel(%arg0: memref<2x16xi32, #tpu.memory_space<vmem>>, %arg1: memref<2x16x16xf32, #tpu.memory_space<vmem>>, %arg2: memref<2x16x32xf32, #tpu.memory_space<vmem>>, %arg3: memref<2x16x32xf32, #tpu.memory_space<vmem>>, %arg4: memref<1x32xf32, #tpu.memory_space<vmem>>, %arg5: memref<1x32xf32, #tpu.memory_space<vmem>>, %arg6: memref<1x32xf32, #tpu.memory_space<vmem>>, %arg7: memref<2x32x96xf32, #tpu.memory_space<vmem>>, %arg8: memref<2x1x96xf32, #tpu.memory_space<vmem>>, %arg9: memref<2x32x32xf32, #tpu.memory_space<vmem>>, %arg10: memref<2x1x32xf32, #tpu.memory_space<vmem>>, %arg11: memref<2x1x32xf32, #tpu.memory_space<vmem>>, %arg12: memref<2x1x32xf32, #tpu.memory_space<vmem>>, %arg13: memref<2x32x64xf32, #tpu.memory_space<vmem>>, %arg14: memref<2x1x64xf32, #tpu.memory_space<vmem>>, %arg15: memref<2x64x32xf32, #tpu.memory_space<vmem>>, %arg16: memref<2x1x32xf32, #tpu.memory_space<vmem>>, %arg17: memref<2x1x32xf32, #tpu.memory_space<vmem>>, %arg18: memref<2x1x32xf32, #tpu.memory_space<vmem>>, %arg19: memref<32x2xf32, #tpu.memory_space<vmem>>, %arg20: memref<1x2xf32, #tpu.memory_space<vmem>>, %arg21: memref<2x2xf32, #tpu.memory_space<vmem>>) attributes {dimension_semantics = [], scalar_prefetch = 0 : i64, scratch_operands = 0 : i64, tpu.core_type = #tpu.core_type<tc>} {
    %c0 = arith.constant 0 : index
    %c0_0 = arith.constant 0 : index
    %0 = vector.load %arg0[%c0, %c0_0] : memref<2x16xi32, #tpu.memory_space<vmem>>, vector<2x16xi32>
    %c0_1 = arith.constant 0 : index
    %c0_2 = arith.constant 0 : index
    %c0_3 = arith.constant 0 : index
    %1 = vector.load %arg1[%c0_1, %c0_2, %c0_3] : memref<2x16x16xf32, #tpu.memory_space<vmem>>, vector<2x16x16xf32>
    %c0_4 = arith.constant 0 : index
    %c0_5 = arith.constant 0 : index
    %c0_6 = arith.constant 0 : index
    %2 = vector.load %arg2[%c0_4, %c0_5, %c0_6] : memref<2x16x32xf32, #tpu.memory_space<vmem>>, vector<2x16x32xf32>
    %c0_i32 = arith.constant 0 : i32
    %3 = vector.broadcast %c0_i32 : i32 to vector<2x16xi32>
    %4 = arith.cmpi eq, %0, %3 : vector<2x16xi32>
    %5 = arith.extui %4 : vector<2x16xi1> to vector<2x16xi32>
    %6 = arith.sitofp %5 : vector<2x16xi32> to vector<2x16xf32>
    %c2_i32 = arith.constant 2 : i32
    %7 = vector.broadcast %c2_i32 : i32 to vector<2x16xi32>
    %8 = arith.cmpi sge, %0, %7 : vector<2x16xi32>
    %9 = arith.extui %8 : vector<2x16xi1> to vector<2x16xi32>
    %10 = arith.sitofp %9 : vector<2x16xi32> to vector<2x16xf32>
    %11 = vector.shape_cast %6 : vector<2x16xf32> to vector<2x16x1xf32>
    %12 = vector.shape_cast %10 : vector<2x16xf32> to vector<2x1x16xf32>
    %13 = vector.broadcast %11 : vector<2x16x1xf32> to vector<2x16x16xf32>
    %14 = vector.broadcast %12 : vector<2x1x16xf32> to vector<2x16x16xf32>
    %15 = arith.mulf %13, %14 : vector<2x16x16xf32>
    %16 = arith.mulf %15, %1 : vector<2x16x16xf32>
    %cst = arith.constant dense<0.000000e+00> : vector<2x16xf32>
    %17 = vector.multi_reduction <add>, %16, %cst [2] : vector<2x16x16xf32> to vector<2x16xf32>
    %18 = vector.shape_cast %17 : vector<2x16xf32> to vector<2x16x1xf32>
    %cst_7 = arith.constant 1.000000e-10 : f32
    %19 = vector.broadcast %cst_7 : f32 to vector<2x16x1xf32>
    %20 = arith.addf %18, %19 : vector<2x16x1xf32>
    %21 = vector.broadcast %20 : vector<2x16x1xf32> to vector<2x16x16xf32>
    %22 = arith.divf %16, %21 : vector<2x16x16xf32>
    "tpu.trace_start"() <{level = 10 : i32, message = "bqk,bkh->bqh"}> : () -> ()
    %cst_8 = arith.constant dense<0.000000e+00> : vector<2x16x32xf32>
    %23 = tpu.matmul %22, %2, %cst_8 {dimension_numbers = #tpu.dot_dimension_numbers<[2], [1], [1], [2], [0, 0, 0, 1, 1, 2], [0], [0]>} : vector<2x16x16xf32>, vector<2x16x32xf32>, vector<2x16x32xf32> -> vector<2x16x32xf32>
    "tpu.trace_stop"() : () -> ()
    %24 = vector.shape_cast %6 : vector<2x16xf32> to vector<2x16x1xf32>
    %cst_9 = arith.constant 1.000000e+00 : f32
    %25 = vector.broadcast %cst_9 : f32 to vector<2x16x1xf32>
    %26 = arith.subf %25, %24 : vector<2x16x1xf32>
    %27 = vector.broadcast %26 : vector<2x16x1xf32> to vector<2x16x32xf32>
    %28 = arith.mulf %2, %27 : vector<2x16x32xf32>
    %29 = vector.broadcast %24 : vector<2x16x1xf32> to vector<2x16x32xf32>
    %30 = arith.mulf %23, %29 : vector<2x16x32xf32>
    %31 = arith.addf %28, %30 : vector<2x16x32xf32>
    %c0_10 = arith.constant 0 : index
    %c0_11 = arith.constant 0 : index
    %c0_12 = arith.constant 0 : index
    %32 = vector.load %arg3[%c0_10, %c0_11, %c0_12] : memref<2x16x32xf32, #tpu.memory_space<vmem>>, vector<2x16x32xf32>
    %33 = arith.addf %31, %32 : vector<2x16x32xf32>
    %c0_13 = arith.constant 0 : index
    %c0_14 = arith.constant 0 : index
    %34 = vector.load %arg4[%c0_13, %c0_14] : memref<1x32xf32, #tpu.memory_space<vmem>>, vector<1x32xf32>
    %35 = vector.shape_cast %34 : vector<1x32xf32> to vector<1x1x32xf32>
    %36 = vector.broadcast %35 : vector<1x1x32xf32> to vector<2x16x32xf32>
    %37 = arith.addf %33, %36 : vector<2x16x32xf32>
    %38 = vector.shape_cast %37 : vector<2x16x32xf32> to vector<32x32xf32>
    %c0_15 = arith.constant 0 : index
    %c0_16 = arith.constant 0 : index
    %39 = vector.load %arg5[%c0_15, %c0_16] : memref<1x32xf32, #tpu.memory_space<vmem>>, vector<1x32xf32>
    %c0_17 = arith.constant 0 : index
    %c0_18 = arith.constant 0 : index
    %40 = vector.load %arg6[%c0_17, %c0_18] : memref<1x32xf32, #tpu.memory_space<vmem>>, vector<1x32xf32>
    %cst_19 = arith.constant dense<0.000000e+00> : vector<32xf32>
    %41 = vector.multi_reduction <add>, %38, %cst_19 [1] : vector<32x32xf32> to vector<32xf32>
    %42 = vector.shape_cast %41 : vector<32xf32> to vector<32x1xf32>
    %cst_20 = arith.constant 3.200000e+01 : f32
    %43 = vector.broadcast %cst_20 : f32 to vector<32x1xf32>
    %44 = arith.divf %42, %43 : vector<32x1xf32>
    %45 = vector.broadcast %44 : vector<32x1xf32> to vector<32x32xf32>
    %46 = arith.subf %38, %45 : vector<32x32xf32>
    %47 = arith.mulf %46, %46 : vector<32x32xf32>
    %cst_21 = arith.constant dense<0.000000e+00> : vector<32xf32>
    %48 = vector.multi_reduction <add>, %47, %cst_21 [1] : vector<32x32xf32> to vector<32xf32>
    %49 = vector.shape_cast %48 : vector<32xf32> to vector<32x1xf32>
    %cst_22 = arith.constant 3.200000e+01 : f32
    %50 = vector.broadcast %cst_22 : f32 to vector<32x1xf32>
    %51 = arith.divf %49, %50 : vector<32x1xf32>
    %52 = vector.broadcast %44 : vector<32x1xf32> to vector<32x32xf32>
    %53 = arith.subf %38, %52 : vector<32x32xf32>
    %cst_23 = arith.constant 9.99999974E-6 : f32
    %54 = vector.broadcast %cst_23 : f32 to vector<32x1xf32>
    %55 = arith.addf %51, %54 : vector<32x1xf32>
    %56 = math.rsqrt %55 : vector<32x1xf32>
    %57 = vector.broadcast %56 : vector<32x1xf32> to vector<32x32xf32>
    %58 = arith.mulf %53, %57 : vector<32x32xf32>
    %59 = vector.broadcast %39 : vector<1x32xf32> to vector<32x32xf32>
    %60 = arith.mulf %58, %59 : vector<32x32xf32>
    %61 = vector.broadcast %40 : vector<1x32xf32> to vector<32x32xf32>
    %62 = arith.addf %60, %61 : vector<32x32xf32>
    %cst_24 = arith.constant 1.000000e+00 : f32
    %63 = vector.broadcast %cst_24 : f32 to vector<2x16x16xf32>
    %64 = arith.subf %63, %1 : vector<2x16x16xf32>
    %cst_25 = arith.constant -3.40282347E+38 : f32
    %65 = vector.broadcast %cst_25 : f32 to vector<2x16x16xf32>
    %66 = arith.mulf %64, %65 : vector<2x16x16xf32>
    %c0_26 = arith.constant 0 : index
    %c0_27 = arith.constant 0 : index
    %c0_28 = arith.constant 0 : index
    %67 = vector.load %arg7[%c0_26, %c0_27, %c0_28] : memref<2x32x96xf32, #tpu.memory_space<vmem>>, vector<1x32x96xf32>
    %68 = vector.shape_cast %67 : vector<1x32x96xf32> to vector<32x96xf32>
    %cst_29 = arith.constant dense<0.000000e+00> : vector<32x96xf32>
    %69 = tpu.matmul %62, %68, %cst_29 {dimension_numbers = #tpu.dot_dimension_numbers<[1], [0], [0], [1], [0, 0, 1, 1], [], []>} : vector<32x32xf32>, vector<32x96xf32>, vector<32x96xf32> -> vector<32x96xf32>
    %c0_30 = arith.constant 0 : index
    %c0_31 = arith.constant 0 : index
    %c0_32 = arith.constant 0 : index
    %70 = vector.load %arg8[%c0_30, %c0_31, %c0_32] : memref<2x1x96xf32, #tpu.memory_space<vmem>>, vector<1x1x96xf32>
    %71 = vector.shape_cast %70 : vector<1x1x96xf32> to vector<1x96xf32>
    %72 = vector.broadcast %71 : vector<1x96xf32> to vector<32x96xf32>
    %73 = arith.addf %69, %72 : vector<32x96xf32>
    %c0_33 = arith.constant 0 : index
    %c0_34 = arith.constant 0 : index
    %c0_35 = arith.constant 0 : index
    %74 = vector.load %arg9[%c0_33, %c0_34, %c0_35] : memref<2x32x32xf32, #tpu.memory_space<vmem>>, vector<1x32x32xf32>
    %75 = vector.shape_cast %74 : vector<1x32x32xf32> to vector<32x32xf32>
    %76 = vector.extract_strided_slice %73 {offsets = [0, 0], sizes = [32, 8], strides = [1, 1]} : vector<32x96xf32> to vector<32x8xf32>
    %77 = vector.shape_cast %76 : vector<32x8xf32> to vector<2x16x8xf32>
    %78 = vector.extract_strided_slice %73 {offsets = [0, 32], sizes = [32, 8], strides = [1, 1]} : vector<32x96xf32> to vector<32x8xf32>
    %79 = vector.shape_cast %78 : vector<32x8xf32> to vector<2x16x8xf32>
    %80 = vector.extract_strided_slice %73 {offsets = [0, 64], sizes = [32, 8], strides = [1, 1]} : vector<32x96xf32> to vector<32x8xf32>
    %81 = vector.shape_cast %80 : vector<32x8xf32> to vector<2x16x8xf32>
    "tpu.trace_start"() <{level = 10 : i32, message = "bqd,bkd->bqk"}> : () -> ()
    %cst_36 = arith.constant dense<0.000000e+00> : vector<2x16x16xf32>
    %82 = tpu.matmul %77, %79, %cst_36 {dimension_numbers = #tpu.dot_dimension_numbers<[2], [2], [1], [1], [0, 0, 0, 1, 1, 1], [0], [0]>} : vector<2x16x8xf32>, vector<2x16x8xf32>, vector<2x16x16xf32> -> vector<2x16x16xf32>
    "tpu.trace_stop"() : () -> ()
    %cst_37 = arith.constant 0.353553385 : f32
    %83 = vector.broadcast %cst_37 : f32 to vector<2x16x16xf32>
    %84 = arith.mulf %82, %83 : vector<2x16x16xf32>
    %85 = arith.addf %84, %66 : vector<2x16x16xf32>
    %cst_38 = arith.constant dense<0xFF800000> : vector<2x16xf32>
    %86 = vector.multi_reduction <maximumf>, %85, %cst_38 [2] : vector<2x16x16xf32> to vector<2x16xf32>
    %87 = vector.shape_cast %86 : vector<2x16xf32> to vector<2x16x1xf32>
    %88 = vector.broadcast %87 : vector<2x16x1xf32> to vector<2x16x16xf32>
    %89 = arith.subf %85, %88 : vector<2x16x16xf32>
    %90 = math.exp %89 : vector<2x16x16xf32>
    %cst_39 = arith.constant dense<0.000000e+00> : vector<2x16xf32>
    %91 = vector.multi_reduction <add>, %90, %cst_39 [2] : vector<2x16x16xf32> to vector<2x16xf32>
    %92 = vector.shape_cast %91 : vector<2x16xf32> to vector<2x16x1xf32>
    %93 = vector.broadcast %92 : vector<2x16x1xf32> to vector<2x16x16xf32>
    %94 = arith.divf %90, %93 : vector<2x16x16xf32>
    "tpu.trace_start"() <{level = 10 : i32, message = "bqk,bkd->bqd"}> : () -> ()
    %cst_40 = arith.constant dense<0.000000e+00> : vector<2x16x8xf32>
    %95 = tpu.matmul %94, %81, %cst_40 {dimension_numbers = #tpu.dot_dimension_numbers<[2], [1], [1], [2], [0, 0, 0, 1, 1, 2], [0], [0]>} : vector<2x16x16xf32>, vector<2x16x8xf32>, vector<2x16x8xf32> -> vector<2x16x8xf32>
    "tpu.trace_stop"() : () -> ()
    %96 = vector.shape_cast %95 : vector<2x16x8xf32> to vector<32x8xf32>
    %97 = vector.extract_strided_slice %75 {offsets = [0, 0], sizes = [8, 32], strides = [1, 1]} : vector<32x32xf32> to vector<8x32xf32>
    %cst_41 = arith.constant dense<0.000000e+00> : vector<32x32xf32>
    %98 = tpu.matmul %96, %97, %cst_41 {dimension_numbers = #tpu.dot_dimension_numbers<[1], [0], [0], [1], [0, 0, 1, 1], [], []>} : vector<32x8xf32>, vector<8x32xf32>, vector<32x32xf32> -> vector<32x32xf32>
    %99 = vector.extract_strided_slice %73 {offsets = [0, 8], sizes = [32, 8], strides = [1, 1]} : vector<32x96xf32> to vector<32x8xf32>
    %100 = vector.shape_cast %99 : vector<32x8xf32> to vector<2x16x8xf32>
    %101 = vector.extract_strided_slice %73 {offsets = [0, 40], sizes = [32, 8], strides = [1, 1]} : vector<32x96xf32> to vector<32x8xf32>
    %102 = vector.shape_cast %101 : vector<32x8xf32> to vector<2x16x8xf32>
    %103 = vector.extract_strided_slice %73 {offsets = [0, 72], sizes = [32, 8], strides = [1, 1]} : vector<32x96xf32> to vector<32x8xf32>
    %104 = vector.shape_cast %103 : vector<32x8xf32> to vector<2x16x8xf32>
    "tpu.trace_start"() <{level = 10 : i32, message = "bqd,bkd->bqk"}> : () -> ()
    %cst_42 = arith.constant dense<0.000000e+00> : vector<2x16x16xf32>
    %105 = tpu.matmul %100, %102, %cst_42 {dimension_numbers = #tpu.dot_dimension_numbers<[2], [2], [1], [1], [0, 0, 0, 1, 1, 1], [0], [0]>} : vector<2x16x8xf32>, vector<2x16x8xf32>, vector<2x16x16xf32> -> vector<2x16x16xf32>
    "tpu.trace_stop"() : () -> ()
    %cst_43 = arith.constant 0.353553385 : f32
    %106 = vector.broadcast %cst_43 : f32 to vector<2x16x16xf32>
    %107 = arith.mulf %105, %106 : vector<2x16x16xf32>
    %108 = arith.addf %107, %66 : vector<2x16x16xf32>
    %cst_44 = arith.constant dense<0xFF800000> : vector<2x16xf32>
    %109 = vector.multi_reduction <maximumf>, %108, %cst_44 [2] : vector<2x16x16xf32> to vector<2x16xf32>
    %110 = vector.shape_cast %109 : vector<2x16xf32> to vector<2x16x1xf32>
    %111 = vector.broadcast %110 : vector<2x16x1xf32> to vector<2x16x16xf32>
    %112 = arith.subf %108, %111 : vector<2x16x16xf32>
    %113 = math.exp %112 : vector<2x16x16xf32>
    %cst_45 = arith.constant dense<0.000000e+00> : vector<2x16xf32>
    %114 = vector.multi_reduction <add>, %113, %cst_45 [2] : vector<2x16x16xf32> to vector<2x16xf32>
    %115 = vector.shape_cast %114 : vector<2x16xf32> to vector<2x16x1xf32>
    %116 = vector.broadcast %115 : vector<2x16x1xf32> to vector<2x16x16xf32>
    %117 = arith.divf %113, %116 : vector<2x16x16xf32>
    "tpu.trace_start"() <{level = 10 : i32, message = "bqk,bkd->bqd"}> : () -> ()
    %cst_46 = arith.constant dense<0.000000e+00> : vector<2x16x8xf32>
    %118 = tpu.matmul %117, %104, %cst_46 {dimension_numbers = #tpu.dot_dimension_numbers<[2], [1], [1], [2], [0, 0, 0, 1, 1, 2], [0], [0]>} : vector<2x16x16xf32>, vector<2x16x8xf32>, vector<2x16x8xf32> -> vector<2x16x8xf32>
    "tpu.trace_stop"() : () -> ()
    %119 = vector.shape_cast %118 : vector<2x16x8xf32> to vector<32x8xf32>
    %120 = vector.extract_strided_slice %75 {offsets = [8, 0], sizes = [8, 32], strides = [1, 1]} : vector<32x32xf32> to vector<8x32xf32>
    %cst_47 = arith.constant dense<0.000000e+00> : vector<32x32xf32>
    %121 = tpu.matmul %119, %120, %cst_47 {dimension_numbers = #tpu.dot_dimension_numbers<[1], [0], [0], [1], [0, 0, 1, 1], [], []>} : vector<32x8xf32>, vector<8x32xf32>, vector<32x32xf32> -> vector<32x32xf32>
    %122 = arith.addf %98, %121 : vector<32x32xf32>
    %123 = vector.extract_strided_slice %73 {offsets = [0, 16], sizes = [32, 8], strides = [1, 1]} : vector<32x96xf32> to vector<32x8xf32>
    %124 = vector.shape_cast %123 : vector<32x8xf32> to vector<2x16x8xf32>
    %125 = vector.extract_strided_slice %73 {offsets = [0, 48], sizes = [32, 8], strides = [1, 1]} : vector<32x96xf32> to vector<32x8xf32>
    %126 = vector.shape_cast %125 : vector<32x8xf32> to vector<2x16x8xf32>
    %127 = vector.extract_strided_slice %73 {offsets = [0, 80], sizes = [32, 8], strides = [1, 1]} : vector<32x96xf32> to vector<32x8xf32>
    %128 = vector.shape_cast %127 : vector<32x8xf32> to vector<2x16x8xf32>
    "tpu.trace_start"() <{level = 10 : i32, message = "bqd,bkd->bqk"}> : () -> ()
    %cst_48 = arith.constant dense<0.000000e+00> : vector<2x16x16xf32>
    %129 = tpu.matmul %124, %126, %cst_48 {dimension_numbers = #tpu.dot_dimension_numbers<[2], [2], [1], [1], [0, 0, 0, 1, 1, 1], [0], [0]>} : vector<2x16x8xf32>, vector<2x16x8xf32>, vector<2x16x16xf32> -> vector<2x16x16xf32>
    "tpu.trace_stop"() : () -> ()
    %cst_49 = arith.constant 0.353553385 : f32
    %130 = vector.broadcast %cst_49 : f32 to vector<2x16x16xf32>
    %131 = arith.mulf %129, %130 : vector<2x16x16xf32>
    %132 = arith.addf %131, %66 : vector<2x16x16xf32>
    %cst_50 = arith.constant dense<0xFF800000> : vector<2x16xf32>
    %133 = vector.multi_reduction <maximumf>, %132, %cst_50 [2] : vector<2x16x16xf32> to vector<2x16xf32>
    %134 = vector.shape_cast %133 : vector<2x16xf32> to vector<2x16x1xf32>
    %135 = vector.broadcast %134 : vector<2x16x1xf32> to vector<2x16x16xf32>
    %136 = arith.subf %132, %135 : vector<2x16x16xf32>
    %137 = math.exp %136 : vector<2x16x16xf32>
    %cst_51 = arith.constant dense<0.000000e+00> : vector<2x16xf32>
    %138 = vector.multi_reduction <add>, %137, %cst_51 [2] : vector<2x16x16xf32> to vector<2x16xf32>
    %139 = vector.shape_cast %138 : vector<2x16xf32> to vector<2x16x1xf32>
    %140 = vector.broadcast %139 : vector<2x16x1xf32> to vector<2x16x16xf32>
    %141 = arith.divf %137, %140 : vector<2x16x16xf32>
    "tpu.trace_start"() <{level = 10 : i32, message = "bqk,bkd->bqd"}> : () -> ()
    %cst_52 = arith.constant dense<0.000000e+00> : vector<2x16x8xf32>
    %142 = tpu.matmul %141, %128, %cst_52 {dimension_numbers = #tpu.dot_dimension_numbers<[2], [1], [1], [2], [0, 0, 0, 1, 1, 2], [0], [0]>} : vector<2x16x16xf32>, vector<2x16x8xf32>, vector<2x16x8xf32> -> vector<2x16x8xf32>
    "tpu.trace_stop"() : () -> ()
    %143 = vector.shape_cast %142 : vector<2x16x8xf32> to vector<32x8xf32>
    %144 = vector.extract_strided_slice %75 {offsets = [16, 0], sizes = [8, 32], strides = [1, 1]} : vector<32x32xf32> to vector<8x32xf32>
    %cst_53 = arith.constant dense<0.000000e+00> : vector<32x32xf32>
    %145 = tpu.matmul %143, %144, %cst_53 {dimension_numbers = #tpu.dot_dimension_numbers<[1], [0], [0], [1], [0, 0, 1, 1], [], []>} : vector<32x8xf32>, vector<8x32xf32>, vector<32x32xf32> -> vector<32x32xf32>
    %146 = arith.addf %122, %145 : vector<32x32xf32>
    %147 = vector.extract_strided_slice %73 {offsets = [0, 24], sizes = [32, 8], strides = [1, 1]} : vector<32x96xf32> to vector<32x8xf32>
    %148 = vector.shape_cast %147 : vector<32x8xf32> to vector<2x16x8xf32>
    %149 = vector.extract_strided_slice %73 {offsets = [0, 56], sizes = [32, 8], strides = [1, 1]} : vector<32x96xf32> to vector<32x8xf32>
    %150 = vector.shape_cast %149 : vector<32x8xf32> to vector<2x16x8xf32>
    %151 = vector.extract_strided_slice %73 {offsets = [0, 88], sizes = [32, 8], strides = [1, 1]} : vector<32x96xf32> to vector<32x8xf32>
    %152 = vector.shape_cast %151 : vector<32x8xf32> to vector<2x16x8xf32>
    "tpu.trace_start"() <{level = 10 : i32, message = "bqd,bkd->bqk"}> : () -> ()
    %cst_54 = arith.constant dense<0.000000e+00> : vector<2x16x16xf32>
    %153 = tpu.matmul %148, %150, %cst_54 {dimension_numbers = #tpu.dot_dimension_numbers<[2], [2], [1], [1], [0, 0, 0, 1, 1, 1], [0], [0]>} : vector<2x16x8xf32>, vector<2x16x8xf32>, vector<2x16x16xf32> -> vector<2x16x16xf32>
    "tpu.trace_stop"() : () -> ()
    %cst_55 = arith.constant 0.353553385 : f32
    %154 = vector.broadcast %cst_55 : f32 to vector<2x16x16xf32>
    %155 = arith.mulf %153, %154 : vector<2x16x16xf32>
    %156 = arith.addf %155, %66 : vector<2x16x16xf32>
    %cst_56 = arith.constant dense<0xFF800000> : vector<2x16xf32>
    %157 = vector.multi_reduction <maximumf>, %156, %cst_56 [2] : vector<2x16x16xf32> to vector<2x16xf32>
    %158 = vector.shape_cast %157 : vector<2x16xf32> to vector<2x16x1xf32>
    %159 = vector.broadcast %158 : vector<2x16x1xf32> to vector<2x16x16xf32>
    %160 = arith.subf %156, %159 : vector<2x16x16xf32>
    %161 = math.exp %160 : vector<2x16x16xf32>
    %cst_57 = arith.constant dense<0.000000e+00> : vector<2x16xf32>
    %162 = vector.multi_reduction <add>, %161, %cst_57 [2] : vector<2x16x16xf32> to vector<2x16xf32>
    %163 = vector.shape_cast %162 : vector<2x16xf32> to vector<2x16x1xf32>
    %164 = vector.broadcast %163 : vector<2x16x1xf32> to vector<2x16x16xf32>
    %165 = arith.divf %161, %164 : vector<2x16x16xf32>
    "tpu.trace_start"() <{level = 10 : i32, message = "bqk,bkd->bqd"}> : () -> ()
    %cst_58 = arith.constant dense<0.000000e+00> : vector<2x16x8xf32>
    %166 = tpu.matmul %165, %152, %cst_58 {dimension_numbers = #tpu.dot_dimension_numbers<[2], [1], [1], [2], [0, 0, 0, 1, 1, 2], [0], [0]>} : vector<2x16x16xf32>, vector<2x16x8xf32>, vector<2x16x8xf32> -> vector<2x16x8xf32>
    "tpu.trace_stop"() : () -> ()
    %167 = vector.shape_cast %166 : vector<2x16x8xf32> to vector<32x8xf32>
    %168 = vector.extract_strided_slice %75 {offsets = [24, 0], sizes = [8, 32], strides = [1, 1]} : vector<32x32xf32> to vector<8x32xf32>
    %cst_59 = arith.constant dense<0.000000e+00> : vector<32x32xf32>
    %169 = tpu.matmul %167, %168, %cst_59 {dimension_numbers = #tpu.dot_dimension_numbers<[1], [0], [0], [1], [0, 0, 1, 1], [], []>} : vector<32x8xf32>, vector<8x32xf32>, vector<32x32xf32> -> vector<32x32xf32>
    %170 = arith.addf %146, %169 : vector<32x32xf32>
    %c0_60 = arith.constant 0 : index
    %c0_61 = arith.constant 0 : index
    %c0_62 = arith.constant 0 : index
    %171 = vector.load %arg10[%c0_60, %c0_61, %c0_62] : memref<2x1x32xf32, #tpu.memory_space<vmem>>, vector<1x1x32xf32>
    %172 = vector.shape_cast %171 : vector<1x1x32xf32> to vector<1x32xf32>
    %173 = vector.broadcast %172 : vector<1x32xf32> to vector<32x32xf32>
    %174 = arith.addf %170, %173 : vector<32x32xf32>
    %175 = arith.addf %174, %62 : vector<32x32xf32>
    %c0_63 = arith.constant 0 : index
    %c0_64 = arith.constant 0 : index
    %c0_65 = arith.constant 0 : index
    %176 = vector.load %arg11[%c0_63, %c0_64, %c0_65] : memref<2x1x32xf32, #tpu.memory_space<vmem>>, vector<1x1x32xf32>
    %177 = vector.shape_cast %176 : vector<1x1x32xf32> to vector<1x32xf32>
    %c0_66 = arith.constant 0 : index
    %c0_67 = arith.constant 0 : index
    %c0_68 = arith.constant 0 : index
    %178 = vector.load %arg12[%c0_66, %c0_67, %c0_68] : memref<2x1x32xf32, #tpu.memory_space<vmem>>, vector<1x1x32xf32>
    %179 = vector.shape_cast %178 : vector<1x1x32xf32> to vector<1x32xf32>
    %cst_69 = arith.constant dense<0.000000e+00> : vector<32xf32>
    %180 = vector.multi_reduction <add>, %175, %cst_69 [1] : vector<32x32xf32> to vector<32xf32>
    %181 = vector.shape_cast %180 : vector<32xf32> to vector<32x1xf32>
    %cst_70 = arith.constant 3.200000e+01 : f32
    %182 = vector.broadcast %cst_70 : f32 to vector<32x1xf32>
    %183 = arith.divf %181, %182 : vector<32x1xf32>
    %184 = vector.broadcast %183 : vector<32x1xf32> to vector<32x32xf32>
    %185 = arith.subf %175, %184 : vector<32x32xf32>
    %186 = arith.mulf %185, %185 : vector<32x32xf32>
    %cst_71 = arith.constant dense<0.000000e+00> : vector<32xf32>
    %187 = vector.multi_reduction <add>, %186, %cst_71 [1] : vector<32x32xf32> to vector<32xf32>
    %188 = vector.shape_cast %187 : vector<32xf32> to vector<32x1xf32>
    %cst_72 = arith.constant 3.200000e+01 : f32
    %189 = vector.broadcast %cst_72 : f32 to vector<32x1xf32>
    %190 = arith.divf %188, %189 : vector<32x1xf32>
    %191 = vector.broadcast %183 : vector<32x1xf32> to vector<32x32xf32>
    %192 = arith.subf %175, %191 : vector<32x32xf32>
    %cst_73 = arith.constant 9.99999974E-6 : f32
    %193 = vector.broadcast %cst_73 : f32 to vector<32x1xf32>
    %194 = arith.addf %190, %193 : vector<32x1xf32>
    %195 = math.rsqrt %194 : vector<32x1xf32>
    %196 = vector.broadcast %195 : vector<32x1xf32> to vector<32x32xf32>
    %197 = arith.mulf %192, %196 : vector<32x32xf32>
    %198 = vector.broadcast %177 : vector<1x32xf32> to vector<32x32xf32>
    %199 = arith.mulf %197, %198 : vector<32x32xf32>
    %200 = vector.broadcast %179 : vector<1x32xf32> to vector<32x32xf32>
    %201 = arith.addf %199, %200 : vector<32x32xf32>
    %c0_74 = arith.constant 0 : index
    %c0_75 = arith.constant 0 : index
    %c0_76 = arith.constant 0 : index
    %202 = vector.load %arg13[%c0_74, %c0_75, %c0_76] : memref<2x32x64xf32, #tpu.memory_space<vmem>>, vector<1x32x64xf32>
    %203 = vector.shape_cast %202 : vector<1x32x64xf32> to vector<32x64xf32>
    %cst_77 = arith.constant dense<0.000000e+00> : vector<32x64xf32>
    %204 = tpu.matmul %201, %203, %cst_77 {dimension_numbers = #tpu.dot_dimension_numbers<[1], [0], [0], [1], [0, 0, 1, 1], [], []>} : vector<32x32xf32>, vector<32x64xf32>, vector<32x64xf32> -> vector<32x64xf32>
    %c0_78 = arith.constant 0 : index
    %c0_79 = arith.constant 0 : index
    %c0_80 = arith.constant 0 : index
    %205 = vector.load %arg14[%c0_78, %c0_79, %c0_80] : memref<2x1x64xf32, #tpu.memory_space<vmem>>, vector<1x1x64xf32>
    %206 = vector.shape_cast %205 : vector<1x1x64xf32> to vector<1x64xf32>
    %207 = vector.broadcast %206 : vector<1x64xf32> to vector<32x64xf32>
    %208 = arith.addf %204, %207 : vector<32x64xf32>
    %cst_81 = arith.constant 5.000000e-01 : f32
    %209 = vector.broadcast %cst_81 : f32 to vector<32x64xf32>
    %210 = arith.mulf %209, %208 : vector<32x64xf32>
    %cst_82 = arith.constant 0.707106769 : f32
    %211 = vector.broadcast %cst_82 : f32 to vector<32x64xf32>
    %212 = arith.mulf %208, %211 : vector<32x64xf32>
    %213 = math.absf %212 : vector<32x64xf32>
    %cst_83 = arith.constant 0.327591091 : f32
    %214 = vector.broadcast %cst_83 : f32 to vector<32x64xf32>
    %215 = arith.mulf %214, %213 : vector<32x64xf32>
    %cst_84 = arith.constant 1.000000e+00 : f32
    %216 = vector.broadcast %cst_84 : f32 to vector<32x64xf32>
    %217 = arith.addf %216, %215 : vector<32x64xf32>
    %cst_85 = arith.constant 1.000000e+00 : f32
    %218 = vector.broadcast %cst_85 : f32 to vector<32x64xf32>
    %219 = arith.divf %218, %217 : vector<32x64xf32>
    %cst_86 = arith.constant 1.06140542 : f32
    %220 = vector.broadcast %cst_86 : f32 to vector<32x64xf32>
    %221 = arith.mulf %220, %219 : vector<32x64xf32>
    %cst_87 = arith.constant -1.45315206 : f32
    %222 = vector.broadcast %cst_87 : f32 to vector<32x64xf32>
    %223 = arith.addf %221, %222 : vector<32x64xf32>
    %224 = arith.mulf %223, %219 : vector<32x64xf32>
    %cst_88 = arith.constant 1.42141378 : f32
    %225 = vector.broadcast %cst_88 : f32 to vector<32x64xf32>
    %226 = arith.addf %224, %225 : vector<32x64xf32>
    %227 = arith.mulf %226, %219 : vector<32x64xf32>
    %cst_89 = arith.constant -0.284496725 : f32
    %228 = vector.broadcast %cst_89 : f32 to vector<32x64xf32>
    %229 = arith.addf %227, %228 : vector<32x64xf32>
    %230 = arith.mulf %229, %219 : vector<32x64xf32>
    %cst_90 = arith.constant 0.254829586 : f32
    %231 = vector.broadcast %cst_90 : f32 to vector<32x64xf32>
    %232 = arith.addf %230, %231 : vector<32x64xf32>
    %233 = arith.mulf %232, %219 : vector<32x64xf32>
    %cst_91 = arith.constant 0.000000e+00 : f32
    %234 = vector.broadcast %cst_91 : f32 to vector<32x64xf32>
    %235 = arith.subf %234, %213 : vector<32x64xf32>
    %236 = arith.mulf %235, %213 : vector<32x64xf32>
    %237 = math.exp %236 : vector<32x64xf32>
    %238 = arith.mulf %233, %237 : vector<32x64xf32>
    %cst_92 = arith.constant 1.000000e+00 : f32
    %239 = vector.broadcast %cst_92 : f32 to vector<32x64xf32>
    %240 = arith.subf %239, %238 : vector<32x64xf32>
    %cst_93 = arith.constant 0.000000e+00 : f32
    %241 = vector.broadcast %cst_93 : f32 to vector<32x64xf32>
    %242 = arith.cmpf oge, %212, %241 : vector<32x64xf32>
    %cst_94 = arith.constant 0.000000e+00 : f32
    %243 = vector.broadcast %cst_94 : f32 to vector<32x64xf32>
    %244 = arith.subf %243, %240 : vector<32x64xf32>
    %245 = arith.select %242, %240, %244 : vector<32x64xi1>, vector<32x64xf32>
    %cst_95 = arith.constant 1.000000e+00 : f32
    %246 = vector.broadcast %cst_95 : f32 to vector<32x64xf32>
    %247 = arith.addf %246, %245 : vector<32x64xf32>
    %248 = arith.mulf %210, %247 : vector<32x64xf32>
    %c0_96 = arith.constant 0 : index
    %c0_97 = arith.constant 0 : index
    %c0_98 = arith.constant 0 : index
    %249 = vector.load %arg15[%c0_96, %c0_97, %c0_98] : memref<2x64x32xf32, #tpu.memory_space<vmem>>, vector<1x64x32xf32>
    %250 = vector.shape_cast %249 : vector<1x64x32xf32> to vector<64x32xf32>
    %cst_99 = arith.constant dense<0.000000e+00> : vector<32x32xf32>
    %251 = tpu.matmul %248, %250, %cst_99 {dimension_numbers = #tpu.dot_dimension_numbers<[1], [0], [0], [1], [0, 0, 1, 1], [], []>} : vector<32x64xf32>, vector<64x32xf32>, vector<32x32xf32> -> vector<32x32xf32>
    %c0_100 = arith.constant 0 : index
    %c0_101 = arith.constant 0 : index
    %c0_102 = arith.constant 0 : index
    %252 = vector.load %arg16[%c0_100, %c0_101, %c0_102] : memref<2x1x32xf32, #tpu.memory_space<vmem>>, vector<1x1x32xf32>
    %253 = vector.shape_cast %252 : vector<1x1x32xf32> to vector<1x32xf32>
    %254 = vector.broadcast %253 : vector<1x32xf32> to vector<32x32xf32>
    %255 = arith.addf %251, %254 : vector<32x32xf32>
    %256 = arith.addf %255, %201 : vector<32x32xf32>
    %c0_103 = arith.constant 0 : index
    %c0_104 = arith.constant 0 : index
    %c0_105 = arith.constant 0 : index
    %257 = vector.load %arg17[%c0_103, %c0_104, %c0_105] : memref<2x1x32xf32, #tpu.memory_space<vmem>>, vector<1x1x32xf32>
    %258 = vector.shape_cast %257 : vector<1x1x32xf32> to vector<1x32xf32>
    %c0_106 = arith.constant 0 : index
    %c0_107 = arith.constant 0 : index
    %c0_108 = arith.constant 0 : index
    %259 = vector.load %arg18[%c0_106, %c0_107, %c0_108] : memref<2x1x32xf32, #tpu.memory_space<vmem>>, vector<1x1x32xf32>
    %260 = vector.shape_cast %259 : vector<1x1x32xf32> to vector<1x32xf32>
    %cst_109 = arith.constant dense<0.000000e+00> : vector<32xf32>
    %261 = vector.multi_reduction <add>, %256, %cst_109 [1] : vector<32x32xf32> to vector<32xf32>
    %262 = vector.shape_cast %261 : vector<32xf32> to vector<32x1xf32>
    %cst_110 = arith.constant 3.200000e+01 : f32
    %263 = vector.broadcast %cst_110 : f32 to vector<32x1xf32>
    %264 = arith.divf %262, %263 : vector<32x1xf32>
    %265 = vector.broadcast %264 : vector<32x1xf32> to vector<32x32xf32>
    %266 = arith.subf %256, %265 : vector<32x32xf32>
    %267 = arith.mulf %266, %266 : vector<32x32xf32>
    %cst_111 = arith.constant dense<0.000000e+00> : vector<32xf32>
    %268 = vector.multi_reduction <add>, %267, %cst_111 [1] : vector<32x32xf32> to vector<32xf32>
    %269 = vector.shape_cast %268 : vector<32xf32> to vector<32x1xf32>
    %cst_112 = arith.constant 3.200000e+01 : f32
    %270 = vector.broadcast %cst_112 : f32 to vector<32x1xf32>
    %271 = arith.divf %269, %270 : vector<32x1xf32>
    %272 = vector.broadcast %264 : vector<32x1xf32> to vector<32x32xf32>
    %273 = arith.subf %256, %272 : vector<32x32xf32>
    %cst_113 = arith.constant 9.99999974E-6 : f32
    %274 = vector.broadcast %cst_113 : f32 to vector<32x1xf32>
    %275 = arith.addf %271, %274 : vector<32x1xf32>
    %276 = math.rsqrt %275 : vector<32x1xf32>
    %277 = vector.broadcast %276 : vector<32x1xf32> to vector<32x32xf32>
    %278 = arith.mulf %273, %277 : vector<32x32xf32>
    %279 = vector.broadcast %258 : vector<1x32xf32> to vector<32x32xf32>
    %280 = arith.mulf %278, %279 : vector<32x32xf32>
    %281 = vector.broadcast %260 : vector<1x32xf32> to vector<32x32xf32>
    %282 = arith.addf %280, %281 : vector<32x32xf32>
    %c1 = arith.constant 1 : index
    %c0_114 = arith.constant 0 : index
    %c0_115 = arith.constant 0 : index
    %283 = vector.load %arg7[%c1, %c0_114, %c0_115] : memref<2x32x96xf32, #tpu.memory_space<vmem>>, vector<1x32x96xf32>
    %284 = vector.shape_cast %283 : vector<1x32x96xf32> to vector<32x96xf32>
    %cst_116 = arith.constant dense<0.000000e+00> : vector<32x96xf32>
    %285 = tpu.matmul %282, %284, %cst_116 {dimension_numbers = #tpu.dot_dimension_numbers<[1], [0], [0], [1], [0, 0, 1, 1], [], []>} : vector<32x32xf32>, vector<32x96xf32>, vector<32x96xf32> -> vector<32x96xf32>
    %c1_117 = arith.constant 1 : index
    %c0_118 = arith.constant 0 : index
    %c0_119 = arith.constant 0 : index
    %286 = vector.load %arg8[%c1_117, %c0_118, %c0_119] : memref<2x1x96xf32, #tpu.memory_space<vmem>>, vector<1x1x96xf32>
    %287 = vector.shape_cast %286 : vector<1x1x96xf32> to vector<1x96xf32>
    %288 = vector.broadcast %287 : vector<1x96xf32> to vector<32x96xf32>
    %289 = arith.addf %285, %288 : vector<32x96xf32>
    %c1_120 = arith.constant 1 : index
    %c0_121 = arith.constant 0 : index
    %c0_122 = arith.constant 0 : index
    %290 = vector.load %arg9[%c1_120, %c0_121, %c0_122] : memref<2x32x32xf32, #tpu.memory_space<vmem>>, vector<1x32x32xf32>
    %291 = vector.shape_cast %290 : vector<1x32x32xf32> to vector<32x32xf32>
    %292 = vector.extract_strided_slice %289 {offsets = [0, 0], sizes = [32, 8], strides = [1, 1]} : vector<32x96xf32> to vector<32x8xf32>
    %293 = vector.shape_cast %292 : vector<32x8xf32> to vector<2x16x8xf32>
    %294 = vector.extract_strided_slice %289 {offsets = [0, 32], sizes = [32, 8], strides = [1, 1]} : vector<32x96xf32> to vector<32x8xf32>
    %295 = vector.shape_cast %294 : vector<32x8xf32> to vector<2x16x8xf32>
    %296 = vector.extract_strided_slice %289 {offsets = [0, 64], sizes = [32, 8], strides = [1, 1]} : vector<32x96xf32> to vector<32x8xf32>
    %297 = vector.shape_cast %296 : vector<32x8xf32> to vector<2x16x8xf32>
    "tpu.trace_start"() <{level = 10 : i32, message = "bqd,bkd->bqk"}> : () -> ()
    %cst_123 = arith.constant dense<0.000000e+00> : vector<2x16x16xf32>
    %298 = tpu.matmul %293, %295, %cst_123 {dimension_numbers = #tpu.dot_dimension_numbers<[2], [2], [1], [1], [0, 0, 0, 1, 1, 1], [0], [0]>} : vector<2x16x8xf32>, vector<2x16x8xf32>, vector<2x16x16xf32> -> vector<2x16x16xf32>
    "tpu.trace_stop"() : () -> ()
    %cst_124 = arith.constant 0.353553385 : f32
    %299 = vector.broadcast %cst_124 : f32 to vector<2x16x16xf32>
    %300 = arith.mulf %298, %299 : vector<2x16x16xf32>
    %301 = arith.addf %300, %66 : vector<2x16x16xf32>
    %cst_125 = arith.constant dense<0xFF800000> : vector<2x16xf32>
    %302 = vector.multi_reduction <maximumf>, %301, %cst_125 [2] : vector<2x16x16xf32> to vector<2x16xf32>
    %303 = vector.shape_cast %302 : vector<2x16xf32> to vector<2x16x1xf32>
    %304 = vector.broadcast %303 : vector<2x16x1xf32> to vector<2x16x16xf32>
    %305 = arith.subf %301, %304 : vector<2x16x16xf32>
    %306 = math.exp %305 : vector<2x16x16xf32>
    %cst_126 = arith.constant dense<0.000000e+00> : vector<2x16xf32>
    %307 = vector.multi_reduction <add>, %306, %cst_126 [2] : vector<2x16x16xf32> to vector<2x16xf32>
    %308 = vector.shape_cast %307 : vector<2x16xf32> to vector<2x16x1xf32>
    %309 = vector.broadcast %308 : vector<2x16x1xf32> to vector<2x16x16xf32>
    %310 = arith.divf %306, %309 : vector<2x16x16xf32>
    "tpu.trace_start"() <{level = 10 : i32, message = "bqk,bkd->bqd"}> : () -> ()
    %cst_127 = arith.constant dense<0.000000e+00> : vector<2x16x8xf32>
    %311 = tpu.matmul %310, %297, %cst_127 {dimension_numbers = #tpu.dot_dimension_numbers<[2], [1], [1], [2], [0, 0, 0, 1, 1, 2], [0], [0]>} : vector<2x16x16xf32>, vector<2x16x8xf32>, vector<2x16x8xf32> -> vector<2x16x8xf32>
    "tpu.trace_stop"() : () -> ()
    %312 = vector.shape_cast %311 : vector<2x16x8xf32> to vector<32x8xf32>
    %313 = vector.extract_strided_slice %291 {offsets = [0, 0], sizes = [8, 32], strides = [1, 1]} : vector<32x32xf32> to vector<8x32xf32>
    %cst_128 = arith.constant dense<0.000000e+00> : vector<32x32xf32>
    %314 = tpu.matmul %312, %313, %cst_128 {dimension_numbers = #tpu.dot_dimension_numbers<[1], [0], [0], [1], [0, 0, 1, 1], [], []>} : vector<32x8xf32>, vector<8x32xf32>, vector<32x32xf32> -> vector<32x32xf32>
    %315 = vector.extract_strided_slice %289 {offsets = [0, 8], sizes = [32, 8], strides = [1, 1]} : vector<32x96xf32> to vector<32x8xf32>
    %316 = vector.shape_cast %315 : vector<32x8xf32> to vector<2x16x8xf32>
    %317 = vector.extract_strided_slice %289 {offsets = [0, 40], sizes = [32, 8], strides = [1, 1]} : vector<32x96xf32> to vector<32x8xf32>
    %318 = vector.shape_cast %317 : vector<32x8xf32> to vector<2x16x8xf32>
    %319 = vector.extract_strided_slice %289 {offsets = [0, 72], sizes = [32, 8], strides = [1, 1]} : vector<32x96xf32> to vector<32x8xf32>
    %320 = vector.shape_cast %319 : vector<32x8xf32> to vector<2x16x8xf32>
    "tpu.trace_start"() <{level = 10 : i32, message = "bqd,bkd->bqk"}> : () -> ()
    %cst_129 = arith.constant dense<0.000000e+00> : vector<2x16x16xf32>
    %321 = tpu.matmul %316, %318, %cst_129 {dimension_numbers = #tpu.dot_dimension_numbers<[2], [2], [1], [1], [0, 0, 0, 1, 1, 1], [0], [0]>} : vector<2x16x8xf32>, vector<2x16x8xf32>, vector<2x16x16xf32> -> vector<2x16x16xf32>
    "tpu.trace_stop"() : () -> ()
    %cst_130 = arith.constant 0.353553385 : f32
    %322 = vector.broadcast %cst_130 : f32 to vector<2x16x16xf32>
    %323 = arith.mulf %321, %322 : vector<2x16x16xf32>
    %324 = arith.addf %323, %66 : vector<2x16x16xf32>
    %cst_131 = arith.constant dense<0xFF800000> : vector<2x16xf32>
    %325 = vector.multi_reduction <maximumf>, %324, %cst_131 [2] : vector<2x16x16xf32> to vector<2x16xf32>
    %326 = vector.shape_cast %325 : vector<2x16xf32> to vector<2x16x1xf32>
    %327 = vector.broadcast %326 : vector<2x16x1xf32> to vector<2x16x16xf32>
    %328 = arith.subf %324, %327 : vector<2x16x16xf32>
    %329 = math.exp %328 : vector<2x16x16xf32>
    %cst_132 = arith.constant dense<0.000000e+00> : vector<2x16xf32>
    %330 = vector.multi_reduction <add>, %329, %cst_132 [2] : vector<2x16x16xf32> to vector<2x16xf32>
    %331 = vector.shape_cast %330 : vector<2x16xf32> to vector<2x16x1xf32>
    %332 = vector.broadcast %331 : vector<2x16x1xf32> to vector<2x16x16xf32>
    %333 = arith.divf %329, %332 : vector<2x16x16xf32>
    "tpu.trace_start"() <{level = 10 : i32, message = "bqk,bkd->bqd"}> : () -> ()
    %cst_133 = arith.constant dense<0.000000e+00> : vector<2x16x8xf32>
    %334 = tpu.matmul %333, %320, %cst_133 {dimension_numbers = #tpu.dot_dimension_numbers<[2], [1], [1], [2], [0, 0, 0, 1, 1, 2], [0], [0]>} : vector<2x16x16xf32>, vector<2x16x8xf32>, vector<2x16x8xf32> -> vector<2x16x8xf32>
    "tpu.trace_stop"() : () -> ()
    %335 = vector.shape_cast %334 : vector<2x16x8xf32> to vector<32x8xf32>
    %336 = vector.extract_strided_slice %291 {offsets = [8, 0], sizes = [8, 32], strides = [1, 1]} : vector<32x32xf32> to vector<8x32xf32>
    %cst_134 = arith.constant dense<0.000000e+00> : vector<32x32xf32>
    %337 = tpu.matmul %335, %336, %cst_134 {dimension_numbers = #tpu.dot_dimension_numbers<[1], [0], [0], [1], [0, 0, 1, 1], [], []>} : vector<32x8xf32>, vector<8x32xf32>, vector<32x32xf32> -> vector<32x32xf32>
    %338 = arith.addf %314, %337 : vector<32x32xf32>
    %339 = vector.extract_strided_slice %289 {offsets = [0, 16], sizes = [32, 8], strides = [1, 1]} : vector<32x96xf32> to vector<32x8xf32>
    %340 = vector.shape_cast %339 : vector<32x8xf32> to vector<2x16x8xf32>
    %341 = vector.extract_strided_slice %289 {offsets = [0, 48], sizes = [32, 8], strides = [1, 1]} : vector<32x96xf32> to vector<32x8xf32>
    %342 = vector.shape_cast %341 : vector<32x8xf32> to vector<2x16x8xf32>
    %343 = vector.extract_strided_slice %289 {offsets = [0, 80], sizes = [32, 8], strides = [1, 1]} : vector<32x96xf32> to vector<32x8xf32>
    %344 = vector.shape_cast %343 : vector<32x8xf32> to vector<2x16x8xf32>
    "tpu.trace_start"() <{level = 10 : i32, message = "bqd,bkd->bqk"}> : () -> ()
    %cst_135 = arith.constant dense<0.000000e+00> : vector<2x16x16xf32>
    %345 = tpu.matmul %340, %342, %cst_135 {dimension_numbers = #tpu.dot_dimension_numbers<[2], [2], [1], [1], [0, 0, 0, 1, 1, 1], [0], [0]>} : vector<2x16x8xf32>, vector<2x16x8xf32>, vector<2x16x16xf32> -> vector<2x16x16xf32>
    "tpu.trace_stop"() : () -> ()
    %cst_136 = arith.constant 0.353553385 : f32
    %346 = vector.broadcast %cst_136 : f32 to vector<2x16x16xf32>
    %347 = arith.mulf %345, %346 : vector<2x16x16xf32>
    %348 = arith.addf %347, %66 : vector<2x16x16xf32>
    %cst_137 = arith.constant dense<0xFF800000> : vector<2x16xf32>
    %349 = vector.multi_reduction <maximumf>, %348, %cst_137 [2] : vector<2x16x16xf32> to vector<2x16xf32>
    %350 = vector.shape_cast %349 : vector<2x16xf32> to vector<2x16x1xf32>
    %351 = vector.broadcast %350 : vector<2x16x1xf32> to vector<2x16x16xf32>
    %352 = arith.subf %348, %351 : vector<2x16x16xf32>
    %353 = math.exp %352 : vector<2x16x16xf32>
    %cst_138 = arith.constant dense<0.000000e+00> : vector<2x16xf32>
    %354 = vector.multi_reduction <add>, %353, %cst_138 [2] : vector<2x16x16xf32> to vector<2x16xf32>
    %355 = vector.shape_cast %354 : vector<2x16xf32> to vector<2x16x1xf32>
    %356 = vector.broadcast %355 : vector<2x16x1xf32> to vector<2x16x16xf32>
    %357 = arith.divf %353, %356 : vector<2x16x16xf32>
    "tpu.trace_start"() <{level = 10 : i32, message = "bqk,bkd->bqd"}> : () -> ()
    %cst_139 = arith.constant dense<0.000000e+00> : vector<2x16x8xf32>
    %358 = tpu.matmul %357, %344, %cst_139 {dimension_numbers = #tpu.dot_dimension_numbers<[2], [1], [1], [2], [0, 0, 0, 1, 1, 2], [0], [0]>} : vector<2x16x16xf32>, vector<2x16x8xf32>, vector<2x16x8xf32> -> vector<2x16x8xf32>
    "tpu.trace_stop"() : () -> ()
    %359 = vector.shape_cast %358 : vector<2x16x8xf32> to vector<32x8xf32>
    %360 = vector.extract_strided_slice %291 {offsets = [16, 0], sizes = [8, 32], strides = [1, 1]} : vector<32x32xf32> to vector<8x32xf32>
    %cst_140 = arith.constant dense<0.000000e+00> : vector<32x32xf32>
    %361 = tpu.matmul %359, %360, %cst_140 {dimension_numbers = #tpu.dot_dimension_numbers<[1], [0], [0], [1], [0, 0, 1, 1], [], []>} : vector<32x8xf32>, vector<8x32xf32>, vector<32x32xf32> -> vector<32x32xf32>
    %362 = arith.addf %338, %361 : vector<32x32xf32>
    %363 = vector.extract_strided_slice %289 {offsets = [0, 24], sizes = [32, 8], strides = [1, 1]} : vector<32x96xf32> to vector<32x8xf32>
    %364 = vector.shape_cast %363 : vector<32x8xf32> to vector<2x16x8xf32>
    %365 = vector.extract_strided_slice %289 {offsets = [0, 56], sizes = [32, 8], strides = [1, 1]} : vector<32x96xf32> to vector<32x8xf32>
    %366 = vector.shape_cast %365 : vector<32x8xf32> to vector<2x16x8xf32>
    %367 = vector.extract_strided_slice %289 {offsets = [0, 88], sizes = [32, 8], strides = [1, 1]} : vector<32x96xf32> to vector<32x8xf32>
    %368 = vector.shape_cast %367 : vector<32x8xf32> to vector<2x16x8xf32>
    "tpu.trace_start"() <{level = 10 : i32, message = "bqd,bkd->bqk"}> : () -> ()
    %cst_141 = arith.constant dense<0.000000e+00> : vector<2x16x16xf32>
    %369 = tpu.matmul %364, %366, %cst_141 {dimension_numbers = #tpu.dot_dimension_numbers<[2], [2], [1], [1], [0, 0, 0, 1, 1, 1], [0], [0]>} : vector<2x16x8xf32>, vector<2x16x8xf32>, vector<2x16x16xf32> -> vector<2x16x16xf32>
    "tpu.trace_stop"() : () -> ()
    %cst_142 = arith.constant 0.353553385 : f32
    %370 = vector.broadcast %cst_142 : f32 to vector<2x16x16xf32>
    %371 = arith.mulf %369, %370 : vector<2x16x16xf32>
    %372 = arith.addf %371, %66 : vector<2x16x16xf32>
    %cst_143 = arith.constant dense<0xFF800000> : vector<2x16xf32>
    %373 = vector.multi_reduction <maximumf>, %372, %cst_143 [2] : vector<2x16x16xf32> to vector<2x16xf32>
    %374 = vector.shape_cast %373 : vector<2x16xf32> to vector<2x16x1xf32>
    %375 = vector.broadcast %374 : vector<2x16x1xf32> to vector<2x16x16xf32>
    %376 = arith.subf %372, %375 : vector<2x16x16xf32>
    %377 = math.exp %376 : vector<2x16x16xf32>
    %cst_144 = arith.constant dense<0.000000e+00> : vector<2x16xf32>
    %378 = vector.multi_reduction <add>, %377, %cst_144 [2] : vector<2x16x16xf32> to vector<2x16xf32>
    %379 = vector.shape_cast %378 : vector<2x16xf32> to vector<2x16x1xf32>
    %380 = vector.broadcast %379 : vector<2x16x1xf32> to vector<2x16x16xf32>
    %381 = arith.divf %377, %380 : vector<2x16x16xf32>
    "tpu.trace_start"() <{level = 10 : i32, message = "bqk,bkd->bqd"}> : () -> ()
    %cst_145 = arith.constant dense<0.000000e+00> : vector<2x16x8xf32>
    %382 = tpu.matmul %381, %368, %cst_145 {dimension_numbers = #tpu.dot_dimension_numbers<[2], [1], [1], [2], [0, 0, 0, 1, 1, 2], [0], [0]>} : vector<2x16x16xf32>, vector<2x16x8xf32>, vector<2x16x8xf32> -> vector<2x16x8xf32>
    "tpu.trace_stop"() : () -> ()
    %383 = vector.shape_cast %382 : vector<2x16x8xf32> to vector<32x8xf32>
    %384 = vector.extract_strided_slice %291 {offsets = [24, 0], sizes = [8, 32], strides = [1, 1]} : vector<32x32xf32> to vector<8x32xf32>
    %cst_146 = arith.constant dense<0.000000e+00> : vector<32x32xf32>
    %385 = tpu.matmul %383, %384, %cst_146 {dimension_numbers = #tpu.dot_dimension_numbers<[1], [0], [0], [1], [0, 0, 1, 1], [], []>} : vector<32x8xf32>, vector<8x32xf32>, vector<32x32xf32> -> vector<32x32xf32>
    %386 = arith.addf %362, %385 : vector<32x32xf32>
    %c1_147 = arith.constant 1 : index
    %c0_148 = arith.constant 0 : index
    %c0_149 = arith.constant 0 : index
    %387 = vector.load %arg10[%c1_147, %c0_148, %c0_149] : memref<2x1x32xf32, #tpu.memory_space<vmem>>, vector<1x1x32xf32>
    %388 = vector.shape_cast %387 : vector<1x1x32xf32> to vector<1x32xf32>
    %389 = vector.broadcast %388 : vector<1x32xf32> to vector<32x32xf32>
    %390 = arith.addf %386, %389 : vector<32x32xf32>
    %391 = arith.addf %390, %282 : vector<32x32xf32>
    %c1_150 = arith.constant 1 : index
    %c0_151 = arith.constant 0 : index
    %c0_152 = arith.constant 0 : index
    %392 = vector.load %arg11[%c1_150, %c0_151, %c0_152] : memref<2x1x32xf32, #tpu.memory_space<vmem>>, vector<1x1x32xf32>
    %393 = vector.shape_cast %392 : vector<1x1x32xf32> to vector<1x32xf32>
    %c1_153 = arith.constant 1 : index
    %c0_154 = arith.constant 0 : index
    %c0_155 = arith.constant 0 : index
    %394 = vector.load %arg12[%c1_153, %c0_154, %c0_155] : memref<2x1x32xf32, #tpu.memory_space<vmem>>, vector<1x1x32xf32>
    %395 = vector.shape_cast %394 : vector<1x1x32xf32> to vector<1x32xf32>
    %cst_156 = arith.constant dense<0.000000e+00> : vector<32xf32>
    %396 = vector.multi_reduction <add>, %391, %cst_156 [1] : vector<32x32xf32> to vector<32xf32>
    %397 = vector.shape_cast %396 : vector<32xf32> to vector<32x1xf32>
    %cst_157 = arith.constant 3.200000e+01 : f32
    %398 = vector.broadcast %cst_157 : f32 to vector<32x1xf32>
    %399 = arith.divf %397, %398 : vector<32x1xf32>
    %400 = vector.broadcast %399 : vector<32x1xf32> to vector<32x32xf32>
    %401 = arith.subf %391, %400 : vector<32x32xf32>
    %402 = arith.mulf %401, %401 : vector<32x32xf32>
    %cst_158 = arith.constant dense<0.000000e+00> : vector<32xf32>
    %403 = vector.multi_reduction <add>, %402, %cst_158 [1] : vector<32x32xf32> to vector<32xf32>
    %404 = vector.shape_cast %403 : vector<32xf32> to vector<32x1xf32>
    %cst_159 = arith.constant 3.200000e+01 : f32
    %405 = vector.broadcast %cst_159 : f32 to vector<32x1xf32>
    %406 = arith.divf %404, %405 : vector<32x1xf32>
    %407 = vector.broadcast %399 : vector<32x1xf32> to vector<32x32xf32>
    %408 = arith.subf %391, %407 : vector<32x32xf32>
    %cst_160 = arith.constant 9.99999974E-6 : f32
    %409 = vector.broadcast %cst_160 : f32 to vector<32x1xf32>
    %410 = arith.addf %406, %409 : vector<32x1xf32>
    %411 = math.rsqrt %410 : vector<32x1xf32>
    %412 = vector.broadcast %411 : vector<32x1xf32> to vector<32x32xf32>
    %413 = arith.mulf %408, %412 : vector<32x32xf32>
    %414 = vector.broadcast %393 : vector<1x32xf32> to vector<32x32xf32>
    %415 = arith.mulf %413, %414 : vector<32x32xf32>
    %416 = vector.broadcast %395 : vector<1x32xf32> to vector<32x32xf32>
    %417 = arith.addf %415, %416 : vector<32x32xf32>
    %c1_161 = arith.constant 1 : index
    %c0_162 = arith.constant 0 : index
    %c0_163 = arith.constant 0 : index
    %418 = vector.load %arg13[%c1_161, %c0_162, %c0_163] : memref<2x32x64xf32, #tpu.memory_space<vmem>>, vector<1x32x64xf32>
    %419 = vector.shape_cast %418 : vector<1x32x64xf32> to vector<32x64xf32>
    %cst_164 = arith.constant dense<0.000000e+00> : vector<32x64xf32>
    %420 = tpu.matmul %417, %419, %cst_164 {dimension_numbers = #tpu.dot_dimension_numbers<[1], [0], [0], [1], [0, 0, 1, 1], [], []>} : vector<32x32xf32>, vector<32x64xf32>, vector<32x64xf32> -> vector<32x64xf32>
    %c1_165 = arith.constant 1 : index
    %c0_166 = arith.constant 0 : index
    %c0_167 = arith.constant 0 : index
    %421 = vector.load %arg14[%c1_165, %c0_166, %c0_167] : memref<2x1x64xf32, #tpu.memory_space<vmem>>, vector<1x1x64xf32>
    %422 = vector.shape_cast %421 : vector<1x1x64xf32> to vector<1x64xf32>
    %423 = vector.broadcast %422 : vector<1x64xf32> to vector<32x64xf32>
    %424 = arith.addf %420, %423 : vector<32x64xf32>
    %cst_168 = arith.constant 5.000000e-01 : f32
    %425 = vector.broadcast %cst_168 : f32 to vector<32x64xf32>
    %426 = arith.mulf %425, %424 : vector<32x64xf32>
    %cst_169 = arith.constant 0.707106769 : f32
    %427 = vector.broadcast %cst_169 : f32 to vector<32x64xf32>
    %428 = arith.mulf %424, %427 : vector<32x64xf32>
    %429 = math.absf %428 : vector<32x64xf32>
    %cst_170 = arith.constant 0.327591091 : f32
    %430 = vector.broadcast %cst_170 : f32 to vector<32x64xf32>
    %431 = arith.mulf %430, %429 : vector<32x64xf32>
    %cst_171 = arith.constant 1.000000e+00 : f32
    %432 = vector.broadcast %cst_171 : f32 to vector<32x64xf32>
    %433 = arith.addf %432, %431 : vector<32x64xf32>
    %cst_172 = arith.constant 1.000000e+00 : f32
    %434 = vector.broadcast %cst_172 : f32 to vector<32x64xf32>
    %435 = arith.divf %434, %433 : vector<32x64xf32>
    %cst_173 = arith.constant 1.06140542 : f32
    %436 = vector.broadcast %cst_173 : f32 to vector<32x64xf32>
    %437 = arith.mulf %436, %435 : vector<32x64xf32>
    %cst_174 = arith.constant -1.45315206 : f32
    %438 = vector.broadcast %cst_174 : f32 to vector<32x64xf32>
    %439 = arith.addf %437, %438 : vector<32x64xf32>
    %440 = arith.mulf %439, %435 : vector<32x64xf32>
    %cst_175 = arith.constant 1.42141378 : f32
    %441 = vector.broadcast %cst_175 : f32 to vector<32x64xf32>
    %442 = arith.addf %440, %441 : vector<32x64xf32>
    %443 = arith.mulf %442, %435 : vector<32x64xf32>
    %cst_176 = arith.constant -0.284496725 : f32
    %444 = vector.broadcast %cst_176 : f32 to vector<32x64xf32>
    %445 = arith.addf %443, %444 : vector<32x64xf32>
    %446 = arith.mulf %445, %435 : vector<32x64xf32>
    %cst_177 = arith.constant 0.254829586 : f32
    %447 = vector.broadcast %cst_177 : f32 to vector<32x64xf32>
    %448 = arith.addf %446, %447 : vector<32x64xf32>
    %449 = arith.mulf %448, %435 : vector<32x64xf32>
    %cst_178 = arith.constant 0.000000e+00 : f32
    %450 = vector.broadcast %cst_178 : f32 to vector<32x64xf32>
    %451 = arith.subf %450, %429 : vector<32x64xf32>
    %452 = arith.mulf %451, %429 : vector<32x64xf32>
    %453 = math.exp %452 : vector<32x64xf32>
    %454 = arith.mulf %449, %453 : vector<32x64xf32>
    %cst_179 = arith.constant 1.000000e+00 : f32
    %455 = vector.broadcast %cst_179 : f32 to vector<32x64xf32>
    %456 = arith.subf %455, %454 : vector<32x64xf32>
    %cst_180 = arith.constant 0.000000e+00 : f32
    %457 = vector.broadcast %cst_180 : f32 to vector<32x64xf32>
    %458 = arith.cmpf oge, %428, %457 : vector<32x64xf32>
    %cst_181 = arith.constant 0.000000e+00 : f32
    %459 = vector.broadcast %cst_181 : f32 to vector<32x64xf32>
    %460 = arith.subf %459, %456 : vector<32x64xf32>
    %461 = arith.select %458, %456, %460 : vector<32x64xi1>, vector<32x64xf32>
    %cst_182 = arith.constant 1.000000e+00 : f32
    %462 = vector.broadcast %cst_182 : f32 to vector<32x64xf32>
    %463 = arith.addf %462, %461 : vector<32x64xf32>
    %464 = arith.mulf %426, %463 : vector<32x64xf32>
    %c1_183 = arith.constant 1 : index
    %c0_184 = arith.constant 0 : index
    %c0_185 = arith.constant 0 : index
    %465 = vector.load %arg15[%c1_183, %c0_184, %c0_185] : memref<2x64x32xf32, #tpu.memory_space<vmem>>, vector<1x64x32xf32>
    %466 = vector.shape_cast %465 : vector<1x64x32xf32> to vector<64x32xf32>
    %cst_186 = arith.constant dense<0.000000e+00> : vector<32x32xf32>
    %467 = tpu.matmul %464, %466, %cst_186 {dimension_numbers = #tpu.dot_dimension_numbers<[1], [0], [0], [1], [0, 0, 1, 1], [], []>} : vector<32x64xf32>, vector<64x32xf32>, vector<32x32xf32> -> vector<32x32xf32>
    %c1_187 = arith.constant 1 : index
    %c0_188 = arith.constant 0 : index
    %c0_189 = arith.constant 0 : index
    %468 = vector.load %arg16[%c1_187, %c0_188, %c0_189] : memref<2x1x32xf32, #tpu.memory_space<vmem>>, vector<1x1x32xf32>
    %469 = vector.shape_cast %468 : vector<1x1x32xf32> to vector<1x32xf32>
    %470 = vector.broadcast %469 : vector<1x32xf32> to vector<32x32xf32>
    %471 = arith.addf %467, %470 : vector<32x32xf32>
    %472 = arith.addf %471, %417 : vector<32x32xf32>
    %c1_190 = arith.constant 1 : index
    %c0_191 = arith.constant 0 : index
    %c0_192 = arith.constant 0 : index
    %473 = vector.load %arg17[%c1_190, %c0_191, %c0_192] : memref<2x1x32xf32, #tpu.memory_space<vmem>>, vector<1x1x32xf32>
    %474 = vector.shape_cast %473 : vector<1x1x32xf32> to vector<1x32xf32>
    %c1_193 = arith.constant 1 : index
    %c0_194 = arith.constant 0 : index
    %c0_195 = arith.constant 0 : index
    %475 = vector.load %arg18[%c1_193, %c0_194, %c0_195] : memref<2x1x32xf32, #tpu.memory_space<vmem>>, vector<1x1x32xf32>
    %476 = vector.shape_cast %475 : vector<1x1x32xf32> to vector<1x32xf32>
    %cst_196 = arith.constant dense<0.000000e+00> : vector<32xf32>
    %477 = vector.multi_reduction <add>, %472, %cst_196 [1] : vector<32x32xf32> to vector<32xf32>
    %478 = vector.shape_cast %477 : vector<32xf32> to vector<32x1xf32>
    %cst_197 = arith.constant 3.200000e+01 : f32
    %479 = vector.broadcast %cst_197 : f32 to vector<32x1xf32>
    %480 = arith.divf %478, %479 : vector<32x1xf32>
    %481 = vector.broadcast %480 : vector<32x1xf32> to vector<32x32xf32>
    %482 = arith.subf %472, %481 : vector<32x32xf32>
    %483 = arith.mulf %482, %482 : vector<32x32xf32>
    %cst_198 = arith.constant dense<0.000000e+00> : vector<32xf32>
    %484 = vector.multi_reduction <add>, %483, %cst_198 [1] : vector<32x32xf32> to vector<32xf32>
    %485 = vector.shape_cast %484 : vector<32xf32> to vector<32x1xf32>
    %cst_199 = arith.constant 3.200000e+01 : f32
    %486 = vector.broadcast %cst_199 : f32 to vector<32x1xf32>
    %487 = arith.divf %485, %486 : vector<32x1xf32>
    %488 = vector.broadcast %480 : vector<32x1xf32> to vector<32x32xf32>
    %489 = arith.subf %472, %488 : vector<32x32xf32>
    %cst_200 = arith.constant 9.99999974E-6 : f32
    %490 = vector.broadcast %cst_200 : f32 to vector<32x1xf32>
    %491 = arith.addf %487, %490 : vector<32x1xf32>
    %492 = math.rsqrt %491 : vector<32x1xf32>
    %493 = vector.broadcast %492 : vector<32x1xf32> to vector<32x32xf32>
    %494 = arith.mulf %489, %493 : vector<32x32xf32>
    %495 = vector.broadcast %474 : vector<1x32xf32> to vector<32x32xf32>
    %496 = arith.mulf %494, %495 : vector<32x32xf32>
    %497 = vector.broadcast %476 : vector<1x32xf32> to vector<32x32xf32>
    %498 = arith.addf %496, %497 : vector<32x32xf32>
    %499 = vector.shape_cast %498 : vector<32x32xf32> to vector<2x16x32xf32>
    %500 = vector.extract_strided_slice %499 {offsets = [0, 0, 0], sizes = [2, 1, 32], strides = [1, 1, 1]} : vector<2x16x32xf32> to vector<2x1x32xf32>
    %501 = vector.shape_cast %500 : vector<2x1x32xf32> to vector<2x32xf32>
    %c0_201 = arith.constant 0 : index
    %c0_202 = arith.constant 0 : index
    %502 = vector.load %arg19[%c0_201, %c0_202] : memref<32x2xf32, #tpu.memory_space<vmem>>, vector<32x2xf32>
    %cst_203 = arith.constant dense<0.000000e+00> : vector<2x2xf32>
    %503 = tpu.matmul %501, %502, %cst_203 {dimension_numbers = #tpu.dot_dimension_numbers<[1], [0], [0], [1], [0, 0, 1, 1], [], []>} : vector<2x32xf32>, vector<32x2xf32>, vector<2x2xf32> -> vector<2x2xf32>
    %c0_204 = arith.constant 0 : index
    %c0_205 = arith.constant 0 : index
    %504 = vector.load %arg20[%c0_204, %c0_205] : memref<1x2xf32, #tpu.memory_space<vmem>>, vector<1x2xf32>
    %505 = vector.broadcast %504 : vector<1x2xf32> to vector<2x2xf32>
    %506 = arith.addf %503, %505 : vector<2x2xf32>
    %cst_206 = arith.constant 0.000000e+00 : f32
    %507 = vector.broadcast %cst_206 : f32 to vector<2x2xf32>
    %508 = arith.subf %507, %506 : vector<2x2xf32>
    %509 = math.exp %508 : vector<2x2xf32>
    %cst_207 = arith.constant 1.000000e+00 : f32
    %510 = vector.broadcast %cst_207 : f32 to vector<2x2xf32>
    %511 = arith.addf %510, %509 : vector<2x2xf32>
    %cst_208 = arith.constant 1.000000e+00 : f32
    %512 = vector.broadcast %cst_208 : f32 to vector<2x2xf32>
    %513 = arith.divf %512, %511 : vector<2x2xf32>
    %c0_209 = arith.constant 0 : index
    %c0_210 = arith.constant 0 : index
    %514 = vector.load %arg21[%c0_209, %c0_210] : memref<2x2xf32, #tpu.memory_space<vmem>>, vector<2x2xf32>
    tpu.vector_store %arg21[%c0_209, %c0_210], %513 {strides = array<i32>} : memref<2x2xf32, #tpu.memory_space<vmem>>, vector<2x2xf32>,
    return
  }
}

</mosaic_0001>

<bundles_post_ra>
// kernel: graphcodebert_classifier_forward.1
= control target key start
LH: loop header
LB: loop body
LE: loop exit
PB: predicated region body
PF: predicated region fallthrough
CT: control target
= control target key end

     0   :  { %s8388_s0 = inlined_call_operand.vmem [shape: s32[2,16], index: 0, kind: input, shape index: {}]   ;;  %s8389_s1 = inlined_call_operand.vmem [shape: f32[2,16,16], index: 1, kind: input, shape index: {}]   ;;  %s8390_s2 = inlined_call_operand.vmem [shape: f32[2,16,32], index: 2, kind: input, shape index: {}]   ;;  %s8391_s3 = inlined_call_operand.vmem [shape: f32[2,16,32], index: 3, kind: input, shape index: {}]   ;;  %s8392_s4 = inlined_call_operand.vmem [shape: f32[1,32], index: 4, kind: input, shape index: {}]   ;;  %s8393_s5 = inlined_call_operand.vmem [shape: f32[1,32], index: 5, kind: input, shape index: {}]   ;;  %s8394_s6 = inlined_call_operand.vmem [shape: f32[1,32], index: 6, kind: input, shape index: {}]   ;;  %s8395_s7 = inlined_call_operand.vmem [shape: f32[2,32,96], index: 7, kind: input, shape index: {}]   ;;  %s8396_s8 = inlined_call_operand.vmem [shape: f32[2,1,96], index: 8, kind: input, shape index: {}]   ;;  %s8397_s9 = inlined_call_operand.vmem [shape: f32[2,32,32], index: 9, kind: input, shape index: {}]   ;;  %s8398_s10 = inlined_call_operand.vmem [shape: f32[2,1,32], index: 10, kind: input, shape index: {}]   ;;  %s8399_s11 = inlined_call_operand.vmem [shape: f32[2,1,32], index: 11, kind: input, shape index: {}]   ;;  %s8400_s12 = inlined_call_operand.vmem [shape: f32[2,1,32], index: 12, kind: input, shape index: {}]   ;;  %s8401_s13 = inlined_call_operand.vmem [shape: f32[2,32,64], index: 13, kind: input, shape index: {}]   ;;  %s8402_s14 = inlined_call_operand.vmem [shape: f32[2,1,64], index: 14, kind: input, shape index: {}]   ;;  %s8403_s15 = inlined_call_operand.vmem [shape: f32[2,64,32], index: 15, kind: input, shape index: {}]   ;;  %s8404_s16 = inlined_call_operand.vmem [shape: f32[2,1,32], index: 16, kind: input, shape index: {}]   ;;  %s8405_s17 = inlined_call_operand.vmem [shape: f32[2,1,32], index: 17, kind: input, shape index: {}]   ;;  %s8406_s18 = inlined_call_operand.vmem [shape: f32[2,1,32], index: 18, kind: input, shape index: {}]   ;;  %s8407_s19 = inlined_call_operand.vmem [shape: f32[32,2], index: 19, kind: input, shape index: {}]   ;;  %s8408_s20 = inlined_call_operand.vmem [shape: f32[1,2], index: 20, kind: input, shape index: {}]   ;;  %s8409_s21 = inlined_call_operand.hbm [shape: f32[2,2], index: 21, kind: output, shape index: {}]  }
   0x1   :  { %8419 = sst [smem:[#allocation5_spill]] %s8388_s0 }
   0x2   :  { %8420 = sst [smem:[#allocation6_spill]] %s8389_s1 }
   0x3   :  { %8421 = sst [smem:[#allocation7_spill]] %s8390_s2 }
   0x4   :  { %8422 = sst [smem:[#allocation8_spill]] %s8391_s3 }
   0x5   :  { %8423 = sst [smem:[#allocation9_spill]] %s8392_s4 }
   0x6   :  { %8424 = sst [smem:[#allocation10_spill]] %s8393_s5 }
   0x7   :  { %s8425_s26 = sld [smem:[#allocation5_spill]]  ;;  %v84_v1 = vlaneseq  ;;  %v7332_v2 = vmov 1966171168   ;;  %v7333_v5 = vmov 0.0  }
   0x8   :  { %v108_v3 = vunpack.c.l.s4 %v7332_v2 }
   0x9   :  { %v85_v4 = vshrl.u32 %v84_v1, 7 }
   0xa   :  { %v109_v7 = vunpack.c.0.s8 %v108_v3 }
   0xd   :  { %v69_v0 = vld [vmem:[%s8425_s26] sm:$0x3] }
   0xe   :  { %vm78_vm0 = vcmp.eq.s32.totalorder %v69_v0, 0  ;;  %vm81_vm1 = vcmp.ge.s32.totalorder %v69_v0, 2 }
   0xf   :  { %v5805_v6 = vsel %vm78_vm0, 1.0, %v7333_v5 }
  0x10   :  { %26 = vsyncpa [#allocation3], 0  ;;  %v5806_v8 = vsel %vm81_vm1, 1.0, %v7333_v5  ;;  %v86_v9 = vsub.s32 0, %v85_v4  ;;  %v97_v10 = vsub.s32 1, %v85_v4  ;;  %v112_v11 = vsub.s32 %v109_v7, %v85_v4  ;;  %s8426_s28 = sld [smem:[#allocation6_spill]] }
  0x11   :  { %vm147_vm2 = vcmask 130048   ;;  %s8427_s24 = sld [smem:[#allocation7_spill]]  ;;  %s8428_s4 = sld [smem:[#allocation8_spill]]  ;;  %vm371_vm3 = vcmask 261120   ;;  %vm571_vm4 = vcmask 64512   ;;  %vm2910_vm8 = vcmask 523264  }
  0x12   :  { %v87_v12 = vrot.slane %v5805_v6, %v86_v9  ;;  %v98_v13 = vrot.slane %v5805_v6, %v97_v10  ;;  %v113_v14 = vrot.slane %v5806_v8, %v112_v11  ;;  %s8429_s1 = sld [smem:[#allocation9_spill]]  ;;  %s7334_s26 = smov 96   ;;  %vm7608_vm5 = vmpackc.low %vm571_vm4, %vm571_vm4  ;;  %vm7346_vm15 = vmmov 0  }
  0x13   :  { %s7335_s27 = smov 64   ;;  %s7336_s3 = smov 88   ;;  %vm5709_vm0 = vcmask 1041409   ;;  %vm5789_vm1 = vcmask 9216  }
  0x14   :  { %89 = vbcast.lane.b32.xlu0 %v87_v12, 256  ;;  %100 = vbcast.lane.b32.xlu1 %v98_v13, 256  ;;  %v114_v15 = vcombine.high %v113_v14, %v113_v14  ;;  %v121_v16 = vrot.slane %v113_v14, %v112_v11  ;;  %s7338_s29 = smov 56   ;;  %s7339_s0 = smov 80  }
  0x15   :  { %s8415_s2 = smov 104   ;;  %s8413_s30 = smov 40  }
  0x16   :  { %v132_v17 = vrot.slane %v121_v16, %v86_v9  ;;  %v128_v18 = vrot.slane %v114_v15, %v112_v11  ;;  %v7470_v22 = vld [vmem:[%s8426_s28] sm:$0xff]  ;;  %v7475_v23 = vld [vmem:[%s8426_s28 + $0x10] sm:$0xff]  ;;  %v7486_v30 = vld [vmem:[%s8426_s28 + $0x8] sm:$0xff] }
  0x17   :  { %v7491_v31 = vld [vmem:[%s8426_s28 + $0x18] sm:$0xff]  ;;  %v74_v40 = vld [vmem:[%s8427_s24] sm:$0xff]  ;;  %v75_v41 = vld [vmem:[%s8427_s24 + $0x8] sm:$0xff]  ;;  %s7337_s28 = smov 120  }
  0x18   :  { %93 = vbcast.lane.b32.xlu0 %v87_v12, 264  ;;  %104 = vbcast.lane.b32.xlu1 %v98_v13, 264  ;;  %v136_v19 = vrot.slane %v128_v18, %v86_v9  ;;  %v6662_v42 = vpack.c.bf16 %v75_v41, %v74_v40  ;;  %v76_v43 = vld [vmem:[%s8427_s24 + $0x10] sm:$0xff]  ;;  %v77_v44 = vld [vmem:[%s8427_s24 + $0x18] sm:$0xff]  ;;  %v351_v9 = vld [vmem:[%s8428_s4 + $0x8] sm:$0xff]  ;;  %s8417_s24 = smov 72  }
  0x19   :  { %v6666_v45 = vpack.c.bf16 %v77_v44, %v76_v43  ;;  %v350_v11 = vld [vmem:[%s8428_s4] sm:$0xff] }
  0x1a   :  { %6663 = vmatprep.subr.bf16.mxu0 %v6662_v42  ;;  %v5811_v14 = vld [vmem:[%s8429_s1] ss:$0 sm:$0xff]  ;;  %s8430_s1 = sld [smem:[#allocation10_spill]] }
  0x1b   :  { %6665 = vmatpush3.bf16.msra.mxu0 %v6662_v42  ;;  %6667 = vmatprep.subr.bf16.mxu1 %v6666_v45 }
  0x1c   :  { %6669 = vmatpush3.bf16.msra.mxu1 %v6666_v45 }
  0x86   :  { %v7463_v20 = vpop.permute.xlu0 %89  ;;  %v7465_v21 = vpop.permute.xlu1 %100 }
  0x87   :  { %v139_v24 = vmul.f32 %v132_v17, %v7463_v20  ;;  %v141_v25 = vmul.f32 %v136_v19, %v7465_v21  ;;  %v334_v63 = vsub.f32 1.0, %v7463_v20  ;;  %v336_v7 = vsub.f32 1.0, %v7465_v21 }
  0x89   :  { %v143_v26 = vmul.f32 %v139_v24, %v7470_v22  ;;  %v145_v27 = vmul.f32 %v141_v25, %v7475_v23  ;;  %v338_v6 = vmul.f32 %v334_v63, %v74_v40  ;;  %v353_v25 = vld [vmem:[%s8428_s4 + $0x18] sm:$0xff]  ;;  %v455_v63 = vld [vmem:[%s8395_s7 + $0x10] sm:$0xff] }
  0x8a   :  { %v94_v28 = vpop.permute.xlu0 %93  ;;  %v7481_v29 = vpop.permute.xlu1 %104 }
  0x8b   :  { %v148_v32 = vsel %vm147_vm2, %v143_v26, 0.0  ;;  %v140_v33 = vmul.f32 %v132_v17, %v94_v28  ;;  %v142_v34 = vmul.f32 %v136_v19, %v7481_v29  ;;  %v154_v35 = vsel %vm147_vm2, %v145_v27, 0.0 }
  0x8c   :  { %149 = vadd.xlane.f32.xlu0 %v148_v32  ;;  %v335_v62 = vsub.f32 1.0, %v94_v28  ;;  %v337_v2 = vsub.f32 1.0, %v7481_v29  ;;  %v340_v19 = vmul.f32 %v336_v7, %v76_v43 }
  0x8d   :  { %v144_v36 = vmul.f32 %v140_v33, %v7486_v30  ;;  %v146_v37 = vmul.f32 %v142_v34, %v7491_v31 }
  0x8e   :  { %v339_v1 = vmul.f32 %v335_v62, %v75_v41  ;;  %v341_v15 = vmul.f32 %v337_v2, %v77_v44 }
  0x8f   :  { %v151_v38 = vsel %vm147_vm2, %v144_v36, 0.0  ;;  %v157_v39 = vsel %vm147_vm2, %v146_v37, 0.0 }
  0x90   :  { %155 = vadd.xlane.f32.xlu0 %v154_v35  ;;  %152 = vadd.xlane.f32.xlu1 %v151_v38 }
  0x94   :  { %158 = vadd.xlane.f32.xlu0 %v157_v39 }
 0x119   :  { %v150_v46 = vpop.xlane.xlu0 %149 }
 0x11a   :  { %v160_v47 = vadd.f32 1e-10, %v150_v46 }
 0x11c   :  { %7100 = vrcp.f32 %v160_v47 }
 0x11d   :  { %v153_v48 = vpop.xlane.xlu1 %152  ;;  %v156_v49 = vpop.xlane.xlu0 %155 }
 0x11e   :  { %v161_v50 = vadd.f32 1e-10, %v153_v48  ;;  %v162_v51 = vadd.f32 1e-10, %v156_v49 }
 0x120   :  { %7102 = vrcp.f32 %v161_v50 }
 0x121   :  { %7104 = vrcp.f32 %v162_v51  ;;  %v159_v52 = vpop.xlane.xlu0 %158 }
 0x122   :  { %v163_v53 = vadd.f32 1e-10, %v159_v52 }
 0x124   :  { %7106 = vrcp.f32 %v163_v53 }
 0x126   :  { %v7101_v54 = vpop.eup %7100 }
 0x127   :  { %v165_v55 = vmul.f32 %v7101_v54, %v143_v26 }
 0x129   :  { %6253 = vmatprep.mubr.msk.f32.mxu0 %vm147_vm2, %v165_v55 }
 0x12a   :  { %v7103_v56 = vpop.eup %7102 }
 0x12b   :  { %v7105_v57 = vpop.eup %7104  ;;  %v167_v58 = vmul.f32 %v7103_v56, %v144_v36 }
 0x12c   :  { %v169_v59 = vmul.f32 %v7105_v57, %v145_v27 }
 0x12d   :  { %6254 = vmatmul.mubr.msk.f32.vlgmr.msra.gmra.mrb[0].mxu0 %vm147_vm2, %v167_v58 }
 0x12e   :  { %v7107_v60 = vpop.eup %7106  ;;  %6260 = vmatprep.mubr.msk.f32.mxu1 %vm147_vm2, %v169_v59 }
 0x12f   :  { %v171_v61 = vmul.f32 %v7107_v60, %v146_v37  ;;  %v453_v60 = vld [vmem:[%s8395_s7] sm:$0xff] }
 0x131   :  { %6261 = vmatmul.mubr.msk.f32.vlgmr.msra.gmra.mrb[0].mxu1 %vm147_vm2, %v171_v61  ;;  %v454_v61 = vld [vmem:[%s8395_s7 + $0x8] sm:$0xff] }
 0x132   :  { %v6670_v62 = vpack.c.bf16 %v454_v61, %v453_v60  ;;  %v448_v60 = vsub.f32 1.0, %v7491_v31 }
 0x134   :  { %6671 = vmatprep.subr.bf16.mxu0 %v6670_v62 }
 0x135   :  { %6673 = vmatpush3.bf16.msra.mxu0 %v6670_v62 }
 0x200   :  { %v6255_v0 = vpop.f32.mrb[0].mxu0 }
 0x201   :  { %v343_v3 = vmul.f32 %v6255_v0, %v94_v28  ;;  %v244_v4 = vpop.f32.mrb[1].mxu0  ;;  %v352_v28 = vld [vmem:[%s8428_s4 + $0x10] sm:$0xff]  ;;  %v456_v0 = vld [vmem:[%s8395_s7 + $0x18] sm:$0xff]  ;;  %s7340_s4 = smov 112  }
 0x202   :  { %v342_v8 = vmul.f32 %v244_v4, %v7463_v20 }
 0x203   :  { %v347_v10 = vadd.f32 %v343_v3, %v339_v1  ;;  %v6674_v1 = vpack.c.bf16 %v456_v0, %v455_v63 }
 0x204   :  { %v346_v12 = vadd.f32 %v342_v8, %v338_v6  ;;  %v6262_v13 = vpop.f32.mrb[0].mxu1 }
 0x205   :  { %v345_v16 = vmul.f32 %v6262_v13, %v7481_v29  ;;  %v325_v17 = vpop.f32.mrb[1].mxu1  ;;  %v355_v18 = vadd.f32 %v351_v9, %v347_v10  ;;  %6675 = vmatprep.subr.bf16.mxu0 %v6674_v1 }
 0x206   :  { %v344_v20 = vmul.f32 %v325_v17, %v7465_v21  ;;  %v354_v24 = vadd.f32 %v350_v11, %v346_v12  ;;  %6677 = vmatpush3.bf16.msra.mxu0 %v6674_v1 }
 0x207   :  { %v349_v26 = vadd.f32 %v345_v16, %v341_v15  ;;  %v366_v27 = vadd.f32 %v5811_v14, %v355_v18  ;;  %v5812_v16 = vld [vmem:[%s8430_s1] ss:$0 sm:$0xff]  ;;  %s7341_s1 = smov 48  }
 0x208   :  { %v348_v32 = vadd.f32 %v344_v20, %v340_v19  ;;  %v365_v33 = vadd.f32 %v5811_v14, %v354_v24  ;;  %v5813_v20 = vld [vmem:[%s8394_s6] ss:$0 sm:$0xff] }
 0x209   :  { %v375_v29 = vsel %vm371_vm3, %v366_v27, 0.0  ;;  %v357_v34 = vadd.f32 %v353_v25, %v349_v26 }
 0x20a   :  { %376 = vadd.xlane.f32.xlu0 %v375_v29  ;;  %v372_v21 = vsel %vm371_vm3, %v365_v33, 0.0  ;;  %v356_v35 = vadd.f32 %v352_v28, %v348_v32 }
 0x20b   :  { %373 = vadd.xlane.f32.xlu1 %v372_v21  ;;  %v368_v36 = vadd.f32 %v5811_v14, %v357_v34 }
 0x20c   :  { %v367_v37 = vadd.f32 %v5811_v14, %v356_v35 }
 0x20d   :  { %v381_v38 = vsel %vm371_vm3, %v368_v36, 0.0 }
 0x20e   :  { %382 = vadd.xlane.f32.xlu0 %v381_v38  ;;  %v378_v39 = vsel %vm371_vm3, %v367_v37, 0.0 }
 0x20f   :  { %379 = vadd.xlane.f32.xlu1 %v378_v39 }
 0x297   :  { %v377_v40 = vpop.xlane.xlu0 %376 }
 0x298   :  { %v386_v41 = vmul.f32 0.03125, %v377_v40  ;;  %v374_v42 = vpop.xlane.xlu1 %373 }
 0x299   :  { %v385_v43 = vmul.f32 0.03125, %v374_v42 }
 0x29a   :  { %v390_v44 = vsub.f32 %v366_v27, %v386_v41 }
 0x29b   :  { %v389_v45 = vsub.f32 %v365_v33, %v385_v43  ;;  %v383_v46 = vpop.xlane.xlu0 %382 }
 0x29c   :  { %v388_v47 = vmul.f32 0.03125, %v383_v46  ;;  %v380_v48 = vpop.xlane.xlu1 %379  ;;  %v394_v49 = vmul.f32 %v390_v44, %v390_v44 }
 0x29d   :  { %v387_v50 = vmul.f32 0.03125, %v380_v48  ;;  %v393_v51 = vmul.f32 %v389_v45, %v389_v45 }
 0x29e   :  { %v392_v52 = vsub.f32 %v368_v36, %v388_v47  ;;  %v400_v53 = vsel %vm371_vm3, %v394_v49, 0.0 }
 0x29f   :  { %v391_v54 = vsub.f32 %v367_v37, %v387_v50  ;;  %401 = vadd.xlane.f32.xlu0 %v400_v53  ;;  %v397_v55 = vsel %vm371_vm3, %v393_v51, 0.0  ;;  %v5814_v37 = vld [vmem:[%s8396_s8] ss:$0 sm:$0xff] }
 0x2a0   :  { %398 = vadd.xlane.f32.xlu1 %v397_v55  ;;  %v396_v56 = vmul.f32 %v392_v52, %v392_v52 }
 0x2a1   :  { %v395_v57 = vmul.f32 %v391_v54, %v391_v54 }
 0x2a2   :  { %v406_v58 = vsel %vm371_vm3, %v396_v56, 0.0 }
 0x2a3   :  { %407 = vadd.xlane.f32.xlu0 %v406_v58  ;;  %v403_v59 = vsel %vm371_vm3, %v395_v57, 0.0  ;;  %v446_v57 = vsub.f32 1.0, %v7486_v30  ;;  %v445_v58 = vsub.f32 1.0, %v7470_v22 }
 0x2a4   :  { %404 = vadd.xlane.f32.xlu1 %v403_v59 }
 0x2a5   :  { %v7626_v59 = vmul.f32 -3.4028235e+38, %v446_v57  ;;  %v7629_v61 = vmul.f32 -3.4028235e+38, %v445_v58 }
 0x32c   :  { %v402_v2 = vpop.xlane.xlu0 %401 }
 0x32d   :  { %v410_v3 = vmul.f32 0.03125, %v402_v2  ;;  %v399_v4 = vpop.xlane.xlu1 %398  ;;  %v7631_v2 = vmul.f32 -3.4028235e+38, %v448_v60 }
 0x32e   :  { %v409_v6 = vmul.f32 0.03125, %v399_v4 }
 0x32f   :  { %v414_v7 = vadd.f32 1e-05, %v410_v3 }
 0x330   :  { %v413_v8 = vadd.f32 1e-05, %v409_v6  ;;  %v408_v9 = vpop.xlane.xlu0 %407 }
 0x331   :  { %7108 = vrsqrt.f32 %v414_v7  ;;  %v412_v10 = vmul.f32 0.03125, %v408_v9  ;;  %v405_v11 = vpop.xlane.xlu1 %404 }
 0x332   :  { %7110 = vrsqrt.f32 %v413_v8  ;;  %v411_v12 = vmul.f32 0.03125, %v405_v11 }
 0x333   :  { %v416_v13 = vadd.f32 1e-05, %v412_v10  ;;  %v447_v10 = vsub.f32 1.0, %v7475_v23 }
 0x334   :  { %v415_v14 = vadd.f32 1e-05, %v411_v12 }
 0x335   :  { %7112 = vrsqrt.f32 %v416_v13  ;;  %v7642_v11 = vmul.f32 -3.4028235e+38, %v447_v10 }
 0x336   :  { %7114 = vrsqrt.f32 %v415_v14 }
 0x33b   :  { %v7109_v15 = vpop.eup %7108 }
 0x33c   :  { %v7111_v17 = vpop.eup %7110  ;;  %v422_v18 = vmul.f32 %v7109_v15, %v390_v44 }
 0x33d   :  { %v421_v19 = vmul.f32 %v7111_v17, %v389_v45 }
 0x33e   :  { %v432_v24 = vmul.f32 %v5812_v16, %v422_v18 }
 0x33f   :  { %v7113_v25 = vpop.eup %7112  ;;  %v431_v26 = vmul.f32 %v5812_v16, %v421_v19 }
 0x340   :  { %v7115_v27 = vpop.eup %7114  ;;  %v424_v28 = vmul.f32 %v7113_v25, %v392_v52  ;;  %v7565_v29 = vadd.f32 %v5813_v20, %v432_v24 }
 0x341   :  { %v7563_v32 = vadd.f32 %v5813_v20, %v431_v26  ;;  %v423_v33 = vmul.f32 %v7115_v27, %v391_v54 }
 0x342   :  { %v434_v34 = vmul.f32 %v5812_v16, %v424_v28 }
 0x343   :  { %6271 = vmatprep.mubr.msk.f32.mxu0 %vm371_vm3, %v7563_v32  ;;  %v433_v21 = vmul.f32 %v5812_v16, %v423_v33 }
 0x344   :  { %6272 = vmatmul.mubr.msk.f32.vlgmr.msra.gmra.mrb[2].mxu0 %vm371_vm3, %v7565_v29  ;;  %v7573_v36 = vadd.f32 %v5813_v20, %v434_v34 }
 0x345   :  { %v7571_v35 = vadd.f32 %v5813_v20, %v433_v21 }
 0x347   :  { %6274 = vmatprep.mubr.msk.f32.mxu0 %vm371_vm3, %v7571_v35 }
 0x348   :  { %6275 = vmatmul.mubr.msk.f32.gmra.mrb[4].mxu0 %vm371_vm3, %v7573_v36 }
 0x417   :  { %v6273_v38 = vpop.f32.mrb[2].mxu0 }
 0x418   :  { %v7582_v39 = vadd.f32 %v6273_v38, %v5814_v37  ;;  %v542_v40 = vpop.f32.mrb[3].mxu0 }
 0x419   :  { %v7584_v41 = vadd.f32 %v5814_v37, %v542_v40 }
 0x41b   :  { %v6276_v42 = vpop.f32.mrb[4].mxu0  ;;  %6281 = vmatprep.mubr.msk.f32.mxu1 %vm571_vm4, %v7584_v41  ;;  %v7590_v43 = vpack.i.bf16 %v7582_v39, %v7584_v41 }
 0x41c   :  { %v7592_v44 = vadd.f32 %v6276_v42, %v5814_v37  ;;  %v552_v45 = vpop.f32.mrb[5].mxu0 }
 0x41d   :  { %v7594_v46 = vadd.f32 %v5814_v37, %v552_v45  ;;  %6941 = vrot.lane.b32.xlu1 %v7590_v43, %s7334_s26 }
 0x41f   :  { %6288 = vmatprep.mubr.msk.f32.mxu0 %vm571_vm4, %v7594_v46  ;;  %v7602_v47 = vpack.i.bf16 %v7592_v44, %v7594_v46 }
 0x421   :  { %6946 = vrot.lane.b32.xlu0 %v7602_v47, %s7334_s26 }
 0x48f   :  { %v6942_v48 = vpop.permute.xlu1 %6941 }
 0x490   :  { %v6944_v49 = vunpack.i.h.bf16 %v6942_v48  ;;  %v6943_v50 = vunpack.i.l.bf16 %v6942_v48 }
 0x492   :  { %v6678_v52 = vpack.c.bf16 %v6944_v49, %v6943_v50 }
 0x493   :  { %v6947_v53 = vpop.permute.xlu0 %6946 }
 0x494   :  { %v6949_v54 = vunpack.i.h.bf16 %v6947_v53  ;;  %v6948_v55 = vunpack.i.l.bf16 %v6947_v53  ;;  %6680 = vmatprep.subr.msk.bf16.mxu1 %vm7608_vm5, %v6678_v52 }
 0x495   :  { %6683 = vmatpush3.bf16.xpose.msk.msra.mxu1 %vm7608_vm5, %v6678_v52 }
 0x496   :  { %v6684_v56 = vpack.c.bf16 %v6949_v54, %v6948_v55 }
 0x498   :  { %6686 = vmatprep.subr.msk.bf16.mxu0 %vm7608_vm5, %v6684_v56 }
 0x499   :  { %6689 = vmatpush3.bf16.xpose.msk.msra.mxu0 %vm7608_vm5, %v6684_v56 }
 0x49c   :  { %6282 = vmatmul.mubr.msk.f32.vlgmr.msra.gmra.mrb[2].mxu1 %vm571_vm4, %v7582_v39 }
 0x4a0   :  { %6289 = vmatmul.mubr.msk.f32.vlgmr.msra.gmra.mrb[6].mxu0 %vm571_vm4, %v7592_v44 }
 0x56f   :  { %v6283_v62 = vpop.f32.mrb[2].mxu1 }
 0x570   :  { %v745_v63 = vmul.f32 0.35355338, %v6283_v62  ;;  %v646_v0 = vpop.f32.mrb[3].mxu1 }
 0x571   :  { %v744_v1 = vmul.f32 0.35355338, %v646_v0 }
 0x572   :  { %v749_v3 = vadd.f32 %v745_v63, %v7626_v59 }
 0x573   :  { %v6290_v4 = vpop.f32.mrb[6].mxu0  ;;  %v748_v6 = vadd.f32 %v744_v1, %v7629_v61 }
 0x574   :  { %v747_v30 = vmul.f32 0.35355338, %v6290_v4  ;;  %v735_v7 = vpop.f32.mrb[7].mxu0  ;;  %v755_v22 = vsel %vm147_vm2, %v749_v3, -inf }
 0x575   :  { %756 = vmax.xlane.f32.xlu0 %v755_v22  ;;  %v752_v31 = vsel %vm147_vm2, %v748_v6, -inf  ;;  %v746_v12 = vmul.f32 0.35355338, %v735_v7 }
 0x576   :  { %753 = vmax.xlane.f32.xlu1 %v752_v31  ;;  %v751_v8 = vadd.f32 %v747_v30, %v7631_v2 }
 0x577   :  { %v750_v13 = vadd.f32 %v746_v12, %v7642_v11 }
 0x578   :  { %v761_v9 = vsel %vm147_vm2, %v751_v8, -inf }
 0x579   :  { %762 = vmax.xlane.f32.xlu0 %v761_v9  ;;  %v758_v14 = vsel %vm147_vm2, %v750_v13, -inf }
 0x587   :  { %6951 = vrot.lane.b32.xlu1 %v7590_v43, %s7335_s27 }
 0x5ab   :  { %759 = vmax.xlane.f32.xlu1 %v758_v14 }
 0x5bc   :  { %6961 = vrot.lane.b32.xlu1 %v7590_v43, %s7336_s3 }
 0x5c0   :  { %6966 = vrot.lane.b32.xlu1 %v7602_v47, %s7336_s3 }
 0x602   :  { %v757_v15 = vpop.xlane.xlu0 %756 }
 0x603   :  { %v765_v16 = vsub.f32 %v749_v3, %v757_v15  ;;  %v754_v17 = vpop.xlane.xlu1 %753 }
 0x604   :  { %v764_v18 = vsub.f32 %v748_v6, %v754_v17 }
 0x605   :  { %v770_v23 = vmul.f32 1.442695, %v765_v16 }
 0x606   :  { %v768_v19 = vmul.f32 1.442695, %v764_v18  ;;  %v763_v21 = vpop.xlane.xlu0 %762 }
 0x607   :  { %7116 = vpow2.f32 %v770_v23  ;;  %v6952_v20 = vpop.permute.xlu1 %6951  ;;  %v767_v37 = vsub.f32 %v751_v8, %v763_v21 }
 0x608   :  { %7118 = vpow2.f32 %v768_v19  ;;  %v6954_v24 = vunpack.i.h.bf16 %v6952_v20  ;;  %v6953_v25 = vunpack.i.l.bf16 %v6952_v20 }
 0x609   :  { %v774_v38 = vmul.f32 1.442695, %v767_v37 }
 0x60a   :  { %v6690_v26 = vpack.c.bf16 %v6954_v24, %v6953_v25 }
 0x60b   :  { %7120 = vpow2.f32 %v774_v38 }
 0x60c   :  { %6691 = vmatprep.subr.bf16.mxu1 %v6690_v26 }
 0x60d   :  { %6693 = vmatpush3.bf16.msra.mxu1 %v6690_v26 }
 0x611   :  { %v7117_v27 = vpop.eup %7116 }
 0x612   :  { %v7119_v28 = vpop.eup %7118  ;;  %v779_v33 = vsel %vm147_vm2, %v7117_v27, 0.0 }
 0x613   :  { %780 = vadd.xlane.f32.xlu0 %v779_v33  ;;  %v776_v34 = vsel %vm147_vm2, %v7119_v28, 0.0 }
 0x614   :  { %777 = vadd.xlane.f32.xlu1 %v776_v34 }
 0x615   :  { %v7121_v53 = vpop.eup %7120 }
 0x616   :  { %v785_v55 = vsel %vm147_vm2, %v7121_v53, 0.0 }
 0x625   :  { %972 = vrot.lane.b32.xlu1 %v7582_v39, %s7337_s28 }
 0x629   :  { %6956 = vrot.lane.b32.xlu0 %v7602_v47, %s7335_s27 }
 0x638   :  { %v760_v40 = vpop.xlane.xlu1 %759 }
 0x639   :  { %v766_v42 = vsub.f32 %v750_v13, %v760_v40 }
 0x63b   :  { %v772_v45 = vmul.f32 1.442695, %v766_v42 }
 0x63c   :  { %v6962_v48 = vpop.permute.xlu1 %6961 }
 0x63d   :  { %7122 = vpow2.f32 %v772_v45  ;;  %v6964_v49 = vunpack.i.h.bf16 %v6962_v48  ;;  %v6963_v50 = vunpack.i.l.bf16 %v6962_v48 }
 0x63f   :  { %v6698_v52 = vpack.c.bf16 %v6964_v49, %v6963_v50 }
 0x640   :  { %v6967_v57 = vpop.permute.xlu1 %6966 }
 0x641   :  { %6700 = vmatprep.subr.msk.bf16.mxu0 %vm7608_vm5, %v6698_v52  ;;  %v6969_v6 = vunpack.i.h.bf16 %v6967_v57  ;;  %v6968_v30 = vunpack.i.l.bf16 %v6967_v57 }
 0x642   :  { %6703 = vmatpush3.bf16.xpose.msk.msra.mxu0 %vm7608_vm5, %v6698_v52 }
 0x643   :  { %v6704_v31 = vpack.c.bf16 %v6969_v6, %v6968_v30 }
 0x647   :  { %v7123_v54 = vpop.eup %7122 }
 0x648   :  { %786 = vadd.xlane.f32.xlu0 %v785_v55  ;;  %v782_v56 = vsel %vm147_vm2, %v7123_v54, 0.0 }
 0x649   :  { %783 = vadd.xlane.f32.xlu1 %v782_v56 }
 0x65a   :  { %1063 = vrot.lane.b32.xlu1 %v7592_v44, %s7337_s28 }
 0x65e   :  { %970 = vrot.lane.b32.xlu0 %v7584_v41, %s7337_s28 }
 0x662   :  { %1061 = vrot.lane.b32.xlu0 %v7594_v46, %s7337_s28 }
 0x6a0   :  { %v781_v58 = vpop.xlane.xlu0 %780 }
 0x6a1   :  { %7124 = vrcp.f32 %v781_v58  ;;  %v778_v60 = vpop.xlane.xlu1 %777 }
 0x6a2   :  { %7126 = vrcp.f32 %v778_v60 }
 0x6a4   :  { %v6957_v62 = vpop.permute.xlu0 %6956 }
 0x6a5   :  { %v6959_v63 = vunpack.i.h.bf16 %v6957_v62  ;;  %v6958_v0 = vunpack.i.l.bf16 %v6957_v62  ;;  %v973_v8 = vpop.permute.xlu1 %972 }
 0x6a7   :  { %v6694_v1 = vpack.c.bf16 %v6959_v63, %v6958_v0 }
 0x6a9   :  { %6695 = vmatprep.subr.bf16.mxu1 %v6694_v1 }
 0x6ab   :  { %v7125_v3 = vpop.eup %7124 }
 0x6ac   :  { %v7127_v4 = vpop.eup %7126  ;;  %v791_v22 = vmul.f32 %v7125_v3, %v7117_v27 }
 0x6ad   :  { %v789_v7 = vmul.f32 %v7127_v4, %v7119_v28 }
 0x6af   :  { %6295 = vmatprep.mubr.msk.f32.mxu1 %vm147_vm2, %v789_v7 }
 0x6b0   :  { %6296 = vmatmul.mubr.msk.f32.vlgmr.msra.gmra.mrb[4].mxu1 %vm147_vm2, %v791_v22 }
 0x6b1   :  { %6697 = vmatpush3.bf16.msra.mxu1 %v6694_v1 }
 0x6b2   :  { %6706 = vmatprep.subr.msk.bf16.mxu1 %vm7608_vm5, %v6704_v31 }
 0x6d5   :  { %v787_v9 = vpop.xlane.xlu0 %786 }
 0x6d6   :  { %7128 = vrcp.f32 %v787_v9  ;;  %v784_v10 = vpop.xlane.xlu1 %783 }
 0x6d7   :  { %7130 = vrcp.f32 %v784_v10 }
 0x6d9   :  { %v971_v12 = vpop.permute.xlu0 %970 }
 0x6da   :  { %6309 = vmatprep.mubr.msk.f32.mxu0 %vm571_vm4, %v971_v12  ;;  %v1064_v18 = vpop.permute.xlu1 %1063 }
 0x6db   :  { %6310 = vmatmul.mubr.msk.f32.vlgmr.msra.gmra.mrb[8].mxu0 %vm571_vm4, %v973_v8 }
 0x6dd   :  { %v1062_v17 = vpop.permute.xlu0 %1061 }
 0x6e0   :  { %v7129_v13 = vpop.eup %7128 }
 0x6e1   :  { %v7131_v14 = vpop.eup %7130  ;;  %v795_v16 = vmul.f32 %v7129_v13, %v7121_v53 }
 0x6e2   :  { %v793_v15 = vmul.f32 %v7131_v14, %v7123_v54 }
 0x6e4   :  { %6302 = vmatprep.mubr.msk.f32.mxu1 %vm147_vm2, %v793_v15 }
 0x6e5   :  { %6303 = vmatmul.mubr.msk.f32.vlgmr.msra.gmra.mrb[6].mxu1 %vm147_vm2, %v795_v16 }
 0x6e6   :  { %6709 = vmatpush3.bf16.xpose.msk.msra.mxu1 %vm7608_vm5, %v6704_v31  ;;  %6316 = vmatprep.mubr.msk.f32.mxu1 %vm571_vm4, %v1062_v17 }
 0x6ed   :  { %6317 = vmatmul.mubr.msk.f32.vlgmr.msra.gmra.mrb[8].mxu1 %vm571_vm4, %v1064_v18 }
 0x783   :  { %v7680_v23 = vpop.f32.mrb[4].mxu1 }
 0x784   :  { %v7682_v19 = vpop.f32.mrb[5].mxu1 }
 0x7ae   :  { %v6311_v20 = vpop.f32.mrb[8].mxu0 }
 0x7af   :  { %v1153_v24 = vmul.f32 0.35355338, %v6311_v20  ;;  %v1052_v25 = vpop.f32.mrb[9].mxu0 }
 0x7b0   :  { %v1152_v26 = vmul.f32 0.35355338, %v1052_v25 }
 0x7b1   :  { %v1157_v27 = vadd.f32 %v1153_v24, %v7626_v59 }
 0x7b2   :  { %v1156_v28 = vadd.f32 %v1152_v26, %v7629_v61 }
 0x7b3   :  { %v1163_v33 = vsel %vm147_vm2, %v1157_v27, -inf }
 0x7b4   :  { %1164 = vmax.xlane.f32.xlu1 %v1163_v33  ;;  %v1160_v34 = vsel %vm147_vm2, %v1156_v28, -inf }
 0x7b5   :  { %1161 = vmax.xlane.f32.xlu0 %v1160_v34 }
 0x7b8   :  { %v7688_v21 = vpop.f32.mrb[6].mxu1 }
 0x7b9   :  { %v7690_v37 = vpop.f32.mrb[7].mxu1 }
 0x7c0   :  { %v6318_v38 = vpop.f32.mrb[8].mxu1 }
 0x7c1   :  { %v1143_v40 = vpop.f32.mrb[9].mxu1  ;;  %v1155_v42 = vmul.f32 0.35355338, %v6318_v38 }
 0x7c2   :  { %v1154_v45 = vmul.f32 0.35355338, %v1143_v40 }
 0x7c3   :  { %v1159_v50 = vadd.f32 %v1155_v42, %v7631_v2 }
 0x7c4   :  { %v1158_v48 = vadd.f32 %v1154_v45, %v7642_v11 }
 0x7c5   :  { %v1169_v52 = vsel %vm147_vm2, %v1159_v50, -inf }
 0x7c6   :  { %v1166_v49 = vsel %vm147_vm2, %v1158_v48, -inf }
 0x7c7   :  { %1167 = vmax.xlane.f32.xlu0 %v1166_v49 }
 0x7cb   :  { %1170 = vmax.xlane.f32.xlu0 %v1169_v52 }
 0x841   :  { %v1165_v53 = vpop.xlane.xlu1 %1164 }
 0x842   :  { %v1173_v54 = vsub.f32 %v1157_v27, %v1165_v53  ;;  %v1162_v55 = vpop.xlane.xlu0 %1161  ;;  %v561_v27 = vld [vmem:[%s8397_s9] sm:$0xff] }
 0x843   :  { %v1172_v56 = vsub.f32 %v1156_v28, %v1162_v55 }
 0x844   :  { %v1178_v57 = vmul.f32 1.442695, %v1173_v54 }
 0x845   :  { %v1176_v58 = vmul.f32 1.442695, %v1172_v56 }
 0x846   :  { %7132 = vpow2.f32 %v1178_v57 }
 0x847   :  { %7134 = vpow2.f32 %v1176_v58 }
 0x850   :  { %v7133_v60 = vpop.eup %7132 }
 0x851   :  { %v7135_v62 = vpop.eup %7134  ;;  %v1187_v63 = vsel %vm147_vm2, %v7133_v60, 0.0 }
 0x852   :  { %1188 = vadd.xlane.f32.xlu0 %v1187_v63  ;;  %v1184_v0 = vsel %vm147_vm2, %v7135_v62, 0.0 }
 0x853   :  { %1185 = vadd.xlane.f32.xlu1 %v1184_v0 }
 0x854   :  { %v1168_v1 = vpop.xlane.xlu0 %1167 }
 0x855   :  { %v1174_v3 = vsub.f32 %v1158_v48, %v1168_v1  ;;  %v562_v48 = vld [vmem:[%s8397_s9 + $0x8] sm:$0xff] }
 0x857   :  { %v1180_v4 = vmul.f32 1.442695, %v1174_v3 }
 0x858   :  { %v1171_v6 = vpop.xlane.xlu0 %1170 }
 0x859   :  { %7136 = vpow2.f32 %v1180_v4  ;;  %v1175_v30 = vsub.f32 %v1159_v50, %v1171_v6 }
 0x85b   :  { %v1182_v7 = vmul.f32 1.442695, %v1175_v30 }
 0x85d   :  { %7138 = vpow2.f32 %v1182_v7 }
 0x863   :  { %v7137_v22 = vpop.eup %7136 }
 0x864   :  { %v1190_v31 = vsel %vm147_vm2, %v7137_v22, 0.0 }
 0x865   :  { %1191 = vadd.xlane.f32.xlu1 %v1190_v31 }
 0x867   :  { %v7139_v8 = vpop.eup %7138 }
 0x868   :  { %v1193_v9 = vsel %vm147_vm2, %v7139_v8, 0.0 }
 0x869   :  { %1194 = vadd.xlane.f32.xlu0 %v1193_v9 }
 0x876   :  { %6971 = vrot.lane.b32.xlu1 %v7590_v43, %s7338_s29 }
 0x87a   :  { %6981 = vrot.lane.b32.xlu1 %v7590_v43, %s7339_s0 }
 0x87e   :  { %6986 = vrot.lane.b32.xlu1 %v7602_v47, %s7339_s0 }
 0x87f   :  { %6976 = vrot.lane.b32.xlu0 %v7602_v47, %s7338_s29 }
 0x882   :  { %1574 = vrot.lane.b32.xlu1 %v7582_v39, %s7340_s4 }
 0x883   :  { %1572 = vrot.lane.b32.xlu0 %v7584_v41, %s7340_s4 }
 0x886   :  { %1665 = vrot.lane.b32.xlu1 %v7592_v44, %s7340_s4 }
 0x887   :  { %1663 = vrot.lane.b32.xlu0 %v7594_v46, %s7340_s4 }
 0x8df   :  { %v1189_v14 = vpop.xlane.xlu0 %1188 }
 0x8e0   :  { %v1186_v10 = vpop.xlane.xlu1 %1185 }
 0x8e1   :  { %7140 = vrcp.f32 %v1186_v10 }
 0x8e2   :  { %7142 = vrcp.f32 %v1189_v14 }
 0x8eb   :  { %v7141_v12 = vpop.eup %7140 }
 0x8ec   :  { %v1197_v13 = vmul.f32 %v7141_v12, %v7135_v62  ;;  %v7143_v25 = vpop.eup %7142 }
 0x8ed   :  { %v1199_v40 = vmul.f32 %v7143_v25, %v7133_v60 }
 0x8ee   :  { %6323 = vmatprep.mubr.msk.f32.mxu0 %vm147_vm2, %v1197_v13 }
 0x8f2   :  { %v1192_v15 = vpop.xlane.xlu1 %1191 }
 0x8f3   :  { %7144 = vrcp.f32 %v1192_v15 }
 0x8f6   :  { %v6972_v16 = vpop.permute.xlu1 %6971  ;;  %v1195_v17 = vpop.xlane.xlu0 %1194 }
 0x8f7   :  { %v6974_v18 = vunpack.i.h.bf16 %v6972_v16  ;;  %v6973_v20 = vunpack.i.l.bf16 %v6972_v16  ;;  %7146 = vrcp.f32 %v1195_v17 }
 0x8f9   :  { %v6710_v24 = vpack.c.bf16 %v6974_v18, %v6973_v20 }
 0x8fa   :  { %v6977_v26 = vpop.permute.xlu0 %6976  ;;  %v6982_v38 = vpop.permute.xlu1 %6981 }
 0x8fb   :  { %v6979_v28 = vunpack.i.h.bf16 %v6977_v26  ;;  %v6978_v33 = vunpack.i.l.bf16 %v6977_v26  ;;  %6711 = vmatprep.subr.bf16.mxu0 %v6710_v24  ;;  %v6984_v49 = vunpack.i.h.bf16 %v6982_v38  ;;  %v6983_v50 = vunpack.i.l.bf16 %v6982_v38 }
 0x8fc   :  { %6713 = vmatpush3.bf16.msra.mxu0 %v6710_v24 }
 0x8fd   :  { %v7145_v34 = vpop.eup %7144  ;;  %v6714_v42 = vpack.c.bf16 %v6979_v28, %v6978_v33  ;;  %6341 = vmatprep.subr.mxu0 %v561_v27  ;;  %v6718_v54 = vpack.c.bf16 %v6984_v49, %v6983_v50 }
 0x8fe   :  { %v1201_v45 = vmul.f32 %v7145_v34, %v7137_v22  ;;  %v1573_v60 = vpop.permute.xlu0 %1572 }
 0x8ff   :  { %6324 = vmatmul.mubr.msk.f32.vlgmr.msra.gmra.mrb[10].mxu0 %vm147_vm2, %v1199_v40  ;;  %6715 = vmatprep.subr.bf16.mxu1 %v6714_v42 }
 0x900   :  { %6717 = vmatpush3.bf16.msra.mxu1 %v6714_v42  ;;  %6330 = vmatprep.mubr.msk.f32.mxu1 %vm147_vm2, %v1201_v45 }
 0x901   :  { %v7147_v52 = vpop.eup %7146  ;;  %6343 = vmatprep.mubr.msk.f32.mxu0 %vm571_vm4, %v7682_v19  ;;  %6342 = vmatpush3.msra.mxu0 %v561_v27  ;;  %v6987_v19 = vpop.permute.xlu1 %6986 }
 0x902   :  { %6333 = vmatprep.subr.mxu1 %v562_v48  ;;  %v1203_v53 = vmul.f32 %v7147_v52, %v7139_v8  ;;  %v6989_v55 = vunpack.i.h.bf16 %v6987_v19  ;;  %v6988_v56 = vunpack.i.l.bf16 %v6987_v19  ;;  %v1664_v63 = vpop.permute.xlu0 %1663 }
 0x903   :  { %6344 = vmatmul.mubr.msk.f32.vlgmr.msra.gmra.mrb[12].mxu0 %vm571_vm4, %v7680_v23 }
 0x904   :  { %6331 = vmatmul.mubr.msk.f32.vlgmr.msra.gmra.mrb[10].mxu1 %vm147_vm2, %v1203_v53  ;;  %6346 = vmatprep.mubr.msk.f32.mxu0 %vm571_vm4, %v7690_v37  ;;  %v6724_v23 = vpack.c.bf16 %v6989_v55, %v6988_v56 }
 0x905   :  { %6334 = vmatpush3.msra.mxu1 %v562_v48 }
 0x906   :  { %6720 = vmatprep.subr.msk.bf16.mxu1 %vm7608_vm5, %v6718_v54 }
 0x907   :  { %6347 = vmatmul.mubr.msk.f32.gmra.mrb[14].mxu0 %vm571_vm4, %v7688_v21  ;;  %v1575_v21 = vpop.permute.xlu1 %1574 }
 0x90b   :  { %v1666_v0 = vpop.permute.xlu1 %1665 }
 0x9d2   :  { %v6325_v57 = vpop.f32.mrb[10].mxu0 }
 0x9d3   :  { %v1282_v58 = vpop.f32.mrb[11].mxu0 }
 0x9d4   :  { %6335 = vmatprep.mubr.msk.f32.mxu1 %vm571_vm4, %v1282_v58 }
 0x9d5   :  { %6336 = vmatmul.mubr.msk.f32.vlgmr.msra.gmra.mrb[12].mxu1 %vm571_vm4, %v6325_v57 }
 0x9d6   :  { %6723 = vmatpush3.bf16.xpose.msk.msra.mxu1 %vm7608_vm5, %v6718_v54 }
 0x9d7   :  { %6726 = vmatprep.subr.msk.bf16.mxu1 %vm7608_vm5, %v6724_v23  ;;  %v6332_v37 = vpop.f32.mrb[10].mxu1 }
 0x9d8   :  { %v1369_v62 = vpop.f32.mrb[11].mxu1 }
 0x9d9   :  { %6338 = vmatprep.mubr.msk.f32.mxu1 %vm571_vm4, %v1369_v62 }
 0x9da   :  { %6339 = vmatmul.mubr.msk.f32.gmra.mrb[14].mxu1 %vm571_vm4, %v6332_v37 }
 0x9db   :  { %6353 = vmatprep.mubr.msk.f32.mxu1 %vm571_vm4, %v1573_v60 }
 0x9de   :  { %6354 = vmatmul.mubr.msk.f32.vlgmr.msra.gmra.mrb[16].mxu1 %vm571_vm4, %v1575_v21 }
 0x9df   :  { %6729 = vmatpush3.bf16.xpose.msk.msra.mxu1 %vm7608_vm5, %v6724_v23  ;;  %6360 = vmatprep.mubr.msk.f32.mxu1 %vm571_vm4, %v1664_v63 }
 0x9e6   :  { %6361 = vmatmul.mubr.msk.f32.vlgmr.msra.gmra.mrb[18].mxu1 %vm571_vm4, %v1666_v0 }
 0xaa8   :  { %v7750_v1 = vpop.f32.mrb[12].mxu1 }
 0xaa9   :  { %v7752_v3 = vpop.f32.mrb[13].mxu1 }
 0xaad   :  { %v7754_v4 = vpop.f32.mrb[14].mxu1 }
 0xaae   :  { %v7756_v6 = vpop.f32.mrb[15].mxu1 }
 0xab1   :  { %v6355_v30 = vpop.f32.mrb[16].mxu1 }
 0xab2   :  { %v1755_v7 = vmul.f32 0.35355338, %v6355_v30  ;;  %v1654_v22 = vpop.f32.mrb[17].mxu1 }
 0xab3   :  { %v1754_v31 = vmul.f32 0.35355338, %v1654_v22 }
 0xab4   :  { %v1759_v8 = vadd.f32 %v1755_v7, %v7626_v59 }
 0xab5   :  { %v1758_v9 = vadd.f32 %v1754_v31, %v7629_v61 }
 0xab6   :  { %v1765_v10 = vsel %vm147_vm2, %v1759_v8, -inf }
 0xab7   :  { %1766 = vmax.xlane.f32.xlu1 %v1765_v10  ;;  %v1762_v12 = vsel %vm147_vm2, %v1758_v9, -inf }
 0xab8   :  { %1763 = vmax.xlane.f32.xlu0 %v1762_v12 }
 0xab9   :  { %v6362_v13 = vpop.f32.mrb[18].mxu1 }
 0xaba   :  { %v1745_v14 = vpop.f32.mrb[19].mxu1  ;;  %v1757_v15 = vmul.f32 0.35355338, %v6362_v13 }
 0xabb   :  { %v1756_v16 = vmul.f32 0.35355338, %v1745_v14 }
 0xabc   :  { %v1761_v20 = vadd.f32 %v1757_v15, %v7631_v2 }
 0xabd   :  { %v1760_v17 = vadd.f32 %v1756_v16, %v7642_v11 }
 0xabe   :  { %v1771_v24 = vsel %vm147_vm2, %v1761_v20, -inf }
 0xabf   :  { %v1768_v18 = vsel %vm147_vm2, %v1760_v17, -inf }
 0xac0   :  { %1769 = vmax.xlane.f32.xlu0 %v1768_v18 }
 0xac4   :  { %1772 = vmax.xlane.f32.xlu0 %v1771_v24 }
 0xb44   :  { %v1767_v25 = vpop.xlane.xlu1 %1766 }
 0xb45   :  { %v1775_v26 = vsub.f32 %v1759_v8, %v1767_v25  ;;  %v1764_v27 = vpop.xlane.xlu0 %1763 }
 0xb46   :  { %v1774_v28 = vsub.f32 %v1758_v9, %v1764_v27 }
 0xb47   :  { %v1780_v33 = vmul.f32 1.442695, %v1775_v26 }
 0xb48   :  { %v1778_v34 = vmul.f32 1.442695, %v1774_v28 }
 0xb49   :  { %7148 = vpow2.f32 %v1780_v33 }
 0xb4a   :  { %7150 = vpow2.f32 %v1778_v34 }
 0xb4d   :  { %v1770_v38 = vpop.xlane.xlu0 %1769 }
 0xb4e   :  { %v1776_v40 = vsub.f32 %v1760_v17, %v1770_v38 }
 0xb50   :  { %v1782_v42 = vmul.f32 1.442695, %v1776_v40 }
 0xb51   :  { %v1773_v45 = vpop.xlane.xlu0 %1772 }
 0xb52   :  { %7152 = vpow2.f32 %v1782_v42  ;;  %v1777_v48 = vsub.f32 %v1761_v20, %v1773_v45 }
 0xb53   :  { %v7149_v49 = vpop.eup %7148 }
 0xb54   :  { %v7151_v50 = vpop.eup %7150  ;;  %v1784_v52 = vmul.f32 1.442695, %v1777_v48  ;;  %v1789_v53 = vsel %vm147_vm2, %v7149_v49, 0.0 }
 0xb55   :  { %1790 = vadd.xlane.f32.xlu0 %v1789_v53  ;;  %v1786_v54 = vsel %vm147_vm2, %v7151_v50, 0.0 }
 0xb56   :  { %7154 = vpow2.f32 %v1784_v52  ;;  %1787 = vadd.xlane.f32.xlu1 %v1786_v54 }
 0xb5c   :  { %v7153_v19 = vpop.eup %7152 }
 0xb5d   :  { %v1792_v55 = vsel %vm147_vm2, %v7153_v19, 0.0 }
 0xb5e   :  { %1793 = vadd.xlane.f32.xlu1 %v1792_v55 }
 0xb60   :  { %v7155_v56 = vpop.eup %7154 }
 0xb61   :  { %v1795_v57 = vsel %vm147_vm2, %v7155_v56, 0.0 }
 0xb62   :  { %1796 = vadd.xlane.f32.xlu0 %v1795_v57 }
 0xb6f   :  { %6991 = vrot.lane.b32.xlu1 %v7590_v43, %s7341_s1 }
 0xb73   :  { %7001 = vrot.lane.b32.xlu1 %v7590_v43, %s8417_s24 }
 0xb77   :  { %2081 = vrot.lane.b32.xlu1 %v7584_v41, %s8415_s2 }
 0xb78   :  { %6996 = vrot.lane.b32.xlu0 %v7602_v47, %s7341_s1 }
 0xb7b   :  { %2083 = vrot.lane.b32.xlu1 %v7582_v39, %s8415_s2 }
 0xb7c   :  { %7006 = vrot.lane.b32.xlu0 %v7602_v47, %s8417_s24 }
 0xb7f   :  { %2174 = vrot.lane.b32.xlu1 %v7592_v44, %s8415_s2 }
 0xb80   :  { %2172 = vrot.lane.b32.xlu0 %v7594_v46, %s8415_s2  ;;  %v563_v46 = vld [vmem:[%s8397_s9 + $0x10] sm:$0xff] }
 0xbe2   :  { %v1791_v23 = vpop.xlane.xlu0 %1790 }
 0xbe3   :  { %v1788_v58 = vpop.xlane.xlu1 %1787 }
 0xbe4   :  { %7156 = vrcp.f32 %v1788_v58 }
 0xbe5   :  { %7158 = vrcp.f32 %v1791_v23 }
 0xbeb   :  { %v1794_v41 = vpop.xlane.xlu1 %1793 }
 0xbec   :  { %7160 = vrcp.f32 %v1794_v41 }
 0xbee   :  { %v7157_v37 = vpop.eup %7156 }
 0xbef   :  { %v6992_v60 = vpop.permute.xlu1 %6991  ;;  %v1797_v62 = vpop.xlane.xlu0 %1796  ;;  %v1799_v21 = vmul.f32 %v7157_v37, %v7151_v50 }
 0xbf0   :  { %v6994_v39 = vunpack.i.h.bf16 %v6992_v60  ;;  %v6993_v63 = vunpack.i.l.bf16 %v6992_v60  ;;  %7162 = vrcp.f32 %v1797_v62  ;;  %v7159_v44 = vpop.eup %7158 }
 0xbf1   :  { %6367 = vmatprep.mubr.msk.f32.mxu0 %vm147_vm2, %v1799_v21  ;;  %v1801_v12 = vmul.f32 %v7159_v44, %v7149_v49 }
 0xbf2   :  { %v6730_v0 = vpack.c.bf16 %v6994_v39, %v6993_v63 }
 0xbf3   :  { %v7002_v30 = vpop.permute.xlu1 %7001  ;;  %v6997_v7 = vpop.permute.xlu0 %6996 }
 0xbf4   :  { %v7004_v22 = vunpack.i.h.bf16 %v7002_v30  ;;  %v7003_v31 = vunpack.i.l.bf16 %v7002_v30  ;;  %v6999_v8 = vunpack.i.h.bf16 %v6997_v7  ;;  %v6998_v9 = vunpack.i.l.bf16 %v6997_v7  ;;  %6731 = vmatprep.subr.bf16.mxu0 %v6730_v0 }
 0xbf5   :  { %6733 = vmatpush3.bf16.msra.mxu0 %v6730_v0 }
 0xbf6   :  { %v7161_v10 = vpop.eup %7160  ;;  %v6734_v13 = vpack.c.bf16 %v6999_v8, %v6998_v9  ;;  %6377 = vmatprep.subr.mxu0 %v563_v46  ;;  %v6738_v16 = vpack.c.bf16 %v7004_v22, %v7003_v31 }
 0xbf7   :  { %v7007_v14 = vpop.permute.xlu0 %7006  ;;  %v1803_v15 = vmul.f32 %v7161_v10, %v7153_v19  ;;  %v2082_v26 = vpop.permute.xlu1 %2081 }
 0xbf8   :  { %v7009_v17 = vunpack.i.h.bf16 %v7007_v14  ;;  %v7008_v18 = vunpack.i.l.bf16 %v7007_v14  ;;  %6368 = vmatmul.mubr.msk.f32.vlgmr.msra.gmra.mrb[16].mxu0 %vm147_vm2, %v1801_v12  ;;  %6735 = vmatprep.subr.bf16.mxu1 %v6734_v13 }
 0xbf9   :  { %6737 = vmatpush3.bf16.msra.mxu1 %v6734_v13  ;;  %6374 = vmatprep.mubr.msk.f32.mxu1 %vm147_vm2, %v1803_v15 }
 0xbfa   :  { %v7163_v20 = vpop.eup %7162  ;;  %v6744_v24 = vpack.c.bf16 %v7009_v17, %v7008_v18  ;;  %6740 = vmatprep.subr.msk.bf16.mxu1 %vm7608_vm5, %v6738_v16  ;;  %6378 = vmatpush3.msra.mxu0 %v563_v46 }
 0xbfb   :  { %v1805_v25 = vmul.f32 %v7163_v20, %v7155_v56  ;;  %v2084_v27 = vpop.permute.xlu1 %2083  ;;  %v2173_v40 = vpop.permute.xlu0 %2172 }
 0xbfc   :  { %6746 = vmatprep.subr.msk.bf16.mxu0 %vm7608_vm5, %v6744_v24 }
 0xbfd   :  { %6375 = vmatmul.mubr.msk.f32.vlgmr.msra.gmra.mrb[20].mxu1 %vm147_vm2, %v1805_v25 }
 0xbfe   :  { %6389 = vmatprep.mubr.msk.f32.mxu1 %vm571_vm4, %v2082_v26 }
 0xbff   :  { %v2175_v42 = vpop.permute.xlu1 %2174 }
 0xc02   :  { %6743 = vmatpush3.bf16.xpose.msk.msra.mxu1 %vm7608_vm5, %v6738_v16 }
 0xc09   :  { %6390 = vmatmul.mubr.msk.f32.vlgmr.msra.gmra.mrb[22].mxu1 %vm571_vm4, %v2084_v27 }
 0xccb   :  { %v6369_v28 = vpop.f32.mrb[16].mxu0 }
 0xccc   :  { %v1884_v33 = vpop.f32.mrb[17].mxu0 }
 0xccd   :  { %6379 = vmatprep.mubr.msk.f32.mxu0 %vm571_vm4, %v1884_v33 }
 0xcce   :  { %6380 = vmatmul.mubr.msk.f32.vlgmr.msra.gmra.mrb[12].mxu0 %vm571_vm4, %v6369_v28 }
 0xccf   :  { %6749 = vmatpush3.bf16.xpose.msk.msra.mxu0 %vm7608_vm5, %v6744_v24 }
 0xcd0   :  { %v6376_v34 = vpop.f32.mrb[20].mxu1 }
 0xcd1   :  { %v1971_v38 = vpop.f32.mrb[21].mxu1 }
 0xcd2   :  { %6382 = vmatprep.mubr.msk.f32.mxu0 %vm571_vm4, %v1971_v38 }
 0xcd3   :  { %6383 = vmatmul.mubr.msk.f32.gmra.mrb[14].mxu0 %vm571_vm4, %v6376_v34 }
 0xcd4   :  { %6396 = vmatprep.mubr.msk.f32.mxu0 %vm571_vm4, %v2173_v40 }
 0xcd7   :  { %6397 = vmatmul.mubr.msk.f32.vlgmr.msra.gmra.mrb[18].mxu0 %vm571_vm4, %v2175_v42 }
 0xcdc   :  { %v6391_v45 = vpop.f32.mrb[22].mxu1 }
 0xcdd   :  { %v2264_v48 = vmul.f32 0.35355338, %v6391_v45  ;;  %v2163_v49 = vpop.f32.mrb[23].mxu1 }
 0xcde   :  { %v2263_v50 = vmul.f32 0.35355338, %v2163_v49 }
 0xcdf   :  { %v2268_v52 = vadd.f32 %v2264_v48, %v7626_v59 }
 0xce0   :  { %v2267_v53 = vadd.f32 %v2263_v50, %v7629_v61 }
 0xce1   :  { %v2274_v54 = vsel %vm147_vm2, %v2268_v52, -inf }
 0xce2   :  { %2275 = vmax.xlane.f32.xlu1 %v2274_v54  ;;  %v2271_v19 = vsel %vm147_vm2, %v2267_v53, -inf  ;;  %v564_v54 = vld [vmem:[%s8397_s9 + $0x18] sm:$0xff] }
 0xce3   :  { %2272 = vmax.xlane.f32.xlu0 %v2271_v19 }
 0xd6f   :  { %v2276_v41 = vpop.xlane.xlu1 %2275 }
 0xd70   :  { %v2273_v55 = vpop.xlane.xlu0 %2272  ;;  %v2284_v37 = vsub.f32 %v2268_v52, %v2276_v41 }
 0xd71   :  { %v2283_v56 = vsub.f32 %v2267_v53, %v2273_v55 }
 0xd72   :  { %v2289_v60 = vmul.f32 1.442695, %v2284_v37 }
 0xd73   :  { %v2287_v57 = vmul.f32 1.442695, %v2283_v56 }
 0xd75   :  { %7164 = vpow2.f32 %v2287_v57 }
 0xd76   :  { %7166 = vpow2.f32 %v2289_v60 }
 0xd7f   :  { %v7165_v58 = vpop.eup %7164 }
 0xd80   :  { %v2295_v23 = vsel %vm147_vm2, %v7165_v58, 0.0  ;;  %v7167_v46 = vpop.eup %7166 }
 0xd81   :  { %2296 = vadd.xlane.f32.xlu1 %v2295_v23  ;;  %v2298_v22 = vsel %vm147_vm2, %v7167_v46, 0.0  ;;  %v5883_v23 = vld [vmem:[%s8398_s10] ss:$0 sm:$0xff] }
 0xdaa   :  { %v6398_v62 = vpop.f32.mrb[18].mxu0 }
 0xdab   :  { %v2254_v21 = vpop.f32.mrb[19].mxu0  ;;  %v2266_v39 = vmul.f32 0.35355338, %v6398_v62 }
 0xdac   :  { %v2265_v63 = vmul.f32 0.35355338, %v2254_v21 }
 0xdad   :  { %v2270_v30 = vadd.f32 %v2266_v39, %v7631_v2 }
 0xdae   :  { %v2269_v0 = vadd.f32 %v2265_v63, %v7642_v11 }
 0xdaf   :  { %v2280_v7 = vsel %vm147_vm2, %v2270_v30, -inf }
 0xdb0   :  { %v2277_v44 = vsel %vm147_vm2, %v2269_v0, -inf }
 0xdb1   :  { %2278 = vmax.xlane.f32.xlu0 %v2277_v44 }
 0xdb5   :  { %2281 = vmax.xlane.f32.xlu0 %v2280_v7 }
 0xdb9   :  { %2299 = vadd.xlane.f32.xlu0 %v2298_v22 }
 0xe0e   :  { %v2297_v31 = vpop.xlane.xlu1 %2296 }
 0xe0f   :  { %7168 = vrcp.f32 %v2297_v31 }
 0xe19   :  { %v7169_v8 = vpop.eup %7168 }
 0xe1a   :  { %v2308_v9 = vmul.f32 %v7169_v8, %v7165_v58 }
 0xe1c   :  { %6403 = vmatprep.mubr.msk.f32.mxu1 %vm147_vm2, %v2308_v9 }
 0xe3e   :  { %v2279_v10 = vpop.xlane.xlu0 %2278 }
 0xe3f   :  { %v2285_v12 = vsub.f32 %v2269_v0, %v2279_v10 }
 0xe41   :  { %v2291_v13 = vmul.f32 1.442695, %v2285_v12 }
 0xe42   :  { %v2282_v14 = vpop.xlane.xlu0 %2281 }
 0xe43   :  { %7170 = vpow2.f32 %v2291_v13  ;;  %v2286_v15 = vsub.f32 %v2270_v30, %v2282_v14 }
 0xe45   :  { %v2293_v16 = vmul.f32 1.442695, %v2286_v15 }
 0xe46   :  { %v2300_v25 = vpop.xlane.xlu0 %2299 }
 0xe47   :  { %7172 = vpow2.f32 %v2293_v16 }
 0xe48   :  { %7174 = vrcp.f32 %v2300_v25 }
 0xe4d   :  { %v7171_v17 = vpop.eup %7170 }
 0xe4e   :  { %v2301_v18 = vsel %vm147_vm2, %v7171_v17, 0.0 }
 0xe4f   :  { %2302 = vadd.xlane.f32.xlu1 %v2301_v18 }
 0xe51   :  { %v7173_v20 = vpop.eup %7172 }
 0xe52   :  { %v2304_v24 = vsel %vm147_vm2, %v7173_v20, 0.0  ;;  %v7175_v40 = vpop.eup %7174 }
 0xe53   :  { %2305 = vadd.xlane.f32.xlu0 %v2304_v24  ;;  %v2310_v49 = vmul.f32 %v7175_v40, %v7167_v46 }
 0xe60   :  { %7011 = vrot.lane.b32.xlu1 %v7590_v43, %s8413_s30 }
 0xe69   :  { %7016 = vrot.lane.b32.xlu0 %v7602_v47, %s8413_s30 }
 0xedc   :  { %v2303_v26 = vpop.xlane.xlu1 %2302 }
 0xedd   :  { %7176 = vrcp.f32 %v2303_v26 }
 0xee0   :  { %v7012_v27 = vpop.permute.xlu1 %7011  ;;  %v2306_v28 = vpop.xlane.xlu0 %2305 }
 0xee1   :  { %v7014_v33 = vunpack.i.h.bf16 %v7012_v27  ;;  %v7013_v34 = vunpack.i.l.bf16 %v7012_v27  ;;  %7178 = vrcp.f32 %v2306_v28 }
 0xee3   :  { %v6750_v38 = vpack.c.bf16 %v7014_v33, %v7013_v34  ;;  %v2679_v34 = vld [vmem:[%s8401_s13] sm:$0xff] }
 0xee4   :  { %v7017_v42 = vpop.permute.xlu0 %7016 }
 0xee5   :  { %v7019_v45 = vunpack.i.h.bf16 %v7017_v42  ;;  %v7018_v48 = vunpack.i.l.bf16 %v7017_v42  ;;  %6751 = vmatprep.subr.bf16.mxu1 %v6750_v38  ;;  %v2681_v42 = vld [vmem:[%s8401_s13 + $0x10] sm:$0xff] }
 0xee6   :  { %6753 = vmatpush3.bf16.msra.mxu1 %v6750_v38  ;;  %v2680_v38 = vld [vmem:[%s8401_s13 + $0x8] sm:$0xff] }
 0xee7   :  { %v7177_v43 = vpop.eup %7176  ;;  %v6754_v50 = vpack.c.bf16 %v7019_v45, %v7018_v48  ;;  %v6758_v40 = vpack.c.bf16 %v2680_v38, %v2679_v34  ;;  %v2682_v45 = vld [vmem:[%s8401_s13 + $0x18] sm:$0xff] }
 0xee8   :  { %v2312_v47 = vmul.f32 %v7177_v43, %v7171_v17  ;;  %v6762_v48 = vpack.c.bf16 %v2682_v45, %v2681_v42 }
 0xee9   :  { %6404 = vmatmul.mubr.msk.f32.vlgmr.msra.gmra.mrb[24].mxu1 %vm147_vm2, %v2310_v49  ;;  %6755 = vmatprep.subr.bf16.mxu0 %v6754_v50 }
 0xeea   :  { %6757 = vmatpush3.bf16.msra.mxu0 %v6754_v50  ;;  %6410 = vmatprep.mubr.msk.f32.mxu0 %vm147_vm2, %v2312_v47 }
 0xeeb   :  { %v7179_v52 = vpop.eup %7178  ;;  %6413 = vmatprep.subr.mxu0 %v564_v54  ;;  %6759 = vmatprep.subr.bf16.mxu1 %v6758_v40 }
 0xeec   :  { %v2314_v53 = vmul.f32 %v7179_v52, %v7173_v20  ;;  %6761 = vmatpush3.bf16.msra.mxu1 %v6758_v40 }
 0xeed   :  { %6763 = vmatprep.subr.bf16.mxu1 %v6762_v48 }
 0xeee   :  { %6411 = vmatmul.mubr.msk.f32.vlgmr.msra.gmra.mrb[20].mxu0 %vm147_vm2, %v2314_v53 }
 0xeef   :  { %6414 = vmatpush3.msra.mxu0 %v564_v54 }
 0xef0   :  { %6765 = vmatpush3.bf16.msra.mxu1 %v6762_v48 }
 0xfbc   :  { %v6405_v19 = vpop.f32.mrb[24].mxu1 }
 0xfbd   :  { %v2393_v55 = vpop.f32.mrb[25].mxu1 }
 0xfbe   :  { %6415 = vmatprep.mubr.msk.f32.mxu0 %vm571_vm4, %v2393_v55 }
 0xfbf   :  { %6416 = vmatmul.mubr.msk.f32.vlgmr.msra.gmra.mrb[12].mxu0 %vm571_vm4, %v6405_v19 }
 0xfc1   :  { %v6412_v56 = vpop.f32.mrb[20].mxu0 }
 0xfc2   :  { %v2480_v57 = vpop.f32.mrb[21].mxu0 }
 0xfc3   :  { %6418 = vmatprep.mubr.msk.f32.mxu0 %vm571_vm4, %v2480_v57 }
 0xfc4   :  { %6419 = vmatmul.mubr.msk.f32.gmra.mrb[14].mxu0 %vm571_vm4, %v6412_v56 }
0x1092   :  { %v6417_v58 = vpop.f32.mrb[12].mxu0 }
0x1093   :  { %v6900_v41 = vadd.f32 %v6417_v58, %v7750_v1  ;;  %v2567_v37 = vpop.f32.mrb[13].mxu0 }
0x1094   :  { %v6901_v60 = vadd.f32 %v2567_v37, %v7752_v3 }
0x1095   :  { %v2598_v62 = vadd.f32 %v6900_v41, %v5883_v23  ;;  %v5884_v41 = vld [vmem:[%s8399_s11] ss:$0 sm:$0xff] }
0x1096   :  { %v2597_v21 = vadd.f32 %v6901_v60, %v5883_v23 }
0x1097   :  { %v6420_v39 = vpop.f32.mrb[14].mxu0  ;;  %v2602_v63 = vadd.f32 %v2598_v62, %v7565_v29 }
0x1098   :  { %v6902_v0 = vadd.f32 %v6420_v39, %v7754_v4  ;;  %v2577_v44 = vpop.f32.mrb[15].mxu0  ;;  %v2601_v30 = vadd.f32 %v2597_v21, %v7563_v32  ;;  %v5885_v21 = vld [vmem:[%s8400_s12] ss:$0 sm:$0xff] }
0x1099   :  { %v6903_v7 = vadd.f32 %v2577_v44, %v7756_v6  ;;  %v2610_v46 = vsel %vm371_vm3, %v2602_v63, 0.0 }
0x109a   :  { %v2600_v22 = vadd.f32 %v6902_v0, %v5883_v23  ;;  %2611 = vadd.xlane.f32.xlu0 %v2610_v46  ;;  %v2607_v1 = vsel %vm371_vm3, %v2601_v30, 0.0 }
0x109b   :  { %v2599_v31 = vadd.f32 %v6903_v7, %v5883_v23  ;;  %2608 = vadd.xlane.f32.xlu1 %v2607_v1 }
0x109c   :  { %v2604_v3 = vadd.f32 %v2600_v22, %v7573_v36 }
0x109d   :  { %v2603_v8 = vadd.f32 %v2599_v31, %v7571_v35 }
0x109e   :  { %v2616_v29 = vsel %vm371_vm3, %v2604_v3, 0.0 }
0x109f   :  { %2617 = vadd.xlane.f32.xlu0 %v2616_v29  ;;  %v2613_v4 = vsel %vm371_vm3, %v2603_v8, 0.0  ;;  %v2895_v29 = vld [vmem:[%s8403_s15] sm:$0xff] }
0x10a0   :  { %2614 = vadd.xlane.f32.xlu1 %v2613_v4  ;;  %v2896_v4 = vld [vmem:[%s8403_s15 + $0x8] sm:$0xff] }
0x1127   :  { %v2612_v32 = vpop.xlane.xlu0 %2611 }
0x1128   :  { %v2620_v6 = vmul.f32 0.03125, %v2612_v32  ;;  %v2609_v9 = vpop.xlane.xlu1 %2608  ;;  %v6766_v32 = vpack.c.bf16 %v2896_v4, %v2895_v29 }
0x1129   :  { %v2619_v10 = vmul.f32 0.03125, %v2609_v9  ;;  %v2898_v9 = vld [vmem:[%s8403_s15 + $0x18] sm:$0xff] }
0x112a   :  { %v2624_v12 = vsub.f32 %v2602_v63, %v2620_v6  ;;  %6767 = vmatprep.subr.bf16.mxu0 %v6766_v32  ;;  %v2897_v6 = vld [vmem:[%s8403_s15 + $0x10] sm:$0xff] }
0x112b   :  { %v2623_v13 = vsub.f32 %v2601_v30, %v2619_v10  ;;  %6769 = vmatpush3.bf16.msra.mxu0 %v6766_v32  ;;  %v6770_v10 = vpack.c.bf16 %v2898_v9, %v2897_v6 }
0x112c   :  { %v2618_v14 = vpop.xlane.xlu0 %2617  ;;  %v2628_v15 = vmul.f32 %v2624_v12, %v2624_v12 }
0x112d   :  { %v2622_v16 = vmul.f32 0.03125, %v2618_v14  ;;  %v2615_v17 = vpop.xlane.xlu1 %2614  ;;  %v2627_v18 = vmul.f32 %v2623_v13, %v2623_v13  ;;  %6771 = vmatprep.subr.bf16.mxu0 %v6770_v10 }
0x112e   :  { %v2621_v36 = vmul.f32 0.03125, %v2615_v17  ;;  %v2634_v35 = vsel %vm371_vm3, %v2628_v15, 0.0  ;;  %v2901_v15 = vld [vmem:[%s8403_s15 + $0x30] sm:$0xff] }
0x112f   :  { %v2626_v20 = vsub.f32 %v2604_v3, %v2622_v16  ;;  %2635 = vadd.xlane.f32.xlu0 %v2634_v35  ;;  %v2631_v24 = vsel %vm371_vm3, %v2627_v18, 0.0  ;;  %6773 = vmatpush3.bf16.msra.mxu0 %v6770_v10  ;;  %v2902_v16 = vld [vmem:[%s8403_s15 + $0x38] sm:$0xff]  ;;  %v5886_v18 = vld [vmem:[%s8402_s14] ss:$0 sm:$0xff] }
0x1130   :  { %v2625_v25 = vsub.f32 %v2603_v8, %v2621_v36  ;;  %2632 = vadd.xlane.f32.xlu1 %v2631_v24  ;;  %v6778_v17 = vpack.c.bf16 %v2902_v16, %v2901_v15 }
0x1131   :  { %v2630_v26 = vmul.f32 %v2626_v20, %v2626_v20 }
0x1132   :  { %v2629_v27 = vmul.f32 %v2625_v25, %v2625_v25 }
0x1133   :  { %v2640_v28 = vsel %vm371_vm3, %v2630_v26, 0.0 }
0x1134   :  { %2641 = vadd.xlane.f32.xlu0 %v2640_v28  ;;  %v2637_v33 = vsel %vm371_vm3, %v2629_v27, 0.0 }
0x1135   :  { %2638 = vadd.xlane.f32.xlu1 %v2637_v33 }
0x11bc   :  { %v2636_v43 = vpop.xlane.xlu0 %2635 }
0x11bd   :  { %v2644_v49 = vmul.f32 0.03125, %v2636_v43  ;;  %v2633_v50 = vpop.xlane.xlu1 %2632 }
0x11be   :  { %v2643_v47 = vmul.f32 0.03125, %v2633_v50 }
0x11bf   :  { %v2648_v52 = vadd.f32 1e-05, %v2644_v49 }
0x11c0   :  { %v2647_v53 = vadd.f32 1e-05, %v2643_v47 }
0x11c1   :  { %7180 = vrsqrt.f32 %v2648_v52  ;;  %v2642_v54 = vpop.xlane.xlu0 %2641 }
0x11c2   :  { %7182 = vrsqrt.f32 %v2647_v53  ;;  %v2646_v19 = vmul.f32 0.03125, %v2642_v54  ;;  %v2639_v55 = vpop.xlane.xlu1 %2638 }
0x11c3   :  { %v2645_v56 = vmul.f32 0.03125, %v2639_v55 }
0x11c4   :  { %v2650_v57 = vadd.f32 1e-05, %v2646_v19 }
0x11c5   :  { %v2649_v58 = vadd.f32 1e-05, %v2645_v56 }
0x11c6   :  { %7184 = vrsqrt.f32 %v2650_v57 }
0x11c7   :  { %7186 = vrsqrt.f32 %v2649_v58 }
0x11cb   :  { %v7181_v23 = vpop.eup %7180 }
0x11cc   :  { %v7183_v37 = vpop.eup %7182  ;;  %v2656_v60 = vmul.f32 %v7181_v23, %v2624_v12  ;;  %v2899_v12 = vld [vmem:[%s8403_s15 + $0x20] sm:$0xff] }
0x11cd   :  { %v2655_v62 = vmul.f32 %v7183_v37, %v2623_v13  ;;  %v2900_v13 = vld [vmem:[%s8403_s15 + $0x28] sm:$0xff] }
0x11ce   :  { %v2666_v39 = vmul.f32 %v5884_v41, %v2656_v60  ;;  %v6774_v14 = vpack.c.bf16 %v2900_v13, %v2899_v12 }
0x11cf   :  { %v2665_v63 = vmul.f32 %v5884_v41, %v2655_v62 }
0x11d0   :  { %v7185_v0 = vpop.eup %7184  ;;  %v7875_v46 = vadd.f32 %v5885_v21, %v2666_v39  ;;  %6775 = vmatprep.subr.bf16.mxu0 %v6774_v14 }
0x11d1   :  { %v7187_v44 = vpop.eup %7186  ;;  %v7873_v30 = vadd.f32 %v5885_v21, %v2665_v63  ;;  %v2658_v7 = vmul.f32 %v7185_v0, %v2626_v20  ;;  %6777 = vmatpush3.bf16.msra.mxu0 %v6774_v14 }
0x11d2   :  { %v2657_v22 = vmul.f32 %v7187_v44, %v2625_v25  ;;  %6779 = vmatprep.subr.bf16.mxu0 %v6778_v17 }
0x11d3   :  { %6429 = vmatprep.mubr.msk.f32.mxu1 %vm371_vm3, %v7873_v30  ;;  %v2668_v1 = vmul.f32 %v5884_v41, %v2658_v7 }
0x11d4   :  { %6430 = vmatmul.mubr.msk.f32.vlgmr.msra.gmra.mrb[26].mxu1 %vm371_vm3, %v7875_v46  ;;  %v2667_v31 = vmul.f32 %v5884_v41, %v2657_v22 }
0x11d5   :  { %v7883_v8 = vadd.f32 %v5885_v21, %v2668_v1  ;;  %6781 = vmatpush3.bf16.msra.mxu0 %v6778_v17 }
0x11d6   :  { %v7881_v3 = vadd.f32 %v5885_v21, %v2667_v31 }
0x11d8   :  { %6432 = vmatprep.mubr.msk.f32.mxu1 %vm371_vm3, %v7881_v3 }
0x11d9   :  { %6433 = vmatmul.mubr.msk.f32.gmra.mrb[28].mxu1 %vm371_vm3, %v7883_v8 }
0x12a7   :  { %v6431_v36 = vpop.f32.mrb[26].mxu1 }
0x12a8   :  { %v7916_v35 = vadd.f32 %v6431_v36, %v5886_v18  ;;  %v2768_v20 = vpop.f32.mrb[27].mxu1 }
0x12a9   :  { %v7918_v24 = vadd.f32 %v5886_v18, %v2768_v20 }
0x12aa   :  { %v7921_v25 = vmul.f32 0.70710677, %v7916_v35 }
0x12ab   :  { %v7924_v26 = vmul.f32 0.70710677, %v7918_v24 }
0x12ac   :  { %v2796_v27 = vand.u32 2147483647, %v7921_v25  ;;  %v6434_v28 = vpop.f32.mrb[28].mxu1  ;;  %vm2876_vm6 = vcmp.ge.f32.partialorder %v7921_v25, 0.0 }
0x12ad   :  { %v2795_v33 = vand.u32 2147483647, %v7924_v26  ;;  %v7928_v34 = vadd.f32 %v6434_v28, %v5886_v18  ;;  %v2778_v38 = vpop.f32.mrb[29].mxu1  ;;  %vm2875_vm7 = vcmp.ge.f32.partialorder %v7924_v26, 0.0 }
0x12ae   :  { %v2800_v40 = vmul.f32 0.3275911, %v2796_v27  ;;  %v7930_v42 = vadd.f32 %v5886_v18, %v2778_v38  ;;  %v2852_v56 = vsub.f32 0.0, %v2796_v27 }
0x12af   :  { %v2799_v45 = vmul.f32 0.3275911, %v2795_v33  ;;  %v7933_v48 = vmul.f32 0.70710677, %v7928_v34  ;;  %v2851_v57 = vsub.f32 0.0, %v2795_v33 }
0x12b0   :  { %v2804_v43 = vadd.f32 1.0, %v2800_v40  ;;  %v7936_v49 = vmul.f32 0.70710677, %v7930_v42  ;;  %v2856_v23 = vmul.f32 %v2852_v56, %v2796_v27 }
0x12b1   :  { %v2803_v50 = vadd.f32 1.0, %v2799_v45  ;;  %v2798_v47 = vand.u32 2147483647, %v7933_v48  ;;  %v2855_v60 = vmul.f32 %v2851_v57, %v2795_v33  ;;  %vm2878_vm9 = vcmp.ge.f32.partialorder %v7933_v48, 0.0  ;;  %v5891_v48 = vld [vmem:[%s8404_s16] ss:$0 sm:$0xff] }
0x12b2   :  { %7188 = vrcp.f32 %v2804_v43  ;;  %v2797_v52 = vand.u32 2147483647, %v7936_v49  ;;  %v2861_v0 = vmul.f32 1.442695, %v2856_v23  ;;  %vm2877_vm10 = vcmp.ge.f32.partialorder %v7936_v49, 0.0 }
0x12b3   :  { %7190 = vrcp.f32 %v2803_v50  ;;  %v2802_v53 = vmul.f32 0.3275911, %v2798_v47  ;;  %v2854_v62 = vsub.f32 0.0, %v2798_v47  ;;  %v2859_v1 = vmul.f32 1.442695, %v2855_v60 }
0x12b4   :  { %v2801_v54 = vmul.f32 0.3275911, %v2797_v52  ;;  %v2853_v39 = vsub.f32 0.0, %v2797_v52 }
0x12b5   :  { %v2806_v19 = vadd.f32 1.0, %v2802_v53  ;;  %v2858_v31 = vmul.f32 %v2854_v62, %v2798_v47 }
0x12b6   :  { %v2805_v55 = vadd.f32 1.0, %v2801_v54  ;;  %v2857_v6 = vmul.f32 %v2853_v39, %v2797_v52 }
0x12b7   :  { %7192 = vrcp.f32 %v2806_v19  ;;  %v2865_v15 = vmul.f32 1.442695, %v2858_v31 }
0x12b8   :  { %7194 = vrcp.f32 %v2805_v55  ;;  %v2863_v36 = vmul.f32 1.442695, %v2857_v6 }
0x12b9   :  { %7196 = vpow2.f32 %v2861_v0 }
0x12ba   :  { %7198 = vpow2.f32 %v2859_v1 }
0x12bb   :  { %7200 = vpow2.f32 %v2865_v15 }
0x12bc   :  { %v7189_v58 = vpop.eup %7188  ;;  %7202 = vpow2.f32 %v2863_v36 }
0x12bd   :  { %v7191_v41 = vpop.eup %7190  ;;  %v2816_v37 = vmul.f32 1.0614054, %v7189_v58 }
0x12be   :  { %v2815_v21 = vmul.f32 1.0614054, %v7191_v41 }
0x12bf   :  { %v2820_v63 = vadd.f32 -1.4531521, %v2816_v37 }
0x12c0   :  { %v2819_v44 = vadd.f32 -1.4531521, %v2815_v21 }
0x12c1   :  { %v7193_v7 = vpop.eup %7192  ;;  %v2824_v22 = vmul.f32 %v7189_v58, %v2820_v63 }
0x12c2   :  { %v7195_v29 = vpop.eup %7194  ;;  %v2823_v4 = vmul.f32 %v7191_v41, %v2819_v44  ;;  %v2818_v32 = vmul.f32 1.0614054, %v7193_v7 }
0x12c3   :  { %v2828_v9 = vadd.f32 1.4214138, %v2824_v22  ;;  %v2817_v10 = vmul.f32 1.0614054, %v7195_v29  ;;  %v7197_v55 = vpop.eup %7196 }
0x12c4   :  { %v2827_v12 = vadd.f32 1.4214138, %v2823_v4  ;;  %v2822_v13 = vadd.f32 -1.4531521, %v2818_v32  ;;  %v7199_v23 = vpop.eup %7198 }
0x12c5   :  { %v2832_v14 = vmul.f32 %v7189_v58, %v2828_v9  ;;  %v2821_v16 = vadd.f32 -1.4531521, %v2817_v10  ;;  %v7201_v22 = vpop.eup %7200 }
0x12c6   :  { %v2831_v17 = vmul.f32 %v7191_v41, %v2827_v12  ;;  %v2826_v18 = vmul.f32 %v7193_v7, %v2822_v13  ;;  %v7203_v4 = vpop.eup %7202  ;;  %v2787_v13 = vmul.f32 0.5, %v7918_v24  ;;  %v2789_v24 = vmul.f32 0.5, %v7930_v42 }
0x12c7   :  { %v2836_v20 = vadd.f32 -0.28449672, %v2832_v14  ;;  %v2825_v27 = vmul.f32 %v7195_v29, %v2821_v16 }
0x12c8   :  { %v2835_v28 = vadd.f32 -0.28449672, %v2831_v17  ;;  %v2830_v33 = vadd.f32 1.4214138, %v2826_v18 }
0x12c9   :  { %v2840_v38 = vmul.f32 %v7189_v58, %v2836_v20  ;;  %v2829_v40 = vadd.f32 1.4214138, %v2825_v27 }
0x12ca   :  { %v2839_v45 = vmul.f32 %v7191_v41, %v2835_v28  ;;  %v2834_v43 = vmul.f32 %v7193_v7, %v2830_v33 }
0x12cb   :  { %v2844_v50 = vadd.f32 0.2548296, %v2840_v38  ;;  %v2833_v47 = vmul.f32 %v7195_v29, %v2829_v40 }
0x12cc   :  { %v2843_v52 = vadd.f32 0.2548296, %v2839_v45  ;;  %v2838_v53 = vadd.f32 -0.28449672, %v2834_v43 }
0x12cd   :  { %v2848_v54 = vmul.f32 %v7189_v58, %v2844_v50  ;;  %v2837_v19 = vadd.f32 -0.28449672, %v2833_v47 }
0x12ce   :  { %v2847_v56 = vmul.f32 %v7191_v41, %v2843_v52  ;;  %v2842_v57 = vmul.f32 %v7193_v7, %v2838_v53 }
0x12cf   :  { %v2868_v37 = vmul.f32 %v7197_v55, %v2848_v54  ;;  %v2841_v60 = vmul.f32 %v7195_v29, %v2837_v19 }
0x12d0   :  { %v2867_v62 = vmul.f32 %v7199_v23, %v2847_v56  ;;  %v2846_v21 = vadd.f32 0.2548296, %v2842_v57 }
0x12d1   :  { %v2872_v39 = vsub.f32 1.0, %v2868_v37  ;;  %v2845_v63 = vadd.f32 0.2548296, %v2841_v60 }
0x12d2   :  { %v2871_v0 = vsub.f32 1.0, %v2867_v62  ;;  %v2850_v44 = vmul.f32 %v7193_v7, %v2846_v21  ;;  %v2788_v7 = vmul.f32 0.5, %v7916_v35  ;;  %v2790_v35 = vmul.f32 0.5, %v7928_v34 }
0x12d3   :  { %v2880_v1 = vsub.f32 0.0, %v2872_v39  ;;  %v2849_v31 = vmul.f32 %v7195_v29, %v2845_v63 }
0x12d4   :  { %v2879_v58 = vsub.f32 0.0, %v2871_v0  ;;  %v2870_v32 = vmul.f32 %v7201_v22, %v2850_v44 }
0x12d5   :  { %v2884_v6 = vsel %vm2876_vm6, %v2872_v39, %v2880_v1  ;;  %v2869_v41 = vmul.f32 %v7203_v4, %v2849_v31 }
0x12d6   :  { %v2888_v9 = vadd.f32 1.0, %v2884_v6  ;;  %v2883_v10 = vsel %vm2875_vm7, %v2871_v0, %v2879_v58  ;;  %v2874_v12 = vsub.f32 1.0, %v2870_v32  ;;  %v5898_v6 = vld [vmem:[%s8395_s7 + $0x20] sm:$0xff] }
0x12d7   :  { %v2887_v14 = vadd.f32 1.0, %v2883_v10  ;;  %v2873_v15 = vsub.f32 1.0, %v2869_v41  ;;  %v5899_v41 = vld [vmem:[%s8395_s7 + $0x28] sm:$0xff]  ;;  %v5900_v10 = vld [vmem:[%s8395_s7 + $0x30] sm:$0xff] }
0x12d8   :  { %v2882_v16 = vsub.f32 0.0, %v2874_v12  ;;  %v2892_v17 = vmul.f32 %v2888_v9, %v2788_v7  ;;  %v6782_v9 = vpack.c.bf16 %v5899_v41, %v5898_v6 }
0x12d9   :  { %v2891_v29 = vmul.f32 %v2887_v14, %v2787_v13  ;;  %v2881_v25 = vsub.f32 0.0, %v2873_v15 }
0x12da   :  { %v2886_v18 = vsel %vm2878_vm9, %v2874_v12, %v2882_v16  ;;  %v5901_v12 = vld [vmem:[%s8395_s7 + $0x38] sm:$0xff]  ;;  %6783 = vmatprep.subr.bf16.mxu1 %v6782_v9 }
0x12db   :  { %v2890_v26 = vadd.f32 1.0, %v2886_v18  ;;  %v2885_v36 = vsel %vm2877_vm10, %v2873_v15, %v2881_v25  ;;  %6451 = vmatprep.mubr.msk.f32.mxu0 %vm2910_vm8, %v2891_v29  ;;  %v6786_v13 = vpack.c.bf16 %v5901_v12, %v5900_v10  ;;  %6785 = vmatpush3.bf16.msra.mxu1 %v6782_v9 }
0x12dc   :  { %v2889_v20 = vadd.f32 1.0, %v2885_v36  ;;  %6452 = vmatmul.mubr.msk.f32.vlgmr.msra.gmra.mrb[22].mxu0 %vm2910_vm8, %v2892_v17 }
0x12dd   :  { %v2894_v28 = vmul.f32 %v2890_v26, %v2790_v35  ;;  %6787 = vmatprep.subr.bf16.mxu1 %v6786_v13 }
0x12de   :  { %v2893_v27 = vmul.f32 %v2889_v20, %v2789_v24 }
0x12df   :  { %6789 = vmatpush3.bf16.msra.mxu1 %v6786_v13 }
0x12e0   :  { %6454 = vmatprep.mubr.msk.f32.mxu0 %vm2910_vm8, %v2893_v27  ;;  %v5896_v27 = vld [vmem:[%s8405_s17] ss:$0 sm:$0xff] }
0x12e1   :  { %6455 = vmatmul.mubr.msk.f32.gmra.mrb[24].mxu0 %vm2910_vm8, %v2894_v28 }
0x13af   :  { %v6453_v49 = vpop.f32.mrb[22].mxu0 }
0x13b0   :  { %v2995_v33 = vadd.f32 %v6453_v49, %v5891_v48  ;;  %v2989_v38 = vpop.f32.mrb[23].mxu0 }
0x13b1   :  { %v2990_v40 = vadd.f32 %v5891_v48, %v2989_v38 }
0x13b2   :  { %v3009_v42 = vadd.f32 %v2995_v33, %v7875_v46  ;;  %v5897_v33 = vld [vmem:[%s8406_s18] ss:$0 sm:$0xff] }
0x13b3   :  { %v3008_v45 = vadd.f32 %v2990_v40, %v7873_v30 }
0x13b4   :  { %v6456_v43 = vpop.f32.mrb[24].mxu0  ;;  %v3017_v34 = vsel %vm371_vm3, %v3009_v42, 0.0 }
0x13b5   :  { %v3005_v50 = vadd.f32 %v6456_v43, %v5891_v48  ;;  %3018 = vadd.xlane.f32.xlu0 %v3017_v34  ;;  %v2999_v47 = vpop.f32.mrb[25].mxu0  ;;  %v3014_v52 = vsel %vm371_vm3, %v3008_v45, 0.0 }
0x13b6   :  { %v3000_v53 = vadd.f32 %v5891_v48, %v2999_v47  ;;  %3015 = vadd.xlane.f32.xlu1 %v3014_v52 }
0x13b7   :  { %v3011_v54 = vadd.f32 %v3005_v50, %v7883_v8 }
0x13b8   :  { %v3010_v19 = vadd.f32 %v3000_v53, %v7881_v3 }
0x13b9   :  { %v3023_v55 = vsel %vm371_vm3, %v3011_v54, 0.0 }
0x13ba   :  { %3024 = vadd.xlane.f32.xlu0 %v3023_v55  ;;  %v3020_v46 = vsel %vm371_vm3, %v3010_v19, 0.0  ;;  %v5903_v55 = vld [vmem:[%s8396_s8 + $0x1] ss:$0 sm:$0xff] }
0x13bb   :  { %3021 = vadd.xlane.f32.xlu1 %v3020_v46 }
0x1442   :  { %v3019_v30 = vpop.xlane.xlu0 %3018 }
0x1443   :  { %v3027_v56 = vmul.f32 0.03125, %v3019_v30  ;;  %v3016_v57 = vpop.xlane.xlu1 %3015 }
0x1444   :  { %v3026_v23 = vmul.f32 0.03125, %v3016_v57 }
0x1445   :  { %v3031_v37 = vsub.f32 %v3009_v42, %v3027_v56 }
0x1446   :  { %v3030_v60 = vsub.f32 %v3008_v45, %v3026_v23 }
0x1447   :  { %v3025_v62 = vpop.xlane.xlu0 %3024  ;;  %v3035_v21 = vmul.f32 %v3031_v37, %v3031_v37 }
0x1448   :  { %v3029_v39 = vmul.f32 0.03125, %v3025_v62  ;;  %v3022_v63 = vpop.xlane.xlu1 %3021  ;;  %v3034_v0 = vmul.f32 %v3030_v60, %v3030_v60 }
0x1449   :  { %v3028_v8 = vmul.f32 0.03125, %v3022_v63  ;;  %v3041_v3 = vsel %vm371_vm3, %v3035_v21, 0.0 }
0x144a   :  { %v3033_v44 = vsub.f32 %v3011_v54, %v3029_v39  ;;  %3042 = vadd.xlane.f32.xlu0 %v3041_v3  ;;  %v3038_v22 = vsel %vm371_vm3, %v3034_v0, 0.0 }
0x144b   :  { %v3032_v1 = vsub.f32 %v3010_v19, %v3028_v8  ;;  %3039 = vadd.xlane.f32.xlu1 %v3038_v22 }
0x144c   :  { %v3037_v31 = vmul.f32 %v3033_v44, %v3033_v44 }
0x144d   :  { %v3036_v4 = vmul.f32 %v3032_v1, %v3032_v1 }
0x144e   :  { %v3047_v58 = vsel %vm371_vm3, %v3037_v31, 0.0 }
0x144f   :  { %3048 = vadd.xlane.f32.xlu0 %v3047_v58  ;;  %v3044_v32 = vsel %vm371_vm3, %v3036_v4, 0.0 }
0x1450   :  { %3045 = vadd.xlane.f32.xlu1 %v3044_v32 }
0x14d7   :  { %v3043_v14 = vpop.xlane.xlu0 %3042 }
0x14d8   :  { %v3051_v15 = vmul.f32 0.03125, %v3043_v14  ;;  %v3040_v7 = vpop.xlane.xlu1 %3039 }
0x14d9   :  { %v3050_v16 = vmul.f32 0.03125, %v3040_v7 }
0x14da   :  { %v3055_v29 = vadd.f32 1e-05, %v3051_v15 }
0x14db   :  { %v3054_v25 = vadd.f32 1e-05, %v3050_v16 }
0x14dc   :  { %7204 = vrsqrt.f32 %v3055_v29  ;;  %v3049_v17 = vpop.xlane.xlu0 %3048 }
0x14dd   :  { %7206 = vrsqrt.f32 %v3054_v25  ;;  %v3053_v18 = vmul.f32 0.03125, %v3049_v17  ;;  %v3046_v26 = vpop.xlane.xlu1 %3045 }
0x14de   :  { %v3052_v36 = vmul.f32 0.03125, %v3046_v26 }
0x14df   :  { %v3057_v24 = vadd.f32 1e-05, %v3053_v18 }
0x14e0   :  { %v3056_v20 = vadd.f32 1e-05, %v3052_v36 }
0x14e1   :  { %7208 = vrsqrt.f32 %v3057_v24 }
0x14e2   :  { %7210 = vrsqrt.f32 %v3056_v20 }
0x14e6   :  { %v7205_v35 = vpop.eup %7204 }
0x14e7   :  { %v7207_v28 = vpop.eup %7206  ;;  %v3063_v48 = vmul.f32 %v7205_v35, %v3031_v37 }
0x14e8   :  { %v3062_v49 = vmul.f32 %v7207_v28, %v3030_v60 }
0x14e9   :  { %v3073_v38 = vmul.f32 %v5896_v27, %v3063_v48 }
0x14ea   :  { %v3072_v40 = vmul.f32 %v5896_v27, %v3062_v49 }
0x14eb   :  { %v7209_v42 = vpop.eup %7208  ;;  %v7987_v50 = vadd.f32 %v5897_v33, %v3073_v38 }
0x14ec   :  { %v7211_v45 = vpop.eup %7210  ;;  %v7985_v43 = vadd.f32 %v5897_v33, %v3072_v40  ;;  %v3065_v34 = vmul.f32 %v7209_v42, %v3033_v44 }
0x14ed   :  { %v3064_v47 = vmul.f32 %v7211_v45, %v3032_v1 }
0x14ee   :  { %6465 = vmatprep.mubr.msk.f32.mxu1 %vm371_vm3, %v7985_v43  ;;  %v3075_v52 = vmul.f32 %v5896_v27, %v3065_v34 }
0x14ef   :  { %6466 = vmatmul.mubr.msk.f32.vlgmr.msra.gmra.mrb[30].mxu1 %vm371_vm3, %v7987_v50  ;;  %v3074_v53 = vmul.f32 %v5896_v27, %v3064_v47 }
0x14f0   :  { %v7995_v19 = vadd.f32 %v5897_v33, %v3075_v52 }
0x14f1   :  { %v7993_v54 = vadd.f32 %v5897_v33, %v3074_v53 }
0x14f3   :  { %6468 = vmatprep.mubr.msk.f32.mxu1 %vm371_vm3, %v7993_v54 }
0x14f4   :  { %6469 = vmatmul.mubr.msk.f32.gmra.mrb[32].mxu1 %vm371_vm3, %v7995_v19 }
0x15c2   :  { %v6467_v46 = vpop.f32.mrb[30].mxu1 }
0x15c3   :  { %v8004_v30 = vadd.f32 %v6467_v46, %v5903_v55  ;;  %v3177_v56 = vpop.f32.mrb[31].mxu1 }
0x15c4   :  { %v8006_v57 = vadd.f32 %v5903_v55, %v3177_v56 }
0x15c6   :  { %6475 = vmatprep.mubr.msk.f32.mxu1 %vm571_vm4, %v8006_v57  ;;  %v8012_v23 = vpack.i.bf16 %v8004_v30, %v8006_v57 }
0x15c7   :  { %v6470_v37 = vpop.f32.mrb[32].mxu1 }
0x15c8   :  { %v8014_v60 = vadd.f32 %v6470_v37, %v5903_v55  ;;  %7021 = vrot.lane.b32.xlu1 %v8012_v23, %s7334_s26  ;;  %v3187_v62 = vpop.f32.mrb[33].mxu1 }
0x15c9   :  { %v8018_v21 = vadd.f32 %v5903_v55, %v3187_v62 }
0x15cb   :  { %6482 = vmatprep.mubr.msk.f32.mxu0 %vm571_vm4, %v8018_v21  ;;  %v8024_v39 = vpack.i.bf16 %v8014_v60, %v8018_v21 }
0x15cd   :  { %7026 = vrot.lane.b32.xlu0 %v8024_v39, %s7334_s26 }
0x163a   :  { %v7022_v63 = vpop.permute.xlu1 %7021 }
0x163b   :  { %v7024_v0 = vunpack.i.h.bf16 %v7022_v63  ;;  %v7023_v8 = vunpack.i.l.bf16 %v7022_v63 }
0x163d   :  { %v6790_v3 = vpack.c.bf16 %v7024_v0, %v7023_v8 }
0x163f   :  { %v7027_v44 = vpop.permute.xlu0 %7026  ;;  %6792 = vmatprep.subr.msk.bf16.mxu1 %vm7608_vm5, %v6790_v3 }
0x1640   :  { %v7029_v22 = vunpack.i.h.bf16 %v7027_v44  ;;  %v7028_v1 = vunpack.i.l.bf16 %v7027_v44  ;;  %6795 = vmatpush3.bf16.xpose.msk.msra.mxu1 %vm7608_vm5, %v6790_v3 }
0x1642   :  { %v6796_v31 = vpack.c.bf16 %v7029_v22, %v7028_v1 }
0x1644   :  { %6798 = vmatprep.subr.msk.bf16.mxu0 %vm7608_vm5, %v6796_v31 }
0x1645   :  { %6801 = vmatpush3.bf16.xpose.msk.msra.mxu0 %vm7608_vm5, %v6796_v31 }
0x1647   :  { %6476 = vmatmul.mubr.msk.f32.vlgmr.msra.gmra.mrb[34].mxu1 %vm571_vm4, %v8004_v30 }
0x164c   :  { %6483 = vmatmul.mubr.msk.f32.vlgmr.msra.gmra.mrb[26].mxu0 %vm571_vm4, %v8014_v60 }
0x171a   :  { %v6477_v4 = vpop.f32.mrb[34].mxu1 }
0x171b   :  { %v3380_v58 = vmul.f32 0.35355338, %v6477_v4  ;;  %v3281_v32 = vpop.f32.mrb[35].mxu1 }
0x171c   :  { %v3379_v6 = vmul.f32 0.35355338, %v3281_v32 }
0x171d   :  { %v3384_v41 = vadd.f32 %v3380_v58, %v7626_v59 }
0x171e   :  { %v3383_v9 = vadd.f32 %v3379_v6, %v7629_v61 }
0x171f   :  { %v6484_v10 = vpop.f32.mrb[26].mxu0  ;;  %v3390_v12 = vsel %vm147_vm2, %v3384_v41, -inf }
0x1720   :  { %v3382_v13 = vmul.f32 0.35355338, %v6484_v10  ;;  %v3370_v14 = vpop.f32.mrb[27].mxu0  ;;  %3391 = vmax.xlane.f32.xlu0 %v3390_v12  ;;  %v3387_v15 = vsel %vm147_vm2, %v3383_v9, -inf }
0x1721   :  { %v3381_v7 = vmul.f32 0.35355338, %v3370_v14  ;;  %3388 = vmax.xlane.f32.xlu1 %v3387_v15 }
0x1722   :  { %v3386_v16 = vadd.f32 %v3382_v13, %v7631_v2 }
0x1723   :  { %v3385_v29 = vadd.f32 %v3381_v7, %v7642_v11 }
0x1724   :  { %v3396_v25 = vsel %vm147_vm2, %v3386_v16, -inf }
0x1725   :  { %3397 = vmax.xlane.f32.xlu0 %v3396_v25  ;;  %v3393_v17 = vsel %vm147_vm2, %v3385_v29, -inf }
0x1726   :  { %3394 = vmax.xlane.f32.xlu1 %v3393_v17 }
0x17ad   :  { %v3392_v18 = vpop.xlane.xlu0 %3391 }
0x17ae   :  { %v3400_v26 = vsub.f32 %v3384_v41, %v3392_v18  ;;  %v3389_v36 = vpop.xlane.xlu1 %3388 }
0x17af   :  { %v3399_v24 = vsub.f32 %v3383_v9, %v3389_v36 }
0x17b0   :  { %v3405_v20 = vmul.f32 1.442695, %v3400_v26 }
0x17b1   :  { %v3403_v35 = vmul.f32 1.442695, %v3399_v24 }
0x17b2   :  { %7212 = vpow2.f32 %v3405_v20  ;;  %v3398_v27 = vpop.xlane.xlu0 %3397 }
0x17b3   :  { %7214 = vpow2.f32 %v3403_v35  ;;  %v3402_v28 = vsub.f32 %v3386_v16, %v3398_v27  ;;  %v3395_v34 = vpop.xlane.xlu1 %3394 }
0x17b4   :  { %v3401_v47 = vsub.f32 %v3385_v29, %v3395_v34 }
0x17b5   :  { %v3409_v48 = vmul.f32 1.442695, %v3402_v28 }
0x17b6   :  { %v3407_v52 = vmul.f32 1.442695, %v3401_v47 }
0x17b7   :  { %7216 = vpow2.f32 %v3409_v48 }
0x17b8   :  { %7218 = vpow2.f32 %v3407_v52 }
0x17bc   :  { %v7213_v49 = vpop.eup %7212 }
0x17bd   :  { %v7215_v33 = vpop.eup %7214  ;;  %v3414_v38 = vsel %vm147_vm2, %v7213_v49, 0.0 }
0x17be   :  { %3415 = vadd.xlane.f32.xlu0 %v3414_v38  ;;  %v3411_v40 = vsel %vm147_vm2, %v7215_v33, 0.0 }
0x17bf   :  { %3412 = vadd.xlane.f32.xlu1 %v3411_v40 }
0x17c1   :  { %v7217_v42 = vpop.eup %7216 }
0x17c2   :  { %v3420_v45 = vsel %vm147_vm2, %v7217_v42, 0.0  ;;  %v7219_v53 = vpop.eup %7218 }
0x17c3   :  { %3421 = vadd.xlane.f32.xlu0 %v3420_v45  ;;  %v3417_v55 = vsel %vm147_vm2, %v7219_v53, 0.0 }
0x17d0   :  { %7031 = vrot.lane.b32.xlu1 %v8012_v23, %s7335_s27 }
0x17d4   :  { %7041 = vrot.lane.b32.xlu1 %v8024_v39, %s7336_s3 }
0x17d9   :  { %7036 = vrot.lane.b32.xlu0 %v8024_v39, %s7335_s27 }
0x17dd   :  { %3698 = vrot.lane.b32.xlu0 %v8014_v60, %s7337_s28 }
0x17e1   :  { %3605 = vrot.lane.b32.xlu0 %v8006_v57, %s7337_s28 }
0x17f8   :  { %3418 = vadd.xlane.f32.xlu1 %v3417_v55 }
0x1809   :  { %3696 = vrot.lane.b32.xlu1 %v8018_v21, %s7337_s28 }
0x180d   :  { %7046 = vrot.lane.b32.xlu1 %v8012_v23, %s7336_s3 }
0x1811   :  { %3607 = vrot.lane.b32.xlu1 %v8004_v30, %s7337_s28  ;;  %s8433_s28 = smov 72  }
0x184b   :  { %v3416_v46 = vpop.xlane.xlu0 %3415 }
0x184c   :  { %7220 = vrcp.f32 %v3416_v46  ;;  %v3413_v56 = vpop.xlane.xlu1 %3412 }
0x184d   :  { %7222 = vrcp.f32 %v3413_v56 }
0x1850   :  { %v3422_v37 = vpop.xlane.xlu0 %3421  ;;  %v7032_v62 = vpop.permute.xlu1 %7031 }
0x1851   :  { %v7034_v63 = vunpack.i.h.bf16 %v7032_v62  ;;  %v7033_v0 = vunpack.i.l.bf16 %v7032_v62  ;;  %7224 = vrcp.f32 %v3422_v37 }
0x1853   :  { %v6802_v8 = vpack.c.bf16 %v7034_v63, %v7033_v0 }
0x1854   :  { %v7037_v3 = vpop.permute.xlu0 %7036  ;;  %v7042_v44 = vpop.permute.xlu1 %7041 }
0x1855   :  { %v7039_v22 = vunpack.i.h.bf16 %v7037_v3  ;;  %v7038_v1 = vunpack.i.l.bf16 %v7037_v3  ;;  %6803 = vmatprep.subr.bf16.mxu1 %v6802_v8  ;;  %v7044_v32 = vunpack.i.h.bf16 %v7042_v44  ;;  %v7043_v6 = vunpack.i.l.bf16 %v7042_v44 }
0x1856   :  { %v7221_v31 = vpop.eup %7220  ;;  %6805 = vmatpush3.bf16.msra.mxu1 %v6802_v8 }
0x1857   :  { %v7223_v4 = vpop.eup %7222  ;;  %v6806_v58 = vpack.c.bf16 %v7039_v22, %v7038_v1  ;;  %v3426_v10 = vmul.f32 %v7221_v31, %v7213_v49  ;;  %v6816_v12 = vpack.c.bf16 %v7044_v32, %v7043_v6 }
0x1858   :  { %v3699_v41 = vpop.permute.xlu0 %3698  ;;  %v3424_v9 = vmul.f32 %v7223_v4, %v7215_v33 }
0x1859   :  { %6807 = vmatprep.subr.bf16.mxu1 %v6806_v58 }
0x185a   :  { %6489 = vmatprep.mubr.msk.f32.mxu1 %vm147_vm2, %v3424_v9 }
0x185b   :  { %6490 = vmatmul.mubr.msk.f32.vlgmr.msra.gmra.mrb[36].mxu1 %vm147_vm2, %v3426_v10  ;;  %v7225_v25 = vpop.eup %7224 }
0x185c   :  { %6809 = vmatpush3.bf16.msra.mxu1 %v6806_v58  ;;  %v3606_v13 = vpop.permute.xlu0 %3605  ;;  %v3430_v36 = vmul.f32 %v7225_v25, %v7217_v42 }
0x185d   :  { %6818 = vmatprep.subr.msk.bf16.mxu1 %vm7608_vm5, %v6816_v12  ;;  %6503 = vmatprep.mubr.msk.f32.mxu0 %vm571_vm4, %v3606_v13 }
0x1885   :  { %v3419_v14 = vpop.xlane.xlu1 %3418 }
0x1886   :  { %7226 = vrcp.f32 %v3419_v14 }
0x1889   :  { %v3697_v15 = vpop.permute.xlu1 %3696 }
0x188d   :  { %v7047_v7 = vpop.permute.xlu1 %7046 }
0x188e   :  { %v7049_v16 = vunpack.i.h.bf16 %v7047_v7  ;;  %v7048_v29 = vunpack.i.l.bf16 %v7047_v7 }
0x1890   :  { %v7227_v17 = vpop.eup %7226  ;;  %v6810_v18 = vpack.c.bf16 %v7049_v16, %v7048_v29 }
0x1891   :  { %v3428_v26 = vmul.f32 %v7227_v17, %v7219_v53  ;;  %v3608_v24 = vpop.permute.xlu1 %3607 }
0x1892   :  { %6812 = vmatprep.subr.msk.bf16.mxu0 %vm7608_vm5, %v6810_v18 }
0x1893   :  { %6496 = vmatprep.mubr.msk.f32.mxu1 %vm147_vm2, %v3428_v26  ;;  %6815 = vmatpush3.bf16.xpose.msk.msra.mxu0 %vm7608_vm5, %v6810_v18 }
0x1894   :  { %6497 = vmatmul.mubr.msk.f32.vlgmr.msra.gmra.mrb[38].mxu1 %vm147_vm2, %v3430_v36 }
0x1895   :  { %6821 = vmatpush3.bf16.xpose.msk.msra.mxu1 %vm7608_vm5, %v6816_v12  ;;  %6510 = vmatprep.mubr.msk.f32.mxu1 %vm571_vm4, %v3697_v15 }
0x189a   :  { %6504 = vmatmul.mubr.msk.f32.vlgmr.msra.gmra.mrb[28].mxu0 %vm571_vm4, %v3608_v24 }
0x189c   :  { %6511 = vmatmul.mubr.msk.f32.vlgmr.msra.gmra.mrb[40].mxu1 %vm571_vm4, %v3699_v41 }
0x192e   :  { %v8084_v20 = vpop.f32.mrb[36].mxu1 }
0x192f   :  { %v8086_v35 = vpop.f32.mrb[37].mxu1 }
0x1967   :  { %v8088_v27 = vpop.f32.mrb[38].mxu1 }
0x1968   :  { %v8090_v28 = vpop.f32.mrb[39].mxu1 }
0x196d   :  { %v6505_v48 = vpop.f32.mrb[28].mxu0 }
0x196e   :  { %v3687_v49 = vpop.f32.mrb[29].mxu0  ;;  %v3788_v14 = vmul.f32 0.35355338, %v6505_v48 }
0x196f   :  { %v6512_v33 = vpop.f32.mrb[40].mxu1  ;;  %v3787_v53 = vmul.f32 0.35355338, %v3687_v49 }
0x1970   :  { %v3790_v38 = vmul.f32 0.35355338, %v6512_v33  ;;  %v3778_v40 = vpop.f32.mrb[41].mxu1  ;;  %v3792_v15 = vadd.f32 %v3788_v14, %v7626_v59 }
0x1971   :  { %v3789_v42 = vmul.f32 0.35355338, %v3778_v40  ;;  %v3791_v55 = vadd.f32 %v3787_v53, %v7629_v61 }
0x1972   :  { %v3794_v45 = vadd.f32 %v3790_v38, %v7631_v2  ;;  %v3798_v7 = vsel %vm147_vm2, %v3792_v15, -inf }
0x1973   :  { %v3793_v34 = vadd.f32 %v3789_v42, %v7642_v11  ;;  %v3795_v46 = vsel %vm147_vm2, %v3791_v55, -inf }
0x1974   :  { %v3804_v47 = vsel %vm147_vm2, %v3794_v45, -inf }
0x1975   :  { %3805 = vmax.xlane.f32.xlu1 %v3804_v47  ;;  %v3801_v52 = vsel %vm147_vm2, %v3793_v34, -inf }
0x1976   :  { %3802 = vmax.xlane.f32.xlu0 %v3801_v52 }
0x1986   :  { %7051 = vrot.lane.b32.xlu1 %v8024_v39, %s7338_s29 }
0x198a   :  { %7061 = vrot.lane.b32.xlu1 %v8024_v39, %s7339_s0 }
0x198e   :  { %4207 = vrot.lane.b32.xlu1 %v8006_v57, %s7340_s4 }
0x1992   :  { %4298 = vrot.lane.b32.xlu1 %v8018_v21, %s7340_s4 }
0x19b6   :  { %3796 = vmax.xlane.f32.xlu1 %v3795_v46 }
0x1a02   :  { %v3806_v56 = vpop.xlane.xlu1 %3805 }
0x1a03   :  { %v3810_v37 = vsub.f32 %v3794_v45, %v3806_v56  ;;  %v3803_v62 = vpop.xlane.xlu0 %3802 }
0x1a04   :  { %v3809_v63 = vsub.f32 %v3793_v34, %v3803_v62 }
0x1a05   :  { %v3817_v0 = vmul.f32 1.442695, %v3810_v37 }
0x1a06   :  { %v3815_v8 = vmul.f32 1.442695, %v3809_v63  ;;  %v7052_v3 = vpop.permute.xlu1 %7051 }
0x1a07   :  { %7228 = vpow2.f32 %v3817_v0  ;;  %v7054_v44 = vunpack.i.h.bf16 %v7052_v3  ;;  %v7053_v22 = vunpack.i.l.bf16 %v7052_v3 }
0x1a08   :  { %7230 = vpow2.f32 %v3815_v8 }
0x1a09   :  { %v6826_v1 = vpack.c.bf16 %v7054_v44, %v7053_v22 }
0x1a0a   :  { %v7062_v6 = vpop.permute.xlu1 %7061 }
0x1a0b   :  { %6827 = vmatprep.subr.bf16.mxu1 %v6826_v1  ;;  %v7064_v33 = vunpack.i.h.bf16 %v7062_v6  ;;  %v7063_v38 = vunpack.i.l.bf16 %v7062_v6 }
0x1a0c   :  { %6829 = vmatpush3.bf16.msra.mxu1 %v6826_v1 }
0x1a0d   :  { %v6836_v45 = vpack.c.bf16 %v7064_v33, %v7063_v38 }
0x1a0e   :  { %v4208_v41 = vpop.permute.xlu1 %4207 }
0x1a11   :  { %v7229_v31 = vpop.eup %7228 }
0x1a12   :  { %v3828_v4 = vsel %vm147_vm2, %v7229_v31, 0.0  ;;  %v7231_v58 = vpop.eup %7230  ;;  %v4299_v9 = vpop.permute.xlu1 %4298 }
0x1a13   :  { %3829 = vadd.xlane.f32.xlu0 %v3828_v4  ;;  %v3825_v32 = vsel %vm147_vm2, %v7231_v58, 0.0 }
0x1a17   :  { %3826 = vadd.xlane.f32.xlu0 %v3825_v32 }
0x1a2d   :  { %7056 = vrot.lane.b32.xlu0 %v8012_v23, %s7339_s0 }
0x1a31   :  { %4209 = vrot.lane.b32.xlu0 %v8004_v30, %s7340_s4 }
0x1a35   :  { %4300 = vrot.lane.b32.xlu0 %v8014_v60, %s7340_s4 }
0x1a43   :  { %v3797_v10 = vpop.xlane.xlu1 %3796 }
0x1a44   :  { %v3807_v12 = vsub.f32 %v3791_v55, %v3797_v10 }
0x1a46   :  { %v3811_v13 = vmul.f32 1.442695, %v3807_v12 }
0x1a48   :  { %7232 = vpow2.f32 %v3811_v13 }
0x1a52   :  { %v7233_v16 = vpop.eup %7232 }
0x1a53   :  { %v3819_v29 = vsel %vm147_vm2, %v7233_v16, 0.0 }
0x1a54   :  { %3799 = vmax.xlane.f32.xlu0 %v3798_v7 }
0x1a58   :  { %3820 = vadd.xlane.f32.xlu0 %v3819_v29 }
0x1a6e   :  { %7066 = vrot.lane.b32.xlu0 %v8012_v23, %s7338_s29  ;;  %s8434_s29 = smov 104  }
0x1aa0   :  { %v3830_v25 = vpop.xlane.xlu0 %3829 }
0x1aa1   :  { %7234 = vrcp.f32 %v3830_v25 }
0x1aa4   :  { %v3827_v17 = vpop.xlane.xlu0 %3826 }
0x1aa5   :  { %7236 = vrcp.f32 %v3827_v17 }
0x1aa8   :  { %v7057_v18 = vpop.permute.xlu0 %7056 }
0x1aa9   :  { %v7059_v26 = vunpack.i.h.bf16 %v7057_v18  ;;  %v7058_v36 = vunpack.i.l.bf16 %v7057_v18 }
0x1aab   :  { %v6830_v24 = vpack.c.bf16 %v7059_v26, %v7058_v36  ;;  %v7235_v48 = vpop.eup %7234  ;;  %v5909_v36 = vld [vmem:[%s8397_s9 + $0x28] sm:$0xff] }
0x1aac   :  { %v3838_v42 = vmul.f32 %v7235_v48, %v7229_v31  ;;  %v4210_v34 = vpop.permute.xlu0 %4209 }
0x1aad   :  { %6832 = vmatprep.subr.msk.bf16.mxu1 %vm7608_vm5, %v6830_v24 }
0x1aaf   :  { %v7237_v49 = vpop.eup %7236 }
0x1ab0   :  { %v3836_v40 = vmul.f32 %v7237_v49, %v7231_v58  ;;  %v4301_v47 = vpop.permute.xlu0 %4300 }
0x1ab2   :  { %6524 = vmatprep.mubr.msk.f32.mxu1 %vm147_vm2, %v3836_v40 }
0x1ab3   :  { %6525 = vmatmul.mubr.msk.f32.vlgmr.msra.gmra.mrb[42].mxu1 %vm147_vm2, %v3838_v42 }
0x1ab4   :  { %6835 = vmatpush3.bf16.xpose.msk.msra.mxu1 %vm7608_vm5, %v6830_v24  ;;  %6547 = vmatprep.mubr.msk.f32.mxu1 %vm571_vm4, %v4208_v41  ;;  %v5908_v24 = vld [vmem:[%s8397_s9 + $0x20] sm:$0xff] }
0x1ab5   :  { %6838 = vmatprep.subr.msk.bf16.mxu1 %vm7608_vm5, %v6836_v45 }
0x1abb   :  { %6548 = vmatmul.mubr.msk.f32.vlgmr.msra.gmra.mrb[44].mxu1 %vm571_vm4, %v4210_v34 }
0x1abc   :  { %6841 = vmatpush3.bf16.xpose.msk.msra.mxu1 %vm7608_vm5, %v6836_v45  ;;  %6554 = vmatprep.mubr.msk.f32.mxu1 %vm571_vm4, %v4299_v9 }
0x1ac3   :  { %6555 = vmatmul.mubr.msk.f32.vlgmr.msra.gmra.mrb[46].mxu1 %vm571_vm4, %v4301_v47 }
0x1ae1   :  { %v3800_v52 = vpop.xlane.xlu0 %3799 }
0x1ae2   :  { %v3808_v53 = vsub.f32 %v3792_v15, %v3800_v52 }
0x1ae4   :  { %v3813_v55 = vmul.f32 1.442695, %v3808_v53 }
0x1ae5   :  { %v3821_v46 = vpop.xlane.xlu0 %3820 }
0x1ae6   :  { %7238 = vpow2.f32 %v3813_v55 }
0x1ae7   :  { %7240 = vrcp.f32 %v3821_v46 }
0x1ae9   :  { %v7067_v56 = vpop.permute.xlu0 %7066 }
0x1aea   :  { %v7069_v37 = vunpack.i.h.bf16 %v7067_v56  ;;  %v7068_v62 = vunpack.i.l.bf16 %v7067_v56 }
0x1aec   :  { %v6822_v63 = vpack.c.bf16 %v7069_v37, %v7068_v62 }
0x1aee   :  { %6823 = vmatprep.subr.bf16.mxu0 %v6822_v63 }
0x1aef   :  { %6825 = vmatpush3.bf16.msra.mxu0 %v6822_v63 }
0x1af0   :  { %v7239_v0 = vpop.eup %7238  ;;  %6527 = vmatprep.subr.mxu0 %v5909_v36 }
0x1af1   :  { %v7241_v8 = vpop.eup %7240  ;;  %v3822_v3 = vsel %vm147_vm2, %v7239_v0, 0.0 }
0x1af2   :  { %3823 = vadd.xlane.f32.xlu1 %v3822_v3  ;;  %v3832_v44 = vmul.f32 %v7241_v8, %v7233_v16 }
0x1af4   :  { %6517 = vmatprep.mubr.msk.f32.mxu0 %vm147_vm2, %v3832_v44 }
0x1b7f   :  { %v3824_v22 = vpop.xlane.xlu1 %3823 }
0x1b80   :  { %7242 = vrcp.f32 %v3824_v22 }
0x1b86   :  { %v8135_v1 = vpop.f32.mrb[42].mxu1 }
0x1b87   :  { %v8137_v31 = vpop.f32.mrb[43].mxu1 }
0x1b8a   :  { %v7243_v4 = vpop.eup %7242 }
0x1b8b   :  { %v3834_v58 = vmul.f32 %v7243_v4, %v7239_v0 }
0x1b8d   :  { %6518 = vmatmul.mubr.msk.f32.vlgmr.msra.gmra.mrb[30].mxu0 %vm147_vm2, %v3834_v58 }
0x1b8e   :  { %v6549_v32 = vpop.f32.mrb[44].mxu1  ;;  %6528 = vmatpush3.msra.mxu0 %v5909_v36 }
0x1b8f   :  { %v4390_v6 = vmul.f32 0.35355338, %v6549_v32  ;;  %v4289_v41 = vpop.f32.mrb[45].mxu1  ;;  %6535 = vmatprep.subr.mxu0 %v5908_v24 }
0x1b90   :  { %v4389_v9 = vmul.f32 0.35355338, %v4289_v41 }
0x1b91   :  { %v4394_v10 = vadd.f32 %v4390_v6, %v7626_v59 }
0x1b92   :  { %v4393_v12 = vadd.f32 %v4389_v9, %v7629_v61  ;;  %v5910_v9 = vld [vmem:[%s8397_s9 + $0x30] sm:$0xff] }
0x1b93   :  { %v4400_v13 = vsel %vm147_vm2, %v4394_v10, -inf }
0x1b94   :  { %4401 = vmax.xlane.f32.xlu1 %v4400_v13  ;;  %v4397_v7 = vsel %vm147_vm2, %v4393_v12, -inf }
0x1b96   :  { %v6556_v14 = vpop.f32.mrb[46].mxu1 }
0x1b97   :  { %v4380_v15 = vpop.f32.mrb[47].mxu1  ;;  %v4392_v16 = vmul.f32 0.35355338, %v6556_v14 }
0x1b98   :  { %v4391_v29 = vmul.f32 0.35355338, %v4380_v15  ;;  %4398 = vmax.xlane.f32.xlu1 %v4397_v7 }
0x1b99   :  { %v4396_v17 = vadd.f32 %v4392_v16, %v7631_v2 }
0x1b9a   :  { %v4395_v25 = vadd.f32 %v4391_v29, %v7642_v11 }
0x1b9b   :  { %v4406_v26 = vsel %vm147_vm2, %v4396_v17, -inf }
0x1b9c   :  { %v4403_v18 = vsel %vm147_vm2, %v4395_v25, -inf }
0x1b9d   :  { %4404 = vmax.xlane.f32.xlu1 %v4403_v18 }
0x1ba1   :  { %4407 = vmax.xlane.f32.xlu1 %v4406_v26 }
0x1c21   :  { %v4402_v48 = vpop.xlane.xlu1 %4401 }
0x1c22   :  { %v4410_v49 = vsub.f32 %v4394_v10, %v4402_v48 }
0x1c24   :  { %v4415_v33 = vmul.f32 1.442695, %v4410_v49 }
0x1c25   :  { %v4399_v38 = vpop.xlane.xlu1 %4398 }
0x1c26   :  { %7244 = vpow2.f32 %v4415_v33  ;;  %v4409_v40 = vsub.f32 %v4393_v12, %v4399_v38 }
0x1c28   :  { %v4413_v42 = vmul.f32 1.442695, %v4409_v40 }
0x1c2a   :  { %7246 = vpow2.f32 %v4413_v42  ;;  %v4405_v45 = vpop.xlane.xlu1 %4404 }
0x1c2b   :  { %v4411_v34 = vsub.f32 %v4395_v25, %v4405_v45 }
0x1c2d   :  { %v4417_v47 = vmul.f32 1.442695, %v4411_v34 }
0x1c2e   :  { %v4408_v52 = vpop.xlane.xlu1 %4407 }
0x1c2f   :  { %7248 = vpow2.f32 %v4417_v47  ;;  %v4412_v53 = vsub.f32 %v4396_v17, %v4408_v52 }
0x1c30   :  { %v7245_v55 = vpop.eup %7244 }
0x1c31   :  { %v4419_v46 = vmul.f32 1.442695, %v4412_v53  ;;  %v4424_v56 = vsel %vm147_vm2, %v7245_v55, 0.0 }
0x1c32   :  { %4425 = vadd.xlane.f32.xlu1 %v4424_v56 }
0x1c33   :  { %7250 = vpow2.f32 %v4419_v46 }
0x1c34   :  { %v7247_v37 = vpop.eup %7246 }
0x1c35   :  { %v4421_v62 = vsel %vm147_vm2, %v7247_v37, 0.0 }
0x1c36   :  { %4422 = vadd.xlane.f32.xlu1 %v4421_v62 }
0x1c39   :  { %v7249_v63 = vpop.eup %7248 }
0x1c3a   :  { %v4427_v0 = vsel %vm147_vm2, %v7249_v63, 0.0 }
0x1c3b   :  { %4428 = vadd.xlane.f32.xlu0 %v4427_v0 }
0x1c3d   :  { %v7251_v8 = vpop.eup %7250 }
0x1c3e   :  { %v4430_v3 = vsel %vm147_vm2, %v7251_v8, 0.0 }
0x1c3f   :  { %4431 = vadd.xlane.f32.xlu1 %v4430_v3 }
0x1c50   :  { %7071 = vrot.lane.b32.xlu1 %v8012_v23, %s7341_s1 }
0x1c51   :  { %7086 = vrot.lane.b32.xlu0 %v8024_v39, %s8433_s28 }
0x1c54   :  { %7076 = vrot.lane.b32.xlu1 %v8024_v39, %s7341_s1  ;;  %s8435_s1 = smov 40  }
0x1c58   :  { %7081 = vrot.lane.b32.xlu1 %v8012_v23, %s8433_s28 }
0x1c5c   :  { %4716 = vrot.lane.b32.xlu1 %v8006_v57, %s8434_s29 }
0x1c60   :  { %4718 = vrot.lane.b32.xlu1 %v8004_v30, %s8434_s29  ;;  %v6519_v44 = vpop.f32.mrb[30].mxu0 }
0x1c61   :  { %v3917_v22 = vpop.f32.mrb[31].mxu0 }
0x1c62   :  { %6529 = vmatprep.mubr.msk.f32.mxu0 %vm571_vm4, %v3917_v22 }
0x1c63   :  { %6530 = vmatmul.mubr.msk.f32.vlgmr.msra.gmra.mrb[32].mxu0 %vm571_vm4, %v6519_v44 }
0x1c64   :  { %4807 = vrot.lane.b32.xlu1 %v8018_v21, %s8434_s29  ;;  %6532 = vmatprep.mubr.msk.f32.mxu0 %vm571_vm4, %v8137_v31 }
0x1c65   :  { %6536 = vmatpush3.msra.mxu0 %v5908_v24 }
0x1c67   :  { %6533 = vmatmul.mubr.msk.f32.gmra.mrb[34].mxu0 %vm571_vm4, %v8135_v1 }
0x1c68   :  { %4809 = vrot.lane.b32.xlu1 %v8014_v60, %s8434_s29  ;;  %6537 = vmatprep.mubr.msk.f32.mxu0 %vm571_vm4, %v8086_v35 }
0x1c6b   :  { %6538 = vmatmul.mubr.msk.f32.vlgmr.msra.gmra.mrb[32].mxu0 %vm571_vm4, %v8084_v20 }
0x1c6c   :  { %6540 = vmatprep.mubr.msk.f32.mxu0 %vm571_vm4, %v8090_v28 }
0x1c6f   :  { %6541 = vmatmul.mubr.msk.f32.gmra.mrb[34].mxu0 %vm571_vm4, %v8088_v27 }
0x1cbf   :  { %v4426_v30 = vpop.xlane.xlu1 %4425 }
0x1cc3   :  { %v4423_v57 = vpop.xlane.xlu1 %4422 }
0x1cc4   :  { %7252 = vrcp.f32 %v4423_v57 }
0x1cc8   :  { %v4429_v21 = vpop.xlane.xlu0 %4428 }
0x1cc9   :  { %7254 = vrcp.f32 %v4429_v21 }
0x1cca   :  { %7256 = vrcp.f32 %v4426_v30 }
0x1ccc   :  { %v4432_v1 = vpop.xlane.xlu1 %4431  ;;  %v7087_v20 = vpop.permute.xlu0 %7086 }
0x1ccd   :  { %7258 = vrcp.f32 %v4432_v1  ;;  %v7089_v10 = vunpack.i.h.bf16 %v7087_v20  ;;  %v7088_v12 = vunpack.i.l.bf16 %v7087_v20 }
0x1cce   :  { %v7253_v60 = vpop.eup %7252 }
0x1ccf   :  { %v4434_v31 = vmul.f32 %v7253_v60, %v7247_v37  ;;  %v6856_v25 = vpack.c.bf16 %v7089_v10, %v7088_v12 }
0x1cd0   :  { %v7072_v35 = vpop.permute.xlu1 %7071 }
0x1cd1   :  { %v7074_v4 = vunpack.i.h.bf16 %v7072_v35  ;;  %v7073_v58 = vunpack.i.l.bf16 %v7072_v35  ;;  %6561 = vmatprep.mubr.msk.f32.mxu0 %vm147_vm2, %v4434_v31 }
0x1cd3   :  { %v7255_v28 = vpop.eup %7254  ;;  %v6842_v32 = vpack.c.bf16 %v7074_v4, %v7073_v58 }
0x1cd4   :  { %v7257_v6 = vpop.eup %7256  ;;  %v7077_v27 = vpop.permute.xlu1 %7076  ;;  %v4438_v41 = vmul.f32 %v7255_v28, %v7249_v63 }
0x1cd5   :  { %v7079_v13 = vunpack.i.h.bf16 %v7077_v27  ;;  %v7078_v14 = vunpack.i.l.bf16 %v7077_v27  ;;  %6843 = vmatprep.subr.bf16.mxu0 %v6842_v32  ;;  %v4436_v15 = vmul.f32 %v7257_v6, %v7245_v55 }
0x1cd6   :  { %6845 = vmatpush3.bf16.msra.mxu0 %v6842_v32  ;;  %6568 = vmatprep.mubr.msk.f32.mxu1 %vm147_vm2, %v4438_v41 }
0x1cd7   :  { %v6846_v7 = vpack.c.bf16 %v7079_v13, %v7078_v14  ;;  %6571 = vmatprep.subr.mxu0 %v5910_v9  ;;  %v7259_v16 = vpop.eup %7258 }
0x1cd8   :  { %v7082_v29 = vpop.permute.xlu1 %7081  ;;  %v4440_v26 = vmul.f32 %v7259_v16, %v7251_v8 }
0x1cd9   :  { %v7084_v17 = vunpack.i.h.bf16 %v7082_v29  ;;  %v7083_v18 = vunpack.i.l.bf16 %v7082_v29  ;;  %6562 = vmatmul.mubr.msk.f32.vlgmr.msra.gmra.mrb[36].mxu0 %vm147_vm2, %v4436_v15  ;;  %6847 = vmatprep.subr.bf16.mxu1 %v6846_v7 }
0x1cda   :  { %6849 = vmatpush3.bf16.msra.mxu1 %v6846_v7  ;;  %6572 = vmatpush3.msra.mxu0 %v5910_v9 }
0x1cdb   :  { %v6850_v36 = vpack.c.bf16 %v7084_v17, %v7083_v18  ;;  %6858 = vmatprep.subr.msk.bf16.mxu0 %vm7608_vm5, %v6856_v25 }
0x1cdc   :  { %v4717_v24 = vpop.permute.xlu1 %4716 }
0x1cdd   :  { %6569 = vmatmul.mubr.msk.f32.vlgmr.msra.gmra.mrb[48].mxu1 %vm147_vm2, %v4440_v26  ;;  %6852 = vmatprep.subr.msk.bf16.mxu1 %vm7608_vm5, %v6850_v36 }
0x1cde   :  { %6583 = vmatprep.mubr.msk.f32.mxu1 %vm571_vm4, %v4717_v24 }
0x1ce0   :  { %v4719_v48 = vpop.permute.xlu1 %4718 }
0x1ce3   :  { %6855 = vmatpush3.bf16.xpose.msk.msra.mxu1 %vm7608_vm5, %v6850_v36 }
0x1ce4   :  { %v4808_v38 = vpop.permute.xlu1 %4807 }
0x1ce8   :  { %v4810_v45 = vpop.permute.xlu1 %4809 }
0x1cea   :  { %6584 = vmatmul.mubr.msk.f32.vlgmr.msra.gmra.mrb[50].mxu1 %vm571_vm4, %v4719_v48 }
0x1dac   :  { %v6563_v49 = vpop.f32.mrb[36].mxu0 }
0x1dad   :  { %v4519_v33 = vpop.f32.mrb[37].mxu0 }
0x1dae   :  { %6573 = vmatprep.mubr.msk.f32.mxu0 %vm571_vm4, %v4519_v33 }
0x1daf   :  { %6574 = vmatmul.mubr.msk.f32.vlgmr.msra.gmra.mrb[32].mxu0 %vm571_vm4, %v6563_v49 }
0x1db0   :  { %6861 = vmatpush3.bf16.xpose.msk.msra.mxu0 %vm7608_vm5, %v6856_v25  ;;  %v6570_v40 = vpop.f32.mrb[48].mxu1 }
0x1db1   :  { %v4606_v42 = vpop.f32.mrb[49].mxu1 }
0x1db2   :  { %6576 = vmatprep.mubr.msk.f32.mxu0 %vm571_vm4, %v4606_v42 }
0x1db3   :  { %6577 = vmatmul.mubr.msk.f32.gmra.mrb[34].mxu0 %vm571_vm4, %v6570_v40  ;;  %v5911_v40 = vld [vmem:[%s8397_s9 + $0x38] sm:$0xff] }
0x1db4   :  { %6590 = vmatprep.mubr.msk.f32.mxu0 %vm571_vm4, %v4808_v38 }
0x1db7   :  { %6591 = vmatmul.mubr.msk.f32.vlgmr.msra.gmra.mrb[38].mxu0 %vm571_vm4, %v4810_v45 }
0x1dbd   :  { %v6585_v34 = vpop.f32.mrb[50].mxu1 }
0x1dbe   :  { %v4899_v47 = vmul.f32 0.35355338, %v6585_v34  ;;  %v4798_v52 = vpop.f32.mrb[51].mxu1 }
0x1dbf   :  { %v4898_v53 = vmul.f32 0.35355338, %v4798_v52  ;;  %v5977_v52 = vld [vmem:[%s8398_s10 + $0x1] ss:$0 sm:$0xff] }
0x1dc0   :  { %v4903_v55 = vadd.f32 %v4899_v47, %v7626_v59 }
0x1dc1   :  { %v4902_v51 = vadd.f32 %v4898_v53, %v7629_v61 }
0x1dc2   :  { %v4909_v46 = vsel %vm147_vm2, %v4903_v55, -inf }
0x1dc3   :  { %4910 = vmax.xlane.f32.xlu0 %v4909_v46  ;;  %v4906_v56 = vsel %vm147_vm2, %v4902_v51, -inf }
0x1dc4   :  { %4907 = vmax.xlane.f32.xlu1 %v4906_v56 }
0x1e50   :  { %v4911_v37 = vpop.xlane.xlu0 %4910 }
0x1e51   :  { %v4908_v62 = vpop.xlane.xlu1 %4907  ;;  %v4919_v63 = vsub.f32 %v4903_v55, %v4911_v37 }
0x1e52   :  { %v4918_v0 = vsub.f32 %v4902_v51, %v4908_v62 }
0x1e53   :  { %v4924_v8 = vmul.f32 1.442695, %v4919_v63 }
0x1e54   :  { %v4922_v3 = vmul.f32 1.442695, %v4918_v0 }
0x1e55   :  { %7260 = vpow2.f32 %v4924_v8 }
0x1e56   :  { %7262 = vpow2.f32 %v4922_v3 }
0x1e5f   :  { %v7261_v1 = vpop.eup %7260 }
0x1e60   :  { %v7263_v31 = vpop.eup %7262  ;;  %v4933_v35 = vsel %vm147_vm2, %v7261_v1, 0.0 }
0x1e61   :  { %v4930_v4 = vsel %vm147_vm2, %v7263_v31, 0.0 }
0x1e8a   :  { %v6592_v44 = vpop.f32.mrb[38].mxu0 }
0x1e8b   :  { %v4901_v22 = vmul.f32 0.35355338, %v6592_v44  ;;  %v4889_v30 = vpop.f32.mrb[39].mxu0 }
0x1e8c   :  { %v4900_v59 = vmul.f32 0.35355338, %v4889_v30 }
0x1e8d   :  { %v4905_v61 = vadd.f32 %v4901_v22, %v7631_v2 }
0x1e8e   :  { %v4904_v57 = vadd.f32 %v4900_v59, %v7642_v11 }
0x1e8f   :  { %v4915_v21 = vsel %vm147_vm2, %v4905_v61, -inf }
0x1e90   :  { %4916 = vmax.xlane.f32.xlu1 %v4915_v21  ;;  %v4912_v60 = vsel %vm147_vm2, %v4904_v57, -inf }
0x1e91   :  { %4913 = vmax.xlane.f32.xlu0 %v4912_v60 }
0x1e94   :  { %4934 = vadd.xlane.f32.xlu1 %v4933_v35 }
0x1e95   :  { %4931 = vadd.xlane.f32.xlu0 %v4930_v4 }
0x1f1d   :  { %v4917_v58 = vpop.xlane.xlu1 %4916 }
0x1f1e   :  { %v4921_v20 = vsub.f32 %v4905_v61, %v4917_v58  ;;  %v4914_v28 = vpop.xlane.xlu0 %4913 }
0x1f1f   :  { %v4920_v2 = vsub.f32 %v4904_v57, %v4914_v28 }
0x1f20   :  { %v4928_v32 = vmul.f32 1.442695, %v4921_v20 }
0x1f21   :  { %v4926_v11 = vmul.f32 1.442695, %v4920_v2  ;;  %v4935_v14 = vpop.xlane.xlu1 %4934 }
0x1f22   :  { %7264 = vpow2.f32 %v4928_v32  ;;  %v4932_v6 = vpop.xlane.xlu0 %4931 }
0x1f23   :  { %7266 = vpow2.f32 %v4926_v11 }
0x1f24   :  { %7268 = vrcp.f32 %v4932_v6 }
0x1f25   :  { %7270 = vrcp.f32 %v4935_v14  ;;  %v5985_v14 = vld [vmem:[%s8401_s13 + $0x38] sm:$0xff] }
0x1f2c   :  { %v7265_v27 = vpop.eup %7264 }
0x1f2d   :  { %v7267_v41 = vpop.eup %7266  ;;  %v4939_v9 = vsel %vm147_vm2, %v7265_v27, 0.0 }
0x1f2e   :  { %4940 = vadd.xlane.f32.xlu1 %v4939_v9  ;;  %v4936_v10 = vsel %vm147_vm2, %v7267_v41, 0.0  ;;  %v7269_v12 = vpop.eup %7268  ;;  %v5982_v9 = vld [vmem:[%s8401_s13 + $0x20] sm:$0xff] }
0x1f2f   :  { %4937 = vadd.xlane.f32.xlu0 %v4936_v10  ;;  %v4943_v13 = vmul.f32 %v7269_v12, %v7263_v31  ;;  %v7271_v48 = vpop.eup %7270  ;;  %v5983_v10 = vld [vmem:[%s8401_s13 + $0x28] sm:$0xff] }
0x1f30   :  { %v4945_v49 = vmul.f32 %v7271_v48, %v7261_v1  ;;  %v6870_v12 = vpack.c.bf16 %v5983_v10, %v5982_v9 }
0x1f31   :  { %6597 = vmatprep.mubr.msk.f32.mxu1 %vm147_vm2, %v4943_v13  ;;  %v5984_v13 = vld [vmem:[%s8401_s13 + $0x30] sm:$0xff] }
0x1f3f   :  { %7096 = vrot.lane.b32.xlu1 %v8024_v39, %s8435_s1 }
0x1f45   :  { %7091 = vrot.lane.b32.xlu0 %v8012_v23, %s8435_s1 }
0x1fbb   :  { %v4941_v15 = vpop.xlane.xlu1 %4940 }
0x1fbc   :  { %7272 = vrcp.f32 %v4941_v15  ;;  %v4938_v7 = vpop.xlane.xlu0 %4937  ;;  %v6874_v15 = vpack.c.bf16 %v5985_v14, %v5984_v13 }
0x1fbd   :  { %7274 = vrcp.f32 %v4938_v7 }
0x1fbf   :  { %v7097_v16 = vpop.permute.xlu1 %7096 }
0x1fc0   :  { %v7099_v29 = vunpack.i.h.bf16 %v7097_v16  ;;  %v7098_v25 = vunpack.i.l.bf16 %v7097_v16  ;;  %v7092_v17 = vpop.permute.xlu0 %7091 }
0x1fc1   :  { %v7094_v18 = vunpack.i.h.bf16 %v7092_v17  ;;  %v7093_v26 = vunpack.i.l.bf16 %v7092_v17 }
0x1fc2   :  { %v6866_v36 = vpack.c.bf16 %v7099_v29, %v7098_v25 }
0x1fc3   :  { %v6862_v24 = vpack.c.bf16 %v7094_v18, %v7093_v26 }
0x1fc4   :  { %6867 = vmatprep.subr.bf16.mxu0 %v6866_v36 }
0x1fc5   :  { %6863 = vmatprep.subr.bf16.mxu1 %v6862_v24  ;;  %6869 = vmatpush3.bf16.msra.mxu0 %v6866_v36 }
0x1fc6   :  { %v7273_v39 = vpop.eup %7272  ;;  %6865 = vmatpush3.bf16.msra.mxu1 %v6862_v24  ;;  %6607 = vmatprep.subr.mxu0 %v5911_v40 }
0x1fc7   :  { %v7275_v23 = vpop.eup %7274  ;;  %v4949_v38 = vmul.f32 %v7273_v39, %v7265_v27  ;;  %6871 = vmatprep.subr.bf16.mxu1 %v6870_v12 }
0x1fc8   :  { %v4947_v33 = vmul.f32 %v7275_v23, %v7267_v41 }
0x1fc9   :  { %6598 = vmatmul.mubr.msk.f32.vlgmr.msra.gmra.mrb[52].mxu1 %vm147_vm2, %v4945_v49 }
0x1fca   :  { %6604 = vmatprep.mubr.msk.f32.mxu0 %vm147_vm2, %v4947_v33  ;;  %6873 = vmatpush3.bf16.msra.mxu1 %v6870_v12  ;;  %v5980_v33 = vld [vmem:[%s8399_s11 + $0x1] ss:$0 sm:$0xff] }
0x1fcb   :  { %6605 = vmatmul.mubr.msk.f32.vlgmr.msra.gmra.mrb[40].mxu0 %vm147_vm2, %v4949_v38  ;;  %6875 = vmatprep.subr.bf16.mxu1 %v6874_v15 }
0x1fcc   :  { %6608 = vmatpush3.msra.mxu0 %v5911_v40 }
0x1fce   :  { %6877 = vmatpush3.bf16.msra.mxu1 %v6874_v15 }
0x209c   :  { %v6599_v42 = vpop.f32.mrb[52].mxu1 }
0x209d   :  { %v5028_v45 = vpop.f32.mrb[53].mxu1 }
0x209e   :  { %v6606_v34 = vpop.f32.mrb[40].mxu0  ;;  %6609 = vmatprep.mubr.msk.f32.mxu0 %vm571_vm4, %v5028_v45  ;;  %v5981_v45 = vld [vmem:[%s8400_s12 + $0x1] ss:$0 sm:$0xff] }
0x209f   :  { %v5115_v47 = vpop.f32.mrb[41].mxu0  ;;  %6610 = vmatmul.mubr.msk.f32.vlgmr.msra.gmra.mrb[32].mxu0 %vm571_vm4, %v6599_v42 }
0x20a0   :  { %6612 = vmatprep.mubr.msk.f32.mxu0 %vm571_vm4, %v5115_v47 }
0x20a3   :  { %6613 = vmatmul.mubr.msk.f32.gmra.mrb[34].mxu0 %vm571_vm4, %v6606_v34 }
0x2172   :  { %v6611_v53 = vpop.f32.mrb[32].mxu0 }
0x2173   :  { %v5234_v55 = vadd.f32 %v6611_v53, %v5977_v52  ;;  %v5202_v51 = vpop.f32.mrb[33].mxu0 }
0x2174   :  { %v5233_v46 = vadd.f32 %v5977_v52, %v5202_v51 }
0x2175   :  { %v5238_v56 = vadd.f32 %v5234_v55, %v7987_v50 }
0x2176   :  { %v5237_v37 = vadd.f32 %v5233_v46, %v7985_v43  ;;  %v6614_v62 = vpop.f32.mrb[34].mxu0 }
0x2177   :  { %v5236_v63 = vadd.f32 %v6614_v62, %v5977_v52  ;;  %v5212_v0 = vpop.f32.mrb[35].mxu0  ;;  %v5248_v8 = vsel %vm371_vm3, %v5238_v56, 0.0 }
0x2178   :  { %v5235_v3 = vadd.f32 %v5977_v52, %v5212_v0  ;;  %5249 = vadd.xlane.f32.xlu0 %v5248_v8  ;;  %v5245_v44 = vsel %vm371_vm3, %v5237_v37, 0.0  ;;  %v5992_v8 = vld [vmem:[%s8403_s15 + $0x40] sm:$0xff] }
0x2179   :  { %v5240_v22 = vadd.f32 %v5236_v63, %v7995_v19  ;;  %5246 = vadd.xlane.f32.xlu1 %v5245_v44 }
0x217a   :  { %v5239_v30 = vadd.f32 %v5235_v3, %v7993_v54  ;;  %v5993_v3 = vld [vmem:[%s8403_s15 + $0x48] sm:$0xff] }
0x217b   :  { %v5254_v59 = vsel %vm371_vm3, %v5240_v22, 0.0  ;;  %v6878_v44 = vpack.c.bf16 %v5993_v3, %v5992_v8 }
0x217c   :  { %v5251_v50 = vsel %vm371_vm3, %v5239_v30, 0.0 }
0x217d   :  { %5255 = vadd.xlane.f32.xlu1 %v5254_v59  ;;  %5252 = vadd.xlane.f32.xlu0 %v5251_v50  ;;  %v5996_v50 = vld [vmem:[%s8403_s15 + $0x60] sm:$0xff] }
0x217e   :  { %6879 = vmatprep.subr.bf16.mxu0 %v6878_v44 }
0x217f   :  { %6881 = vmatpush3.bf16.msra.mxu0 %v6878_v44 }
0x2205   :  { %v5250_v43 = vpop.xlane.xlu0 %5249 }
0x2206   :  { %v5258_v61 = vmul.f32 0.03125, %v5250_v43  ;;  %v5247_v57 = vpop.xlane.xlu1 %5246  ;;  %v5997_v43 = vld [vmem:[%s8403_s15 + $0x68] sm:$0xff] }
0x2207   :  { %v5257_v21 = vmul.f32 0.03125, %v5247_v57  ;;  %v5998_v57 = vld [vmem:[%s8403_s15 + $0x70] sm:$0xff] }
0x2208   :  { %v5262_v1 = vsub.f32 %v5238_v56, %v5258_v61  ;;  %v6886_v61 = vpack.c.bf16 %v5997_v43, %v5996_v50 }
0x2209   :  { %v5261_v60 = vsub.f32 %v5237_v37, %v5257_v21  ;;  %v5999_v21 = vld [vmem:[%s8403_s15 + $0x78] sm:$0xff] }
0x220a   :  { %v5256_v31 = vpop.xlane.xlu1 %5255  ;;  %v5253_v35 = vpop.xlane.xlu0 %5252  ;;  %v5266_v4 = vmul.f32 %v5262_v1, %v5262_v1 }
0x220b   :  { %v5260_v58 = vmul.f32 0.03125, %v5256_v31  ;;  %v5259_v19 = vmul.f32 0.03125, %v5253_v35  ;;  %v5265_v20 = vmul.f32 %v5261_v60, %v5261_v60 }
0x220c   :  { %v5272_v54 = vsel %vm371_vm3, %v5266_v4, 0.0 }
0x220d   :  { %v5264_v28 = vsub.f32 %v5240_v22, %v5260_v58  ;;  %v5263_v2 = vsub.f32 %v5239_v30, %v5259_v19  ;;  %5273 = vadd.xlane.f32.xlu1 %v5272_v54  ;;  %v5269_v32 = vsel %vm371_vm3, %v5265_v20, 0.0  ;;  %v5994_v22 = vld [vmem:[%s8403_s15 + $0x50] sm:$0xff]  ;;  %v5995_v30 = vld [vmem:[%s8403_s15 + $0x58] sm:$0xff] }
0x220e   :  { %5270 = vadd.xlane.f32.xlu0 %v5269_v32  ;;  %v6882_v59 = vpack.c.bf16 %v5995_v30, %v5994_v22 }
0x220f   :  { %v5268_v11 = vmul.f32 %v5264_v28, %v5264_v28  ;;  %v5267_v6 = vmul.f32 %v5263_v2, %v5263_v2 }
0x2210   :  { %6883 = vmatprep.subr.bf16.mxu0 %v6882_v59 }
0x2211   :  { %v5278_v27 = vsel %vm371_vm3, %v5268_v11, 0.0  ;;  %v5275_v41 = vsel %vm371_vm3, %v5267_v6, 0.0  ;;  %6885 = vmatpush3.bf16.msra.mxu0 %v6882_v59 }
0x2212   :  { %5279 = vadd.xlane.f32.xlu1 %v5278_v27  ;;  %5276 = vadd.xlane.f32.xlu0 %v5275_v41 }
0x2213   :  { %6887 = vmatprep.subr.bf16.mxu0 %v6886_v61 }
0x2215   :  { %6889 = vmatpush3.bf16.msra.mxu0 %v6886_v61 }
0x229a   :  { %v5274_v7 = vpop.xlane.xlu1 %5273 }
0x229b   :  { %v5282_v16 = vmul.f32 0.03125, %v5274_v7  ;;  %v5271_v29 = vpop.xlane.xlu0 %5270 }
0x229c   :  { %v5281_v25 = vmul.f32 0.03125, %v5271_v29 }
0x229d   :  { %v5286_v17 = vadd.f32 1e-05, %v5282_v16 }
0x229e   :  { %v5285_v18 = vadd.f32 1e-05, %v5281_v25 }
0x229f   :  { %7276 = vrsqrt.f32 %v5286_v17  ;;  %v5280_v26 = vpop.xlane.xlu1 %5279  ;;  %v5277_v36 = vpop.xlane.xlu0 %5276 }
0x22a0   :  { %7278 = vrsqrt.f32 %v5285_v18  ;;  %v5284_v24 = vmul.f32 0.03125, %v5280_v26  ;;  %v5283_v48 = vmul.f32 0.03125, %v5277_v36 }
0x22a2   :  { %v5288_v39 = vadd.f32 1e-05, %v5284_v24  ;;  %v5287_v23 = vadd.f32 1e-05, %v5283_v48 }
0x22a4   :  { %7280 = vrsqrt.f32 %v5288_v39 }
0x22a5   :  { %7282 = vrsqrt.f32 %v5287_v23 }
0x22a9   :  { %v7277_v49 = vpop.eup %7276 }
0x22aa   :  { %v7279_v38 = vpop.eup %7278  ;;  %v5294_v40 = vmul.f32 %v7277_v49, %v5262_v1  ;;  %v6890_v1 = vpack.c.bf16 %v5999_v21, %v5998_v57 }
0x22ab   :  { %v5293_v42 = vmul.f32 %v7279_v38, %v5261_v60  ;;  %v5987_v60 = vld [vmem:[%s8402_s14 + $0x1] ss:$0 sm:$0xff] }
0x22ac   :  { %v5304_v34 = vmul.f32 %v5980_v33, %v5294_v40  ;;  %6891 = vmatprep.subr.bf16.mxu0 %v6890_v1 }
0x22ad   :  { %v5303_v47 = vmul.f32 %v5980_v33, %v5293_v42  ;;  %6893 = vmatpush3.bf16.msra.mxu0 %v6890_v1 }
0x22ae   :  { %v7281_v52 = vpop.eup %7280  ;;  %v5314_v46 = vadd.f32 %v5981_v45, %v5304_v34 }
0x22af   :  { %v7283_v53 = vpop.eup %7282  ;;  %v8271_v55 = vadd.f32 %v5981_v45, %v5303_v47  ;;  %v5296_v51 = vmul.f32 %v7281_v52, %v5264_v28 }
0x22b0   :  { %v5295_v56 = vmul.f32 %v7283_v53, %v5263_v2 }
0x22b1   :  { %6623 = vmatprep.mubr.msk.f32.mxu1 %vm371_vm3, %v8271_v55  ;;  %v5306_v37 = vmul.f32 %v5980_v33, %v5296_v51 }
0x22b2   :  { %6624 = vmatmul.mubr.msk.f32.vlgmr.msra.gmra.mrb[54].mxu1 %vm371_vm3, %v5314_v46  ;;  %v5305_v62 = vmul.f32 %v5980_v33, %v5295_v56 }
0x22b3   :  { %v5316_v63 = vadd.f32 %v5981_v45, %v5306_v37 }
0x22b4   :  { %v8276_v0 = vadd.f32 %v5981_v45, %v5305_v62 }
0x22b6   :  { %6626 = vmatprep.mubr.msk.f32.mxu1 %vm371_vm3, %v8276_v0 }
0x22b7   :  { %6627 = vmatmul.mubr.msk.f32.gmra.mrb[56].mxu1 %vm371_vm3, %v5316_v63 }
0x22b8   :  { %6659 = vmatprep.mubr.msk.f32.mxu1 %vm7346_vm15, %v7333_v5 }
0x2385   :  { %v6625_v31 = vpop.f32.mrb[54].mxu1 }
0x2386   :  { %v8308_v35 = vadd.f32 %v6625_v31, %v5987_v60  ;;  %v5408_v4 = vpop.f32.mrb[55].mxu1 }
0x2387   :  { %v8310_v58 = vadd.f32 %v5987_v60, %v5408_v4 }
0x2388   :  { %v8313_v19 = vmul.f32 0.70710677, %v8308_v35 }
0x2389   :  { %v8316_v20 = vmul.f32 0.70710677, %v8310_v58 }
0x238a   :  { %v5436_v54 = vand.u32 2147483647, %v8313_v19  ;;  %v6628_v28 = vpop.f32.mrb[56].mxu1  ;;  %vm5516_vm11 = vcmp.ge.f32.partialorder %v8313_v19, 0.0 }
0x238b   :  { %v5435_v2 = vand.u32 2147483647, %v8316_v20  ;;  %v8320_v32 = vadd.f32 %v6628_v28, %v5987_v60  ;;  %v5418_v11 = vpop.f32.mrb[57].mxu1  ;;  %vm5515_vm12 = vcmp.ge.f32.partialorder %v8316_v20, 0.0 }
0x238c   :  { %v5440_v6 = vmul.f32 0.3275911, %v5436_v54  ;;  %v8322_v27 = vadd.f32 %v5987_v60, %v5418_v11  ;;  %v5492_v17 = vsub.f32 0.0, %v5436_v54 }
0x238d   :  { %v5439_v41 = vmul.f32 0.3275911, %v5435_v2  ;;  %v8325_v9 = vmul.f32 0.70710677, %v8320_v32  ;;  %v5491_v18 = vsub.f32 0.0, %v5435_v2 }
0x238e   :  { %v5444_v10 = vadd.f32 1.0, %v5440_v6  ;;  %v8328_v12 = vmul.f32 0.70710677, %v8322_v27  ;;  %v5496_v36 = vmul.f32 %v5492_v17, %v5436_v54 }
0x238f   :  { %v5443_v13 = vadd.f32 1.0, %v5439_v41  ;;  %v5438_v14 = vand.u32 2147483647, %v8325_v9  ;;  %v5495_v39 = vmul.f32 %v5491_v18, %v5435_v2  ;;  %vm5518_vm13 = vcmp.ge.f32.partialorder %v8325_v9, 0.0  ;;  %v6001_v9 = vld [vmem:[%s8404_s16 + $0x1] ss:$0 sm:$0xff] }
0x2390   :  { %7284 = vrcp.f32 %v5444_v10  ;;  %v5437_v15 = vand.u32 2147483647, %v8328_v12  ;;  %v5501_v40 = vmul.f32 1.442695, %v5496_v36  ;;  %vm5517_vm14 = vcmp.ge.f32.partialorder %v8328_v12, 0.0 }
0x2391   :  { %7286 = vrcp.f32 %v5443_v13  ;;  %v5442_v7 = vmul.f32 0.3275911, %v5438_v14  ;;  %v5494_v23 = vsub.f32 0.0, %v5438_v14  ;;  %v5499_v47 = vmul.f32 1.442695, %v5495_v39 }
0x2392   :  { %v5441_v16 = vmul.f32 0.3275911, %v5437_v15  ;;  %v5493_v33 = vsub.f32 0.0, %v5437_v15 }
0x2393   :  { %v5446_v29 = vadd.f32 1.0, %v5442_v7  ;;  %v5498_v52 = vmul.f32 %v5494_v23, %v5438_v14 }
0x2394   :  { %v5445_v25 = vadd.f32 1.0, %v5441_v16  ;;  %v5497_v56 = vmul.f32 %v5493_v33, %v5437_v15 }
0x2395   :  { %7288 = vrcp.f32 %v5446_v29  ;;  %v5505_v44 = vmul.f32 1.442695, %v5498_v52  ;;  %v5427_v52 = vmul.f32 0.5, %v8310_v58 }
0x2396   :  { %7290 = vrcp.f32 %v5445_v25  ;;  %v5503_v50 = vmul.f32 1.442695, %v5497_v56 }
0x2397   :  { %7292 = vpow2.f32 %v5501_v40 }
0x2398   :  { %7294 = vpow2.f32 %v5499_v47 }
0x2399   :  { %7296 = vpow2.f32 %v5505_v44 }
0x239a   :  { %v7285_v26 = vpop.eup %7284  ;;  %7298 = vpow2.f32 %v5503_v50 }
0x239b   :  { %v7287_v24 = vpop.eup %7286  ;;  %v5456_v48 = vmul.f32 1.0614054, %v7285_v26 }
0x239c   :  { %v5455_v49 = vmul.f32 1.0614054, %v7287_v24 }
0x239d   :  { %v5460_v38 = vadd.f32 -1.4531521, %v5456_v48 }
0x239e   :  { %v5459_v42 = vadd.f32 -1.4531521, %v5455_v49 }
0x239f   :  { %v7289_v45 = vpop.eup %7288  ;;  %v5464_v34 = vmul.f32 %v7285_v26, %v5460_v38 }
0x23a0   :  { %v7291_v53 = vpop.eup %7290  ;;  %v5463_v51 = vmul.f32 %v7287_v24, %v5459_v42  ;;  %v5458_v46 = vmul.f32 1.0614054, %v7289_v45 }
0x23a1   :  { %v5468_v37 = vadd.f32 1.4214138, %v5464_v34  ;;  %v5457_v62 = vmul.f32 1.0614054, %v7291_v53  ;;  %v7293_v10 = vpop.eup %7292 }
0x23a2   :  { %v5467_v63 = vadd.f32 1.4214138, %v5463_v51  ;;  %v5462_v8 = vadd.f32 -1.4531521, %v5458_v46  ;;  %v7295_v15 = vpop.eup %7294 }
0x23a3   :  { %v5472_v3 = vmul.f32 %v7285_v26, %v5468_v37  ;;  %v5461_v22 = vadd.f32 -1.4531521, %v5457_v62  ;;  %v7297_v39 = vpop.eup %7296 }
0x23a4   :  { %v5471_v30 = vmul.f32 %v7287_v24, %v5467_v63  ;;  %v5466_v59 = vmul.f32 %v7289_v45, %v5462_v8  ;;  %v7299_v33 = vpop.eup %7298  ;;  %v5429_v8 = vmul.f32 0.5, %v8322_v27 }
0x23a5   :  { %v5476_v43 = vadd.f32 -0.28449672, %v5472_v3  ;;  %v5465_v61 = vmul.f32 %v7291_v53, %v5461_v22 }
0x23a6   :  { %v5475_v57 = vadd.f32 -0.28449672, %v5471_v30  ;;  %v5470_v21 = vadd.f32 1.4214138, %v5466_v59 }
0x23a7   :  { %v5480_v1 = vmul.f32 %v7285_v26, %v5476_v43  ;;  %v5469_v60 = vadd.f32 1.4214138, %v5465_v61 }
0x23a8   :  { %v5479_v31 = vmul.f32 %v7287_v24, %v5475_v57  ;;  %v5474_v4 = vmul.f32 %v7289_v45, %v5470_v21 }
0x23a9   :  { %v5484_v54 = vadd.f32 0.2548296, %v5480_v1  ;;  %v5473_v28 = vmul.f32 %v7291_v53, %v5469_v60 }
0x23aa   :  { %v5483_v2 = vadd.f32 0.2548296, %v5479_v31  ;;  %v5478_v11 = vadd.f32 -0.28449672, %v5474_v4 }
0x23ab   :  { %v5488_v6 = vmul.f32 %v7285_v26, %v5484_v54  ;;  %v5477_v41 = vadd.f32 -0.28449672, %v5473_v28 }
0x23ac   :  { %v5487_v13 = vmul.f32 %v7287_v24, %v5483_v2  ;;  %v5482_v14 = vmul.f32 %v7289_v45, %v5478_v11 }
0x23ad   :  { %v5508_v7 = vmul.f32 %v7293_v10, %v5488_v6  ;;  %v5481_v16 = vmul.f32 %v7291_v53, %v5477_v41  ;;  %v5696_v6 = vld [vmem:[%s8407_s19 + $0x8] sm:$0xff]  ;;  %v7345_v10 = vmov 0.0|0.0  }
0x23ae   :  { %v5507_v29 = vmul.f32 %v7295_v15, %v5487_v13  ;;  %v5486_v25 = vadd.f32 0.2548296, %v5482_v14  ;;  %6894 = vmatprep.subr.bf16.mxu1 %v7345_v10  ;;  %v5697_v13 = vld [vmem:[%s8407_s19 + $0x10] sm:$0xff]  ;;  %v5698_v14 = vld [vmem:[%s8407_s19 + $0x18] sm:$0xff] }
0x23af   :  { %v5512_v17 = vsub.f32 1.0, %v5508_v7  ;;  %v5485_v18 = vadd.f32 0.2548296, %v5481_v16  ;;  %v6898_v15 = vpack.c.bf16 %v5698_v14, %v5697_v13 }
0x23b0   :  { %v5511_v36 = vsub.f32 1.0, %v5507_v29  ;;  %v5490_v48 = vmul.f32 %v7289_v45, %v5486_v25  ;;  %v5428_v45 = vmul.f32 0.5, %v8308_v35  ;;  %v5430_v35 = vmul.f32 0.5, %v8320_v32 }
0x23b1   :  { %v5520_v23 = vsub.f32 0.0, %v5512_v17  ;;  %v5489_v49 = vmul.f32 %v7291_v53, %v5485_v18 }
0x23b2   :  { %v5519_v26 = vsub.f32 0.0, %v5511_v36  ;;  %v5510_v38 = vmul.f32 %v7297_v39, %v5490_v48 }
0x23b3   :  { %v5524_v40 = vsel %vm5516_vm11, %v5512_v17, %v5520_v23  ;;  %v5509_v24 = vmul.f32 %v7299_v33, %v5489_v49  ;;  %v6008_v23 = vld [vmem:[%s8405_s17 + $0x1] ss:$0 sm:$0xff]  ;;  %s7347_s17 = smov [#allocation2]  }
0x23b4   :  { %v5528_v42 = vadd.f32 1.0, %v5524_v40  ;;  %v5523_v34 = vsel %vm5515_vm12, %v5511_v36, %v5519_v26  ;;  %v5514_v47 = vsub.f32 1.0, %v5510_v38  ;;  %v6009_v26 = vld [vmem:[%s8406_s18 + $0x1] ss:$0 sm:$0xff]  ;;  %s5797_s18 = sshll.u32 %s7347_s17, 4  ;;  %s5798_s18 = int_to_ptr.vmem [resolvable:$true] %s5797_s18 }
0x23b5   :  { %v5527_v51 = vadd.f32 1.0, %v5523_v34  ;;  %v5513_v46 = vsub.f32 1.0, %v5509_v24  ;;  %v6010_v34 = vld [vmem:[%s8408_s20] ss:$0 sm:$0xff]  ;;  %s7308_s22 = scalar_lea.vmem %s5798_s18, 32  ;;  %p7313_p1 = scmp.lt.s32.totalorder %s5798_s18, %s5798_s18 }
0x23b6   :  { %v5522_v56 = vsub.f32 0.0, %v5514_v47  ;;  %v5532_v37 = vmul.f32 %v5528_v42, %v5428_v45  ;;  %p7309_p0 = scmp.ne.s32.totalorder %s5798_s18, %s7308_s22  ;;  %p7314_p2 = scmp.lt.s32.totalorder %s7308_s22, %s7308_s22 }
0x23b7   :  { %v5531_v53 = vmul.f32 %v5527_v51, %v5427_v52  ;;  %v5521_v19 = vsub.f32 0.0, %v5513_v46 }
0x23b8   :  { %v5526_v62 = vsel %vm5518_vm13, %v5514_v47, %v5522_v56  ;;  %p7315_p3 = por %p7314_p2, %p7313_p1 }
0x23b9   :  { %v5530_v20 = vadd.f32 1.0, %v5526_v62  ;;  %v5525_v63 = vsel %vm5517_vm14, %v5513_v46, %v5521_v19  ;;  %6645 = vmatprep.mubr.msk.f32.mxu0 %vm2910_vm8, %v5531_v53 }
0x23ba   :  { %v5529_v58 = vadd.f32 1.0, %v5525_v63  ;;  %6646 = vmatmul.mubr.msk.f32.vlgmr.msra.gmra.mrb[42].mxu0 %vm2910_vm8, %v5532_v37  ;;  %p7316_p4 = pnand %p7315_p3, %p7309_p0 }
0x23bb   :  { %v5534_v44 = vmul.f32 %v5530_v20, %v5430_v35 }
0x23bc   :  { %v5533_v3 = vmul.f32 %v5529_v58, %v5429_v8 }
0x23be   :  { %6648 = vmatprep.mubr.msk.f32.mxu0 %vm2910_vm8, %v5533_v3 }
0x23bf   :  { %6649 = vmatmul.mubr.msk.f32.gmra.mrb[44].mxu0 %vm2910_vm8, %v5534_v44 }
0x248d   :  { %v6647_v12 = vpop.f32.mrb[42].mxu0 }
0x248e   :  { %v5630_v22 = vpop.f32.mrb[43].mxu0 }
0x248f   :  { %v5631_v30 = vadd.f32 %v6001_v9, %v5630_v22 }
0x2491   :  { %v5647_v27 = vadd.f32 %v5631_v30, %v8271_v55 }
0x2492   :  { %v6650_v59 = vpop.f32.mrb[44].mxu0 }
0x2493   :  { %v5639_v50 = vpop.f32.mrb[45].mxu0  ;;  %v5653_v43 = vsel %vm371_vm3, %v5647_v27, 0.0 }
0x2494   :  { %v5640_v32 = vadd.f32 %v6001_v9, %v5639_v50  ;;  %5654 = vadd.xlane.f32.xlu1 %v5653_v43 }
0x2496   :  { %v5648_v61 = vadd.f32 %v5640_v32, %v8276_v0  ;;  %v5695_v0 = vld [vmem:[%s8407_s19] sm:$0xff] }
0x2497   :  { %v6895_v41 = vpack.c.bf16 %v5696_v6, %v5695_v0 }
0x2498   :  { %v5656_v57 = vsel %vm371_vm3, %v5648_v61, 0.0 }
0x2499   :  { %5657 = vadd.xlane.f32.xlu0 %v5656_v57  ;;  %6896 = vmatpush3.bf16.msra.mxu1 %v6895_v41 }
0x249a   :  { %6897 = vmatprep.subr.bf16.mxu1 %v7345_v10 }
0x249d   :  { %6899 = vmatpush3.bf16.msra.mxu1 %v6898_v15 }
0x2521   :  { %v5655_v21 = vpop.xlane.xlu1 %5654 }
0x2522   :  { %v5659_v1 = vmul.f32 0.03125, %v5655_v21 }
0x2524   :  { %v5661_v60 = vsub.f32 %v5647_v27, %v5659_v1 }
0x2526   :  { %v5658_v31 = vpop.xlane.xlu0 %5657  ;;  %v5663_v4 = vmul.f32 %v5661_v60, %v5661_v60 }
0x2527   :  { %v5660_v54 = vmul.f32 0.03125, %v5658_v31 }
0x2528   :  { %v5665_v28 = vsel %vm371_vm3, %v5663_v4, 0.0 }
0x2529   :  { %v5662_v55 = vsub.f32 %v5648_v61, %v5660_v54  ;;  %5666 = vadd.xlane.f32.xlu1 %v5665_v28 }
0x252b   :  { %v5664_v2 = vmul.f32 %v5662_v55, %v5662_v55 }
0x252d   :  { %v5668_v11 = vsel %vm371_vm3, %v5664_v2, 0.0 }
0x252e   :  { %5669 = vadd.xlane.f32.xlu0 %v5668_v11 }
0x25b6   :  { %v5667_v7 = vpop.xlane.xlu1 %5666 }
0x25b7   :  { %v5671_v16 = vmul.f32 0.03125, %v5667_v7 }
0x25b9   :  { %v5673_v29 = vadd.f32 1e-05, %v5671_v16 }
0x25bb   :  { %v5670_v25 = vpop.xlane.xlu0 %5669  ;;  %7300 = vrsqrt.f32 %v5673_v29 }
0x25bc   :  { %v5672_v17 = vmul.f32 0.03125, %v5670_v25 }
0x25be   :  { %v5674_v18 = vadd.f32 1e-05, %v5672_v17 }
0x25c0   :  { %7302 = vrsqrt.f32 %v5674_v18 }
0x25c5   :  { %v7301_v36 = vpop.eup %7300 }
0x25c6   :  { %v5677_v48 = vmul.f32 %v7301_v36, %v5661_v60 }
0x25c8   :  { %v5685_v33 = vmul.f32 %v6008_v23, %v5677_v48 }
0x25ca   :  { %v7303_v39 = vpop.eup %7302  ;;  %v5693_v40 = vadd.f32 %v6009_v26, %v5685_v33 }
0x25cb   :  { %v5678_v49 = vmul.f32 %v7303_v39, %v5662_v55 }
0x25cd   :  { %v5686_v5 = vmul.f32 %v6008_v23, %v5678_v49 }
0x25cf   :  { %v5694_v38 = vadd.f32 %v6009_v26, %v5686_v5 }
0x25d1   :  { %v5708_v24 = vrot.slane %v5694_v38, 7 }
0x25d3   :  { %v5710_v42 = vsel %vm5709_vm0, %v5708_v24, %v5693_v40 }
0x25d4   :  { %6660 = vmatmul.mubr.msk.f32.vlgmr.msra.gmra.mrb[58].mxu1 %vm371_vm3, %v5710_v42 }
0x26a7   :  { %v5779_v47 = vpop.f32.mrb[58].mxu1 }
0x26a8   :  { %v5780_v52 = vadd.f32 %v6010_v34, %v5779_v47  ;;  %v6661_v51 = vpop.f32.mrb[59].mxu1 }
0x26aa   :  { %v5783_v46 = vsub.f32 0.0, %v5780_v52 }
0x26ac   :  { %v5784_v45 = vmul.f32 1.442695, %v5783_v46 }
0x26ae   :  { %7304 = vpow2.f32 %v5784_v45 }
0x26b8   :  { %v7305_v56 = vpop.eup %7304 }
0x26b9   :  { %v5786_v53 = vadd.f32 1.0, %v7305_v56 }
0x26bb   :  { %7306 = vrcp.f32 %v5786_v53 }
0x26c5   :  { %v7307_v19 = vpop.eup %7306 }
0x26c6   :  { %5790 = vst.msk [vmem:[#allocation2] sm:$0x3] %vm5789_vm1, %v7307_v19 }
0x26c7   :  { %7319 = shalt.err (!%p7316_p4)
}
0x26c8   :  { %s7320_s6 = scalar_lea.hbm %s8409_s21, 32 }
0x26c9   :  { %p7321_p5 = scmp.ne.s32.totalorder %s8409_s21, %s7320_s6  ;;  %p7324_p6 = scmp.lt.u32.totalorder %s7320_s6, %s8409_s21 }
0x26cb   :  { %p7326_p7 = pnand %p7324_p6, %p7321_p5 }
0x26cd   :  { %7329 = shalt.err (!%p7326_p7)
}
0x26ce   :  { %5800 = dma.vmem_to_hbm [thread:$0]  %s5798_s18, 32, %s8409_s21, [#allocation3]  }
0x26cf   :  { %7330 = dma.done.wait [#allocation3], 32  }
0x26d0   :  { %7331 = vsyncadd [#allocation3], 4294967264 }
0x26d1   :  { %5804 = vsyncpa [#allocation3], 1 }

</bundles_post_ra>
